<compile_context>
chip_gen: v5e
topology: v5e:2x2
jax: 0.10.0
libtpu: 0.0.40
codegen_flags: <defaults>
</compile_context>

<pallas_src>
import functools

import jax
import jax.numpy as jnp
from jax.experimental import pallas as pl
from jax.experimental.pallas import tpu as pltpu


def _vmem_limit_bytes():
    # Per-generation scoped-VMEM budget (review: don't hard-code 32 MiB).
    try:
        cap = int(pltpu.get_tpu_info().vmem_capacity_bytes)
    except Exception:
        cap = 64 * 1024 * 1024                     # conservative (v7x-sized) fallback
    return min(cap * 3 // 4, 96 * 1024 * 1024)     # ~96 MiB v5e/v6e, ~48 MiB v7x


def _compiler_params():
    return pltpu.CompilerParams(
        dimension_semantics=("parallel",),         # batch axis -> both TCs on v7x
        vmem_limit_bytes=_vmem_limit_bytes(),
    )


# ---------------------------------------------------------------------------
# Fused Block kernel: [ReLU -> dw3x3 -> pw1x1(BN folded)] x reps
#                     -> [3x3/stride-s maxpool] -> + (identity | BN(1x1/s conv)) skip
# ---------------------------------------------------------------------------
def _block_kernel(*refs, units, strides, has_skip, dims):
    H, W, Ho, Wo, cin0, cout_f, cpad = dims
    Hp, Wp = H + 2, W + 2
    s = strides

    it = iter(refs)
    x_ref = next(it)                                   # (H, W, cin0)
    unit_refs = [(next(it), next(it), next(it)) for _ in range(len(units))]
    if has_skip:
        wsk_ref, sb_ref = next(it), next(it)
    o_ref = next(it)                                   # (Ho, Wo, cout_f)
    pad_ref = next(it)                                 # (Hp, Wp, cpad) scratch
    if s != 1:
        row_ref = next(it)                             # (Ho, Wp, cout_f) scratch
        xs_ref = next(it)                              # (Ho, W,  cin0)  scratch

    # ---- zero the pad borders ONCE; reused by every unit's depthwise ------------
    pad_ref[0:1, :, :] = jnp.zeros((1, Wp, cpad), jnp.float32)
    pad_ref[Hp - 1:Hp, :, :] = jnp.zeros((1, Wp, cpad), jnp.float32)
    pad_ref[:, 0:1, :] = jnp.zeros((Hp, 1, cpad), jnp.float32)
    pad_ref[:, Wp - 1:Wp, :] = jnp.zeros((Hp, 1, cpad), jnp.float32)

    # ---- rep units: activation `h` stays on-chip (value / VMEM), never hits HBM --
    h = x_ref[...]                                     # (H, W, cin0) f32
    for u, (cin, cout, relu) in enumerate(units):
        wd_ref, wp_ref, b_ref = unit_refs[u]
        src = jnp.maximum(h, 0.0) if relu else h       # relu(0)==0 keeps pad valid
        pad_ref[1:H + 1, 1:W + 1, 0:cin] = src

        wdb = wd_ref[...].reshape(9, 1, 1, cin)        # hoisted weight broadcast
        acc = pad_ref[0:H, 0:W, 0:cin] * wdb[0]        # per-tap ref slices, f32 acc
        for k in range(1, 9):
            ky, kx = divmod(k, 3)
            acc = acc + pad_ref[ky:ky + H, kx:kx + W, 0:cin] * wdb[k]

        # pointwise 1x1 (BN scale folded into wp); bf16 operands, f32 accumulation
        y = jnp.dot(acc.reshape(H * W, cin).astype(jnp.bfloat16), wp_ref[...],
                    preferred_element_type=jnp.float32).reshape(H, W, cout)
        h = y + b_ref[...].reshape(1, 1, cout)

    # ---- tail -------------------------------------------------------------------
    if s != 1:
        # 3x3 / stride-s / pad-1 max-pool (PyTorch pads with -inf -> any real wins).
        neg = jnp.float32(-1e30)
        pad_ref[0:1, :, 0:cout_f] = jnp.full((1, Wp, cout_f), neg, jnp.float32)
        pad_ref[Hp - 1:Hp, :, 0:cout_f] = jnp.full((1, Wp, cout_f), neg, jnp.float32)
        pad_ref[:, 0:1, 0:cout_f] = jnp.full((Hp, 1, cout_f), neg, jnp.float32)
        pad_ref[:, Wp - 1:Wp, 0:cout_f] = jnp.full((Hp, 1, cout_f), neg, jnp.float32)
        pad_ref[1:H + 1, 1:W + 1, 0:cout_f] = h

        # row pass: stride along H (major axis), all-slice indexers only
        rowmax = pad_ref[pl.ds(0, Ho, stride=s), :, 0:cout_f]
        rowmax = jnp.maximum(rowmax, pad_ref[pl.ds(1, Ho, stride=s), :, 0:cout_f])
        rowmax = jnp.maximum(rowmax, pad_ref[pl.ds(2, Ho, stride=s), :, 0:cout_f])
        row_ref[...] = rowmax
        # column pass: stride along W (one strided axis per read for robust lowering)
        pooled = row_ref[:, pl.ds(0, Wo, stride=s), :]
        pooled = jnp.maximum(pooled, row_ref[:, pl.ds(1, Wo, stride=s), :])
        pooled = jnp.maximum(pooled, row_ref[:, pl.ds(2, Wo, stride=s), :])
    else:
        pooled = h

    if has_skip:
        if s != 1:
            xs_ref[...] = x_ref[pl.ds(0, Ho, stride=s), :, :]    # strided on H only
            xs = xs_ref[:, pl.ds(0, Wo, stride=s), :]            # strided on W only
        else:
            xs = x_ref[...]
        sk = jnp.dot(xs.reshape(Ho * Wo, cin0).astype(jnp.bfloat16), wsk_ref[...],
                     preferred_element_type=jnp.float32).reshape(Ho, Wo, cout_f)
        out = pooled + sk + sb_ref[...].reshape(1, 1, cout_f)
    else:
        out = pooled + x_ref[...]          # identity skip (module implies strides==1)

    o_ref[...] = out                       # single lane-dense output store


# ---------------------------------------------------------------------------
# Wrapper
# ---------------------------------------------------------------------------
def block_forward_pallas(x_nchw, params, strides):
    # TODO(synk): fold NCHW<->NHWC into the kernel (or keep the model NHWC) to
    # remove these two bracketing HBM passes.
    x = jnp.transpose(x_nchw, (0, 2, 3, 1)).astype(jnp.float32)
    N, H, W, cin0 = x.shape
    has_skip = params["skip"] is not None

    args = [x]
    in_specs = [pl.BlockSpec((None, H, W, cin0), lambda n: (n, 0, 0, 0))]
    unit_cfg = []
    for (wd, wp, scale, bias, relu) in params["units"]:
        cin, cout = wp.shape
        args += [wd.reshape(9, cin).astype(jnp.float32),
                 (wp * scale[None, :]).astype(jnp.bfloat16),   # fold BN at trace time
                 bias.reshape(1, cout).astype(jnp.float32)]
        in_specs += [pl.BlockSpec((9, cin), lambda n: (0, 0)),
                     pl.BlockSpec((cin, cout), lambda n: (0, 0)),
                     pl.BlockSpec((1, cout), lambda n: (0, 0))]
        unit_cfg.append((cin, cout, bool(relu)))

    cout_f = unit_cfg[-1][1]
    if has_skip:
        wsk, ssc, sbi = params["skip"]
        args += [(wsk * ssc[None, :]).astype(jnp.bfloat16),
                 sbi.reshape(1, cout_f).astype(jnp.float32)]
        in_specs += [pl.BlockSpec((cin0, cout_f), lambda n: (0, 0)),
                     pl.BlockSpec((1, cout_f), lambda n: (0, 0))]

    s = strides
    Ho = (H - 1) // s + 1 if s != 1 else H
    Wo = (W - 1) // s + 1 if s != 1 else W
    cpad = max([c for c, _, _ in unit_cfg] + [cout_f])

    scratch = [pltpu.VMEM((H + 2, W + 2, cpad), jnp.float32)]
    if s != 1:
        scratch += [pltpu.VMEM((Ho, W + 2, cout_f), jnp.float32),
                    pltpu.VMEM((Ho, W, cin0), jnp.float32)]

    kernel = functools.partial(
        _block_kernel, units=tuple(unit_cfg), strides=s, has_skip=has_skip,
        dims=(H, W, Ho, Wo, cin0, cout_f, cpad))

    out = pl.pallas_call(
        kernel,
        out_shape=jax.ShapeDtypeStruct((N, Ho, Wo, cout_f), jnp.float32),
        grid=(N,),
        in_specs=in_specs,
        out_specs=pl.BlockSpec((None, Ho, Wo, cout_f), lambda n: (n, 0, 0, 0)),
        scratch_shapes=scratch,
        compiler_params=_compiler_params(),
    )(*args)
    return jnp.transpose(out, (0, 3, 1, 2))                     # NHWC -> NCHW


# ---------------------------------------------------------------------------
# Deterministic parameter init (mirrors Block.__init__ structure)
# ---------------------------------------------------------------------------
def init_block_params(key, in_filters, out_filters, reps, strides=1,
                      start_with_relu=True, grow_fist=True):
    keys = iter(jax.random.split(key, 128))

    # TODO(synk): BatchNorm2d is inference-only (running stats folded to scale/bias);
    # training-mode batch statistics / stat updates are not implemented.
    def bn_params(c):
        gamma = jax.random.uniform(next(keys), (c,), minval=0.5, maxval=1.5)
        beta = jax.random.normal(next(keys), (c,)) * 0.1
        mean = jax.random.normal(next(keys), (c,)) * 0.1
        var = jax.random.uniform(next(keys), (c,), minval=0.5, maxval=1.5)
        eps = 1e-5
        scale = gamma / jnp.sqrt(var + eps)
        bias = beta - mean * scale
        return scale.astype(jnp.float32), bias.astype(jnp.float32)

    units_cfg = []
    filters = in_filters
    if grow_fist:
        units_cfg.append([True, in_filters, out_filters])
        filters = out_filters
    for _ in range(reps - 1):
        units_cfg.append([True, filters, filters])
    if not grow_fist:
        units_cfg.append([True, in_filters, out_filters])
    if not start_with_relu:
        units_cfg[0][0] = False          # rep = rep[1:] drops the leading ReLU

    units = []
    for relu_flag, cin, cout in units_cfg:
        wd = (jax.random.normal(next(keys), (3, 3, cin)) * 0.2).astype(jnp.float32)
        wp = (jax.random.normal(next(keys), (cin, cout)) * 0.2).astype(jnp.float32)
        sc, bi = bn_params(cout)
        units.append((wd, wp, sc, bi, relu_flag))

    if out_filters != in_filters or strides != 1:
        wsk = (jax.random.normal(next(keys), (in_filters, out_filters)) * 0.2
               ).astype(jnp.float32)
        ssc, sbi = bn_params(out_filters)
        skip = (wsk, ssc, sbi)
    else:
        skip = None

    return dict(units=units, skip=skip)


# ---------------------------------------------------------------------------
# Pure-JAX reference (NCHW, lax convs) used only for the correctness check
# ---------------------------------------------------------------------------
def reference_block(x_nchw, params, strides):
    hp = jax.lax.Precision.HIGHEST
    h = x_nchw
    for (wd, wp, scale, bias, apply_relu) in params["units"]:
        if apply_relu:
            h = jnp.maximum(h, 0.0)
        cin = h.shape[1]
        wdt = jnp.transpose(wd, (2, 0, 1))[:, None, :, :]           # (Cin,1,3,3)
        h = jax.lax.conv_general_dilated(
            h, wdt, (1, 1), ((1, 1), (1, 1)),
            dimension_numbers=("NCHW", "OIHW", "NCHW"),
            feature_group_count=cin, precision=hp)
        wpt = jnp.transpose(wp)[:, :, None, None]                   # (Cout,Cin,1,1)
        h = jax.lax.conv_general_dilated(
            h, wpt, (1, 1), ((0, 0), (0, 0)),
            dimension_numbers=("NCHW", "OIHW", "NCHW"), precision=hp)
        h = h * scale[None, :, None, None] + bias[None, :, None, None]
    if strides != 1:
        h = jax.lax.reduce_window(
            h, -jnp.inf, jax.lax.max, (1, 1, 3, 3), (1, 1, strides, strides),
            ((0, 0), (0, 0), (1, 1), (1, 1)))
    if params["skip"] is not None:
        wsk, ssc, sbi = params["skip"]
        wskt = jnp.transpose(wsk)[:, :, None, None]
        sk = jax.lax.conv_general_dilated(
            x_nchw, wskt, (strides, strides), ((0, 0), (0, 0)),
            dimension_numbers=("NCHW", "OIHW", "NCHW"), precision=hp)
        sk = sk * ssc[None, :, None, None] + sbi[None, :, None, None]
    else:
        sk = x_nchw
    return h + sk


# ---------------------------------------------------------------------------
def _run_case(name, key, N, Cin, H, W, Cout, reps, strides):
    k_x, k_p = jax.random.split(key)
    x = jax.random.normal(k_x, (N, Cin, H, W), dtype=jnp.float32)
    params = init_block_params(k_p, Cin, Cout, reps, strides,
                               start_with_relu=True, grow_fist=True)
    out = jax.block_until_ready(block_forward_pallas(x, params, strides))
    ref = jax.block_until_ready(reference_block(x, params, strides))
    assert out.shape == ref.shape, (name, out.shape, ref.shape)
    # Tolerance accounts for bf16 MXU operands (f32 accumulation) chained across
    # the per-unit pointwise and skip matmuls; the reference is pure f32.
    if not bool(jnp.allclose(out, ref, atol=3e-2, rtol=3e-2)):
        raise AssertionError(
            f"{name}: max abs err {float(jnp.max(jnp.abs(out - ref)))}")


if __name__ == "__main__":
    key = jax.random.PRNGKey(0)
    k1, k2, k3 = jax.random.split(key, 3)

    # Block(4, 8, reps=2, strides=2): projection skip + fused maxpool tail.
    _run_case("proj_pool", k1, 2, 4, 16, 16, 8, 2, 2)
    # Block(8, 8, reps=2, strides=1): identity skip fused in-kernel.
    _run_case("identity", k2, 2, 8, 16, 16, 8, 2, 1)
    # Block(4, 8, reps=2, strides=1): projection skip, no pool.
    _run_case("proj_s1", k3, 2, 4, 16, 16, 8, 2, 1)

    print("KERNEL_OK")
</pallas_src>

<mosaic_0001>
module attributes {stable_mosaic.version = 11 : i64} {
  func.func @_block_kernel(%arg0: i32, %arg1: memref<1x16x16x4xf32, #tpu.memory_space<vmem>>, %arg2: memref<9x4xf32, #tpu.memory_space<vmem>>, %arg3: memref<4x8xbf16, #tpu.memory_space<vmem>>, %arg4: memref<1x8xf32, #tpu.memory_space<vmem>>, %arg5: memref<9x8xf32, #tpu.memory_space<vmem>>, %arg6: memref<8x8xbf16, #tpu.memory_space<vmem>>, %arg7: memref<1x8xf32, #tpu.memory_space<vmem>>, %arg8: memref<4x8xbf16, #tpu.memory_space<vmem>>, %arg9: memref<1x8xf32, #tpu.memory_space<vmem>>, %arg10: memref<1x8x8x8xf32, #tpu.memory_space<vmem>>, %arg11: memref<18x18x8xf32, #tpu.memory_space<vmem>>, %arg12: memref<8x18x8xf32, #tpu.memory_space<vmem>>, %arg13: memref<8x16x4xf32, #tpu.memory_space<vmem>>) attributes {dimension_semantics = [#tpu.dimension_semantics<parallel>], iteration_bounds = array<i64: 2>, scalar_prefetch = 0 : i64, scratch_operands = 3 : i64, tpu.core_type = #tpu.core_type<tc>, window_params = [{transform_indices = @transform_0, window_bounds = array<i64: 1, 16, 16, 4>}, {pipeline_mode = #tpu.pipeline_mode<synchronous>, transform_indices = @transform_1, window_bounds = array<i64: 9, 4>}, {pipeline_mode = #tpu.pipeline_mode<synchronous>, transform_indices = @transform_2, window_bounds = array<i64: 4, 8>}, {pipeline_mode = #tpu.pipeline_mode<synchronous>, transform_indices = @transform_3, window_bounds = array<i64: 1, 8>}, {pipeline_mode = #tpu.pipeline_mode<synchronous>, transform_indices = @transform_4, window_bounds = array<i64: 9, 8>}, {pipeline_mode = #tpu.pipeline_mode<synchronous>, transform_indices = @transform_5, window_bounds = array<i64: 8, 8>}, {pipeline_mode = #tpu.pipeline_mode<synchronous>, transform_indices = @transform_6, window_bounds = array<i64: 1, 8>}, {pipeline_mode = #tpu.pipeline_mode<synchronous>, transform_indices = @transform_7, window_bounds = array<i64: 4, 8>}, {pipeline_mode = #tpu.pipeline_mode<synchronous>, transform_indices = @transform_8, window_bounds = array<i64: 1, 8>}, {transform_indices = @transform_9, window_bounds = array<i64: 1, 8, 8, 8>}]} {
    %cst = arith.constant 0.000000e+00 : f32
    %0 = vector.broadcast %cst : f32 to vector<1x18x8xf32>
    %c0 = arith.constant 0 : index
    %c0_0 = arith.constant 0 : index
    %c0_1 = arith.constant 0 : index
    %1 = vector.load %arg11[%c0, %c0_0, %c0_1] : memref<18x18x8xf32, #tpu.memory_space<vmem>>, vector<1x18x8xf32>
    tpu.vector_store %arg11[%c0, %c0_0, %c0_1], %0 {strides = array<i32>} : memref<18x18x8xf32, #tpu.memory_space<vmem>>, vector<1x18x8xf32>,
    %cst_2 = arith.constant 0.000000e+00 : f32
    %2 = vector.broadcast %cst_2 : f32 to vector<1x18x8xf32>
    %c17 = arith.constant 17 : index
    %c0_3 = arith.constant 0 : index
    %c0_4 = arith.constant 0 : index
    %3 = vector.load %arg11[%c17, %c0_3, %c0_4] : memref<18x18x8xf32, #tpu.memory_space<vmem>>, vector<1x18x8xf32>
    tpu.vector_store %arg11[%c17, %c0_3, %c0_4], %2 {strides = array<i32>} : memref<18x18x8xf32, #tpu.memory_space<vmem>>, vector<1x18x8xf32>,
    %cst_5 = arith.constant 0.000000e+00 : f32
    %4 = vector.broadcast %cst_5 : f32 to vector<18x1x8xf32>
    %c0_6 = arith.constant 0 : index
    %c0_7 = arith.constant 0 : index
    %c0_8 = arith.constant 0 : index
    %5 = vector.load %arg11[%c0_6, %c0_7, %c0_8] : memref<18x18x8xf32, #tpu.memory_space<vmem>>, vector<18x1x8xf32>
    tpu.vector_store %arg11[%c0_6, %c0_7, %c0_8], %4 {strides = array<i32>} : memref<18x18x8xf32, #tpu.memory_space<vmem>>, vector<18x1x8xf32>,
    %cst_9 = arith.constant 0.000000e+00 : f32
    %6 = vector.broadcast %cst_9 : f32 to vector<18x1x8xf32>
    %c0_10 = arith.constant 0 : index
    %c17_11 = arith.constant 17 : index
    %c0_12 = arith.constant 0 : index
    %7 = vector.load %arg11[%c0_10, %c17_11, %c0_12] : memref<18x18x8xf32, #tpu.memory_space<vmem>>, vector<18x1x8xf32>
    tpu.vector_store %arg11[%c0_10, %c17_11, %c0_12], %6 {strides = array<i32>} : memref<18x18x8xf32, #tpu.memory_space<vmem>>, vector<18x1x8xf32>,
    %c0_13 = arith.constant 0 : index
    %c0_14 = arith.constant 0 : index
    %c0_15 = arith.constant 0 : index
    %c0_16 = arith.constant 0 : index
    %8 = vector.load %arg1[%c0_13, %c0_14, %c0_15, %c0_16] : memref<1x16x16x4xf32, #tpu.memory_space<vmem>>, vector<1x16x16x4xf32>
    %9 = vector.shape_cast %8 : vector<1x16x16x4xf32> to vector<16x16x4xf32>
    %cst_17 = arith.constant 0.000000e+00 : f32
    %10 = vector.broadcast %cst_17 : f32 to vector<16x16x4xf32>
    %11 = arith.maximumf %9, %10 : vector<16x16x4xf32>
    %c1 = arith.constant 1 : index
    %c1_18 = arith.constant 1 : index
    %c0_19 = arith.constant 0 : index
    %12 = vector.load %arg11[%c1, %c1_18, %c0_19] : memref<18x18x8xf32, #tpu.memory_space<vmem>>, vector<16x16x4xf32>
    tpu.vector_store %arg11[%c1, %c1_18, %c0_19], %11 {strides = array<i32>} : memref<18x18x8xf32, #tpu.memory_space<vmem>>, vector<16x16x4xf32>,
    %c0_20 = arith.constant 0 : index
    %c0_21 = arith.constant 0 : index
    %13 = vector.load %arg2[%c0_20, %c0_21] : memref<9x4xf32, #tpu.memory_space<vmem>>, vector<9x4xf32>
    %14 = vector.shape_cast %13 : vector<9x4xf32> to vector<9x1x1x4xf32>
    %c0_22 = arith.constant 0 : index
    %c0_23 = arith.constant 0 : index
    %c0_24 = arith.constant 0 : index
    %15 = vector.load %arg11[%c0_22, %c0_23, %c0_24] : memref<18x18x8xf32, #tpu.memory_space<vmem>>, vector<16x16x4xf32>
    %16 = vector.extract_strided_slice %14 {offsets = [0, 0, 0, 0], sizes = [1, 1, 1, 4], strides = [1, 1, 1, 1]} : vector<9x1x1x4xf32> to vector<1x1x1x4xf32>
    %17 = vector.shape_cast %16 : vector<1x1x1x4xf32> to vector<1x1x4xf32>
    %18 = vector.broadcast %17 : vector<1x1x4xf32> to vector<16x16x4xf32>
    %19 = arith.mulf %15, %18 : vector<16x16x4xf32>
    %c0_25 = arith.constant 0 : index
    %c1_26 = arith.constant 1 : index
    %c0_27 = arith.constant 0 : index
    %20 = vector.load %arg11[%c0_25, %c1_26, %c0_27] : memref<18x18x8xf32, #tpu.memory_space<vmem>>, vector<16x16x4xf32>
    %21 = vector.extract_strided_slice %14 {offsets = [1, 0, 0, 0], sizes = [1, 1, 1, 4], strides = [1, 1, 1, 1]} : vector<9x1x1x4xf32> to vector<1x1x1x4xf32>
    %22 = vector.shape_cast %21 : vector<1x1x1x4xf32> to vector<1x1x4xf32>
    %23 = vector.broadcast %22 : vector<1x1x4xf32> to vector<16x16x4xf32>
    %24 = arith.mulf %20, %23 : vector<16x16x4xf32>
    %25 = arith.addf %19, %24 : vector<16x16x4xf32>
    %c0_28 = arith.constant 0 : index
    %c2 = arith.constant 2 : index
    %c0_29 = arith.constant 0 : index
    %26 = vector.load %arg11[%c0_28, %c2, %c0_29] : memref<18x18x8xf32, #tpu.memory_space<vmem>>, vector<16x16x4xf32>
    %27 = vector.extract_strided_slice %14 {offsets = [2, 0, 0, 0], sizes = [1, 1, 1, 4], strides = [1, 1, 1, 1]} : vector<9x1x1x4xf32> to vector<1x1x1x4xf32>
    %28 = vector.shape_cast %27 : vector<1x1x1x4xf32> to vector<1x1x4xf32>
    %29 = vector.broadcast %28 : vector<1x1x4xf32> to vector<16x16x4xf32>
    %30 = arith.mulf %26, %29 : vector<16x16x4xf32>
    %31 = arith.addf %25, %30 : vector<16x16x4xf32>
    %c1_30 = arith.constant 1 : index
    %c0_31 = arith.constant 0 : index
    %c0_32 = arith.constant 0 : index
    %32 = vector.load %arg11[%c1_30, %c0_31, %c0_32] : memref<18x18x8xf32, #tpu.memory_space<vmem>>, vector<16x16x4xf32>
    %33 = vector.extract_strided_slice %14 {offsets = [3, 0, 0, 0], sizes = [1, 1, 1, 4], strides = [1, 1, 1, 1]} : vector<9x1x1x4xf32> to vector<1x1x1x4xf32>
    %34 = vector.shape_cast %33 : vector<1x1x1x4xf32> to vector<1x1x4xf32>
    %35 = vector.broadcast %34 : vector<1x1x4xf32> to vector<16x16x4xf32>
    %36 = arith.mulf %32, %35 : vector<16x16x4xf32>
    %37 = arith.addf %31, %36 : vector<16x16x4xf32>
    %c1_33 = arith.constant 1 : index
    %c1_34 = arith.constant 1 : index
    %c0_35 = arith.constant 0 : index
    %38 = vector.load %arg11[%c1_33, %c1_34, %c0_35] : memref<18x18x8xf32, #tpu.memory_space<vmem>>, vector<16x16x4xf32>
    %39 = vector.extract_strided_slice %14 {offsets = [4, 0, 0, 0], sizes = [1, 1, 1, 4], strides = [1, 1, 1, 1]} : vector<9x1x1x4xf32> to vector<1x1x1x4xf32>
    %40 = vector.shape_cast %39 : vector<1x1x1x4xf32> to vector<1x1x4xf32>
    %41 = vector.broadcast %40 : vector<1x1x4xf32> to vector<16x16x4xf32>
    %42 = arith.mulf %38, %41 : vector<16x16x4xf32>
    %43 = arith.addf %37, %42 : vector<16x16x4xf32>
    %c1_36 = arith.constant 1 : index
    %c2_37 = arith.constant 2 : index
    %c0_38 = arith.constant 0 : index
    %44 = vector.load %arg11[%c1_36, %c2_37, %c0_38] : memref<18x18x8xf32, #tpu.memory_space<vmem>>, vector<16x16x4xf32>
    %45 = vector.extract_strided_slice %14 {offsets = [5, 0, 0, 0], sizes = [1, 1, 1, 4], strides = [1, 1, 1, 1]} : vector<9x1x1x4xf32> to vector<1x1x1x4xf32>
    %46 = vector.shape_cast %45 : vector<1x1x1x4xf32> to vector<1x1x4xf32>
    %47 = vector.broadcast %46 : vector<1x1x4xf32> to vector<16x16x4xf32>
    %48 = arith.mulf %44, %47 : vector<16x16x4xf32>
    %49 = arith.addf %43, %48 : vector<16x16x4xf32>
    %c2_39 = arith.constant 2 : index
    %c0_40 = arith.constant 0 : index
    %c0_41 = arith.constant 0 : index
    %50 = vector.load %arg11[%c2_39, %c0_40, %c0_41] : memref<18x18x8xf32, #tpu.memory_space<vmem>>, vector<16x16x4xf32>
    %51 = vector.extract_strided_slice %14 {offsets = [6, 0, 0, 0], sizes = [1, 1, 1, 4], strides = [1, 1, 1, 1]} : vector<9x1x1x4xf32> to vector<1x1x1x4xf32>
    %52 = vector.shape_cast %51 : vector<1x1x1x4xf32> to vector<1x1x4xf32>
    %53 = vector.broadcast %52 : vector<1x1x4xf32> to vector<16x16x4xf32>
    %54 = arith.mulf %50, %53 : vector<16x16x4xf32>
    %55 = arith.addf %49, %54 : vector<16x16x4xf32>
    %c2_42 = arith.constant 2 : index
    %c1_43 = arith.constant 1 : index
    %c0_44 = arith.constant 0 : index
    %56 = vector.load %arg11[%c2_42, %c1_43, %c0_44] : memref<18x18x8xf32, #tpu.memory_space<vmem>>, vector<16x16x4xf32>
    %57 = vector.extract_strided_slice %14 {offsets = [7, 0, 0, 0], sizes = [1, 1, 1, 4], strides = [1, 1, 1, 1]} : vector<9x1x1x4xf32> to vector<1x1x1x4xf32>
    %58 = vector.shape_cast %57 : vector<1x1x1x4xf32> to vector<1x1x4xf32>
    %59 = vector.broadcast %58 : vector<1x1x4xf32> to vector<16x16x4xf32>
    %60 = arith.mulf %56, %59 : vector<16x16x4xf32>
    %61 = arith.addf %55, %60 : vector<16x16x4xf32>
    %c2_45 = arith.constant 2 : index
    %c2_46 = arith.constant 2 : index
    %c0_47 = arith.constant 0 : index
    %62 = vector.load %arg11[%c2_45, %c2_46, %c0_47] : memref<18x18x8xf32, #tpu.memory_space<vmem>>, vector<16x16x4xf32>
    %63 = vector.extract_strided_slice %14 {offsets = [8, 0, 0, 0], sizes = [1, 1, 1, 4], strides = [1, 1, 1, 1]} : vector<9x1x1x4xf32> to vector<1x1x1x4xf32>
    %64 = vector.shape_cast %63 : vector<1x1x1x4xf32> to vector<1x1x4xf32>
    %65 = vector.broadcast %64 : vector<1x1x4xf32> to vector<16x16x4xf32>
    %66 = arith.mulf %62, %65 : vector<16x16x4xf32>
    %67 = arith.addf %61, %66 : vector<16x16x4xf32>
    %68 = vector.shape_cast %67 : vector<16x16x4xf32> to vector<256x4xf32>
    %69 = arith.truncf %68 : vector<256x4xf32> to vector<256x4xbf16>
    %c0_48 = arith.constant 0 : index
    %c0_49 = arith.constant 0 : index
    %70 = vector.load %arg3[%c0_48, %c0_49] : memref<4x8xbf16, #tpu.memory_space<vmem>>, vector<4x8xbf16>
    %cst_50 = arith.constant dense<0.000000e+00> : vector<256x8xf32>
    %71 = tpu.matmul %69, %70, %cst_50 {dimension_numbers = #tpu.dot_dimension_numbers<[1], [0], [0], [1], [0, 0, 1, 1], [], []>} : vector<256x4xbf16>, vector<4x8xbf16>, vector<256x8xf32> -> vector<256x8xf32>
    %72 = vector.shape_cast %71 : vector<256x8xf32> to vector<16x16x8xf32>
    %c0_51 = arith.constant 0 : index
    %c0_52 = arith.constant 0 : index
    %73 = vector.load %arg4[%c0_51, %c0_52] : memref<1x8xf32, #tpu.memory_space<vmem>>, vector<1x8xf32>
    %74 = vector.shape_cast %73 : vector<1x8xf32> to vector<1x1x8xf32>
    %75 = vector.broadcast %74 : vector<1x1x8xf32> to vector<16x16x8xf32>
    %76 = arith.addf %72, %75 : vector<16x16x8xf32>
    %cst_53 = arith.constant 0.000000e+00 : f32
    %77 = vector.broadcast %cst_53 : f32 to vector<16x16x8xf32>
    %78 = arith.maximumf %76, %77 : vector<16x16x8xf32>
    %c1_54 = arith.constant 1 : index
    %c1_55 = arith.constant 1 : index
    %c0_56 = arith.constant 0 : index
    %79 = vector.load %arg11[%c1_54, %c1_55, %c0_56] : memref<18x18x8xf32, #tpu.memory_space<vmem>>, vector<16x16x8xf32>
    tpu.vector_store %arg11[%c1_54, %c1_55, %c0_56], %78 {strides = array<i32>} : memref<18x18x8xf32, #tpu.memory_space<vmem>>, vector<16x16x8xf32>,
    %c0_57 = arith.constant 0 : index
    %c0_58 = arith.constant 0 : index
    %80 = vector.load %arg5[%c0_57, %c0_58] : memref<9x8xf32, #tpu.memory_space<vmem>>, vector<9x8xf32>
    %81 = vector.shape_cast %80 : vector<9x8xf32> to vector<9x1x1x8xf32>
    %c0_59 = arith.constant 0 : index
    %c0_60 = arith.constant 0 : index
    %c0_61 = arith.constant 0 : index
    %82 = vector.load %arg11[%c0_59, %c0_60, %c0_61] : memref<18x18x8xf32, #tpu.memory_space<vmem>>, vector<16x16x8xf32>
    %83 = vector.extract_strided_slice %81 {offsets = [0, 0, 0, 0], sizes = [1, 1, 1, 8], strides = [1, 1, 1, 1]} : vector<9x1x1x8xf32> to vector<1x1x1x8xf32>
    %84 = vector.shape_cast %83 : vector<1x1x1x8xf32> to vector<1x1x8xf32>
    %85 = vector.broadcast %84 : vector<1x1x8xf32> to vector<16x16x8xf32>
    %86 = arith.mulf %82, %85 : vector<16x16x8xf32>
    %c0_62 = arith.constant 0 : index
    %c1_63 = arith.constant 1 : index
    %c0_64 = arith.constant 0 : index
    %87 = vector.load %arg11[%c0_62, %c1_63, %c0_64] : memref<18x18x8xf32, #tpu.memory_space<vmem>>, vector<16x16x8xf32>
    %88 = vector.extract_strided_slice %81 {offsets = [1, 0, 0, 0], sizes = [1, 1, 1, 8], strides = [1, 1, 1, 1]} : vector<9x1x1x8xf32> to vector<1x1x1x8xf32>
    %89 = vector.shape_cast %88 : vector<1x1x1x8xf32> to vector<1x1x8xf32>
    %90 = vector.broadcast %89 : vector<1x1x8xf32> to vector<16x16x8xf32>
    %91 = arith.mulf %87, %90 : vector<16x16x8xf32>
    %92 = arith.addf %86, %91 : vector<16x16x8xf32>
    %c0_65 = arith.constant 0 : index
    %c2_66 = arith.constant 2 : index
    %c0_67 = arith.constant 0 : index
    %93 = vector.load %arg11[%c0_65, %c2_66, %c0_67] : memref<18x18x8xf32, #tpu.memory_space<vmem>>, vector<16x16x8xf32>
    %94 = vector.extract_strided_slice %81 {offsets = [2, 0, 0, 0], sizes = [1, 1, 1, 8], strides = [1, 1, 1, 1]} : vector<9x1x1x8xf32> to vector<1x1x1x8xf32>
    %95 = vector.shape_cast %94 : vector<1x1x1x8xf32> to vector<1x1x8xf32>
    %96 = vector.broadcast %95 : vector<1x1x8xf32> to vector<16x16x8xf32>
    %97 = arith.mulf %93, %96 : vector<16x16x8xf32>
    %98 = arith.addf %92, %97 : vector<16x16x8xf32>
    %c1_68 = arith.constant 1 : index
    %c0_69 = arith.constant 0 : index
    %c0_70 = arith.constant 0 : index
    %99 = vector.load %arg11[%c1_68, %c0_69, %c0_70] : memref<18x18x8xf32, #tpu.memory_space<vmem>>, vector<16x16x8xf32>
    %100 = vector.extract_strided_slice %81 {offsets = [3, 0, 0, 0], sizes = [1, 1, 1, 8], strides = [1, 1, 1, 1]} : vector<9x1x1x8xf32> to vector<1x1x1x8xf32>
    %101 = vector.shape_cast %100 : vector<1x1x1x8xf32> to vector<1x1x8xf32>
    %102 = vector.broadcast %101 : vector<1x1x8xf32> to vector<16x16x8xf32>
    %103 = arith.mulf %99, %102 : vector<16x16x8xf32>
    %104 = arith.addf %98, %103 : vector<16x16x8xf32>
    %c1_71 = arith.constant 1 : index
    %c1_72 = arith.constant 1 : index
    %c0_73 = arith.constant 0 : index
    %105 = vector.load %arg11[%c1_71, %c1_72, %c0_73] : memref<18x18x8xf32, #tpu.memory_space<vmem>>, vector<16x16x8xf32>
    %106 = vector.extract_strided_slice %81 {offsets = [4, 0, 0, 0], sizes = [1, 1, 1, 8], strides = [1, 1, 1, 1]} : vector<9x1x1x8xf32> to vector<1x1x1x8xf32>
    %107 = vector.shape_cast %106 : vector<1x1x1x8xf32> to vector<1x1x8xf32>
    %108 = vector.broadcast %107 : vector<1x1x8xf32> to vector<16x16x8xf32>
    %109 = arith.mulf %105, %108 : vector<16x16x8xf32>
    %110 = arith.addf %104, %109 : vector<16x16x8xf32>
    %c1_74 = arith.constant 1 : index
    %c2_75 = arith.constant 2 : index
    %c0_76 = arith.constant 0 : index
    %111 = vector.load %arg11[%c1_74, %c2_75, %c0_76] : memref<18x18x8xf32, #tpu.memory_space<vmem>>, vector<16x16x8xf32>
    %112 = vector.extract_strided_slice %81 {offsets = [5, 0, 0, 0], sizes = [1, 1, 1, 8], strides = [1, 1, 1, 1]} : vector<9x1x1x8xf32> to vector<1x1x1x8xf32>
    %113 = vector.shape_cast %112 : vector<1x1x1x8xf32> to vector<1x1x8xf32>
    %114 = vector.broadcast %113 : vector<1x1x8xf32> to vector<16x16x8xf32>
    %115 = arith.mulf %111, %114 : vector<16x16x8xf32>
    %116 = arith.addf %110, %115 : vector<16x16x8xf32>
    %c2_77 = arith.constant 2 : index
    %c0_78 = arith.constant 0 : index
    %c0_79 = arith.constant 0 : index
    %117 = vector.load %arg11[%c2_77, %c0_78, %c0_79] : memref<18x18x8xf32, #tpu.memory_space<vmem>>, vector<16x16x8xf32>
    %118 = vector.extract_strided_slice %81 {offsets = [6, 0, 0, 0], sizes = [1, 1, 1, 8], strides = [1, 1, 1, 1]} : vector<9x1x1x8xf32> to vector<1x1x1x8xf32>
    %119 = vector.shape_cast %118 : vector<1x1x1x8xf32> to vector<1x1x8xf32>
    %120 = vector.broadcast %119 : vector<1x1x8xf32> to vector<16x16x8xf32>
    %121 = arith.mulf %117, %120 : vector<16x16x8xf32>
    %122 = arith.addf %116, %121 : vector<16x16x8xf32>
    %c2_80 = arith.constant 2 : index
    %c1_81 = arith.constant 1 : index
    %c0_82 = arith.constant 0 : index
    %123 = vector.load %arg11[%c2_80, %c1_81, %c0_82] : memref<18x18x8xf32, #tpu.memory_space<vmem>>, vector<16x16x8xf32>
    %124 = vector.extract_strided_slice %81 {offsets = [7, 0, 0, 0], sizes = [1, 1, 1, 8], strides = [1, 1, 1, 1]} : vector<9x1x1x8xf32> to vector<1x1x1x8xf32>
    %125 = vector.shape_cast %124 : vector<1x1x1x8xf32> to vector<1x1x8xf32>
    %126 = vector.broadcast %125 : vector<1x1x8xf32> to vector<16x16x8xf32>
    %127 = arith.mulf %123, %126 : vector<16x16x8xf32>
    %128 = arith.addf %122, %127 : vector<16x16x8xf32>
    %c2_83 = arith.constant 2 : index
    %c2_84 = arith.constant 2 : index
    %c0_85 = arith.constant 0 : index
    %129 = vector.load %arg11[%c2_83, %c2_84, %c0_85] : memref<18x18x8xf32, #tpu.memory_space<vmem>>, vector<16x16x8xf32>
    %130 = vector.extract_strided_slice %81 {offsets = [8, 0, 0, 0], sizes = [1, 1, 1, 8], strides = [1, 1, 1, 1]} : vector<9x1x1x8xf32> to vector<1x1x1x8xf32>
    %131 = vector.shape_cast %130 : vector<1x1x1x8xf32> to vector<1x1x8xf32>
    %132 = vector.broadcast %131 : vector<1x1x8xf32> to vector<16x16x8xf32>
    %133 = arith.mulf %129, %132 : vector<16x16x8xf32>
    %134 = arith.addf %128, %133 : vector<16x16x8xf32>
    %135 = vector.shape_cast %134 : vector<16x16x8xf32> to vector<256x8xf32>
    %136 = arith.truncf %135 : vector<256x8xf32> to vector<256x8xbf16>
    %c0_86 = arith.constant 0 : index
    %c0_87 = arith.constant 0 : index
    %137 = vector.load %arg6[%c0_86, %c0_87] : memref<8x8xbf16, #tpu.memory_space<vmem>>, vector<8x8xbf16>
    %cst_88 = arith.constant dense<0.000000e+00> : vector<256x8xf32>
    %138 = tpu.matmul %136, %137, %cst_88 {dimension_numbers = #tpu.dot_dimension_numbers<[1], [0], [0], [1], [0, 0, 1, 1], [], []>} : vector<256x8xbf16>, vector<8x8xbf16>, vector<256x8xf32> -> vector<256x8xf32>
    %139 = vector.shape_cast %138 : vector<256x8xf32> to vector<16x16x8xf32>
    %c0_89 = arith.constant 0 : index
    %c0_90 = arith.constant 0 : index
    %140 = vector.load %arg7[%c0_89, %c0_90] : memref<1x8xf32, #tpu.memory_space<vmem>>, vector<1x8xf32>
    %141 = vector.shape_cast %140 : vector<1x8xf32> to vector<1x1x8xf32>
    %142 = vector.broadcast %141 : vector<1x1x8xf32> to vector<16x16x8xf32>
    %143 = arith.addf %139, %142 : vector<16x16x8xf32>
    %cst_91 = arith.constant -1.000000e+30 : f32
    %144 = vector.broadcast %cst_91 : f32 to vector<1x18x8xf32>
    %c0_92 = arith.constant 0 : index
    %c0_93 = arith.constant 0 : index
    %c0_94 = arith.constant 0 : index
    %145 = vector.load %arg11[%c0_92, %c0_93, %c0_94] : memref<18x18x8xf32, #tpu.memory_space<vmem>>, vector<1x18x8xf32>
    tpu.vector_store %arg11[%c0_92, %c0_93, %c0_94], %144 {strides = array<i32>} : memref<18x18x8xf32, #tpu.memory_space<vmem>>, vector<1x18x8xf32>,
    %cst_95 = arith.constant -1.000000e+30 : f32
    %146 = vector.broadcast %cst_95 : f32 to vector<1x18x8xf32>
    %c17_96 = arith.constant 17 : index
    %c0_97 = arith.constant 0 : index
    %c0_98 = arith.constant 0 : index
    %147 = vector.load %arg11[%c17_96, %c0_97, %c0_98] : memref<18x18x8xf32, #tpu.memory_space<vmem>>, vector<1x18x8xf32>
    tpu.vector_store %arg11[%c17_96, %c0_97, %c0_98], %146 {strides = array<i32>} : memref<18x18x8xf32, #tpu.memory_space<vmem>>, vector<1x18x8xf32>,
    %cst_99 = arith.constant -1.000000e+30 : f32
    %148 = vector.broadcast %cst_99 : f32 to vector<18x1x8xf32>
    %c0_100 = arith.constant 0 : index
    %c0_101 = arith.constant 0 : index
    %c0_102 = arith.constant 0 : index
    %149 = vector.load %arg11[%c0_100, %c0_101, %c0_102] : memref<18x18x8xf32, #tpu.memory_space<vmem>>, vector<18x1x8xf32>
    tpu.vector_store %arg11[%c0_100, %c0_101, %c0_102], %148 {strides = array<i32>} : memref<18x18x8xf32, #tpu.memory_space<vmem>>, vector<18x1x8xf32>,
    %cst_103 = arith.constant -1.000000e+30 : f32
    %150 = vector.broadcast %cst_103 : f32 to vector<18x1x8xf32>
    %c0_104 = arith.constant 0 : index
    %c17_105 = arith.constant 17 : index
    %c0_106 = arith.constant 0 : index
    %151 = vector.load %arg11[%c0_104, %c17_105, %c0_106] : memref<18x18x8xf32, #tpu.memory_space<vmem>>, vector<18x1x8xf32>
    tpu.vector_store %arg11[%c0_104, %c17_105, %c0_106], %150 {strides = array<i32>} : memref<18x18x8xf32, #tpu.memory_space<vmem>>, vector<18x1x8xf32>,
    %c1_107 = arith.constant 1 : index
    %c1_108 = arith.constant 1 : index
    %c0_109 = arith.constant 0 : index
    %152 = vector.load %arg11[%c1_107, %c1_108, %c0_109] : memref<18x18x8xf32, #tpu.memory_space<vmem>>, vector<16x16x8xf32>
    tpu.vector_store %arg11[%c1_107, %c1_108, %c0_109], %143 {strides = array<i32>} : memref<18x18x8xf32, #tpu.memory_space<vmem>>, vector<16x16x8xf32>,
    %c0_110 = arith.constant 0 : index
    %c0_111 = arith.constant 0 : index
    %c0_112 = arith.constant 0 : index
    %153 = tpu.strided_load %arg11[%c0_110, %c0_111, %c0_112] {strides = array<i32: 2, 1, 1>} : memref<18x18x8xf32, #tpu.memory_space<vmem>>, vector<8x18x8xf32>
    %c1_113 = arith.constant 1 : index
    %c0_114 = arith.constant 0 : index
    %c0_115 = arith.constant 0 : index
    %154 = tpu.strided_load %arg11[%c1_113, %c0_114, %c0_115] {strides = array<i32: 2, 1, 1>} : memref<18x18x8xf32, #tpu.memory_space<vmem>>, vector<8x18x8xf32>
    %155 = arith.maximumf %153, %154 : vector<8x18x8xf32>
    %c2_116 = arith.constant 2 : index
    %c0_117 = arith.constant 0 : index
    %c0_118 = arith.constant 0 : index
    %156 = tpu.strided_load %arg11[%c2_116, %c0_117, %c0_118] {strides = array<i32: 2, 1, 1>} : memref<18x18x8xf32, #tpu.memory_space<vmem>>, vector<8x18x8xf32>
    %157 = arith.maximumf %155, %156 : vector<8x18x8xf32>
    %c0_119 = arith.constant 0 : index
    %c0_120 = arith.constant 0 : index
    %c0_121 = arith.constant 0 : index
    %158 = vector.load %arg12[%c0_119, %c0_120, %c0_121] : memref<8x18x8xf32, #tpu.memory_space<vmem>>, vector<8x18x8xf32>
    tpu.vector_store %arg12[%c0_119, %c0_120, %c0_121], %157 {strides = array<i32>} : memref<8x18x8xf32, #tpu.memory_space<vmem>>, vector<8x18x8xf32>,
    %c0_122 = arith.constant 0 : index
    %c0_123 = arith.constant 0 : index
    %c0_124 = arith.constant 0 : index
    %159 = tpu.strided_load %arg12[%c0_122, %c0_123, %c0_124] {strides = array<i32: 1, 2, 1>} : memref<8x18x8xf32, #tpu.memory_space<vmem>>, vector<8x8x8xf32>
    %c0_125 = arith.constant 0 : index
    %c1_126 = arith.constant 1 : index
    %c0_127 = arith.constant 0 : index
    %160 = tpu.strided_load %arg12[%c0_125, %c1_126, %c0_127] {strides = array<i32: 1, 2, 1>} : memref<8x18x8xf32, #tpu.memory_space<vmem>>, vector<8x8x8xf32>
    %161 = arith.maximumf %159, %160 : vector<8x8x8xf32>
    %c0_128 = arith.constant 0 : index
    %c2_129 = arith.constant 2 : index
    %c0_130 = arith.constant 0 : index
    %162 = tpu.strided_load %arg12[%c0_128, %c2_129, %c0_130] {strides = array<i32: 1, 2, 1>} : memref<8x18x8xf32, #tpu.memory_space<vmem>>, vector<8x8x8xf32>
    %163 = arith.maximumf %161, %162 : vector<8x8x8xf32>
    %c0_131 = arith.constant 0 : index
    %c0_132 = arith.constant 0 : index
    %c0_133 = arith.constant 0 : index
    %c0_134 = arith.constant 0 : index
    %164 = tpu.strided_load %arg1[%c0_131, %c0_132, %c0_133, %c0_134] {strides = array<i32: 1, 2, 1, 1>} : memref<1x16x16x4xf32, #tpu.memory_space<vmem>>, vector<1x8x16x4xf32>
    %165 = vector.shape_cast %164 : vector<1x8x16x4xf32> to vector<8x16x4xf32>
    %c0_135 = arith.constant 0 : index
    %c0_136 = arith.constant 0 : index
    %c0_137 = arith.constant 0 : index
    %166 = vector.load %arg13[%c0_135, %c0_136, %c0_137] : memref<8x16x4xf32, #tpu.memory_space<vmem>>, vector<8x16x4xf32>
    tpu.vector_store %arg13[%c0_135, %c0_136, %c0_137], %165 {strides = array<i32>} : memref<8x16x4xf32, #tpu.memory_space<vmem>>, vector<8x16x4xf32>,
    %c0_138 = arith.constant 0 : index
    %c0_139 = arith.constant 0 : index
    %c0_140 = arith.constant 0 : index
    %167 = tpu.strided_load %arg13[%c0_138, %c0_139, %c0_140] {strides = array<i32: 1, 2, 1>} : memref<8x16x4xf32, #tpu.memory_space<vmem>>, vector<8x8x4xf32>
    %168 = vector.shape_cast %167 : vector<8x8x4xf32> to vector<64x4xf32>
    %169 = arith.truncf %168 : vector<64x4xf32> to vector<64x4xbf16>
    %c0_141 = arith.constant 0 : index
    %c0_142 = arith.constant 0 : index
    %170 = vector.load %arg8[%c0_141, %c0_142] : memref<4x8xbf16, #tpu.memory_space<vmem>>, vector<4x8xbf16>
    %cst_143 = arith.constant dense<0.000000e+00> : vector<64x8xf32>
    %171 = tpu.matmul %169, %170, %cst_143 {dimension_numbers = #tpu.dot_dimension_numbers<[1], [0], [0], [1], [0, 0, 1, 1], [], []>} : vector<64x4xbf16>, vector<4x8xbf16>, vector<64x8xf32> -> vector<64x8xf32>
    %172 = vector.shape_cast %171 : vector<64x8xf32> to vector<8x8x8xf32>
    %173 = arith.addf %163, %172 : vector<8x8x8xf32>
    %c0_144 = arith.constant 0 : index
    %c0_145 = arith.constant 0 : index
    %174 = vector.load %arg9[%c0_144, %c0_145] : memref<1x8xf32, #tpu.memory_space<vmem>>, vector<1x8xf32>
    %175 = vector.shape_cast %174 : vector<1x8xf32> to vector<1x1x8xf32>
    %176 = vector.broadcast %175 : vector<1x1x8xf32> to vector<8x8x8xf32>
    %177 = arith.addf %173, %176 : vector<8x8x8xf32>
    %c0_146 = arith.constant 0 : index
    %c0_147 = arith.constant 0 : index
    %c0_148 = arith.constant 0 : index
    %c0_149 = arith.constant 0 : index
    %178 = vector.load %arg10[%c0_146, %c0_147, %c0_148, %c0_149] : memref<1x8x8x8xf32, #tpu.memory_space<vmem>>, vector<1x8x8x8xf32>
    %179 = vector.shape_cast %178 : vector<1x8x8x8xf32> to vector<8x8x8xf32>
    %180 = vector.shape_cast %177 : vector<8x8x8xf32> to vector<1x8x8x8xf32>
    tpu.vector_store %arg10[%c0_146, %c0_147, %c0_148, %c0_149], %180 {strides = array<i32>} : memref<1x8x8x8xf32, #tpu.memory_space<vmem>>, vector<1x8x8x8xf32>,
    return
  }
  func.func @transform_0(%arg0: i32) -> (i32, i32, i32, i32) {
    %c0_i32 = arith.constant 0 : i32
    %c0_i32_0 = arith.constant 0 : i32
    %c0_i32_1 = arith.constant 0 : i32
    %c0_i32_2 = arith.constant 0 : i32
    return %arg0, %c0_i32, %c0_i32_0, %c0_i32_1 : i32, i32, i32, i32
  }
  func.func @transform_1(%arg0: i32) -> (i32, i32) {
    %c0_i32 = arith.constant 0 : i32
    %c0_i32_0 = arith.constant 0 : i32
    %c0_i32_1 = arith.constant 0 : i32
    return %c0_i32, %c0_i32_0 : i32, i32
  }
  func.func @transform_2(%arg0: i32) -> (i32, i32) {
    %c0_i32 = arith.constant 0 : i32
    %c0_i32_0 = arith.constant 0 : i32
    %c0_i32_1 = arith.constant 0 : i32
    return %c0_i32, %c0_i32_0 : i32, i32
  }
  func.func @transform_3(%arg0: i32) -> (i32, i32) {
    %c0_i32 = arith.constant 0 : i32
    %c0_i32_0 = arith.constant 0 : i32
    %c0_i32_1 = arith.constant 0 : i32
    return %c0_i32, %c0_i32_0 : i32, i32
  }
  func.func @transform_4(%arg0: i32) -> (i32, i32) {
    %c0_i32 = arith.constant 0 : i32
    %c0_i32_0 = arith.constant 0 : i32
    %c0_i32_1 = arith.constant 0 : i32
    return %c0_i32, %c0_i32_0 : i32, i32
  }
  func.func @transform_5(%arg0: i32) -> (i32, i32) {
    %c0_i32 = arith.constant 0 : i32
    %c0_i32_0 = arith.constant 0 : i32
    %c0_i32_1 = arith.constant 0 : i32
    return %c0_i32, %c0_i32_0 : i32, i32
  }
  func.func @transform_6(%arg0: i32) -> (i32, i32) {
    %c0_i32 = arith.constant 0 : i32
    %c0_i32_0 = arith.constant 0 : i32
    %c0_i32_1 = arith.constant 0 : i32
    return %c0_i32, %c0_i32_0 : i32, i32
  }
  func.func @transform_7(%arg0: i32) -> (i32, i32) {
    %c0_i32 = arith.constant 0 : i32
    %c0_i32_0 = arith.constant 0 : i32
    %c0_i32_1 = arith.constant 0 : i32
    return %c0_i32, %c0_i32_0 : i32, i32
  }
  func.func @transform_8(%arg0: i32) -> (i32, i32) {
    %c0_i32 = arith.constant 0 : i32
    %c0_i32_0 = arith.constant 0 : i32
    %c0_i32_1 = arith.constant 0 : i32
    return %c0_i32, %c0_i32_0 : i32, i32
  }
  func.func @transform_9(%arg0: i32) -> (i32, i32, i32, i32) {
    %c0_i32 = arith.constant 0 : i32
    %c0_i32_0 = arith.constant 0 : i32
    %c0_i32_1 = arith.constant 0 : i32
    %c0_i32_2 = arith.constant 0 : i32
    return %arg0, %c0_i32, %c0_i32_0, %c0_i32_1 : i32, i32, i32, i32
  }
}

</mosaic_0001>

<bundles_post_ra>
// kernel: tpu_custom_call.1
= control target key start
LH: loop header
LB: loop body
LE: loop exit
PB: predicated region body
PF: predicated region fallthrough
CT: control target
= control target key end

     0   :  { %14 = vsyncpa [#allocation6], 0  ;;  %s5284_s0 = inlined_call_operand.vmem [shape: f32[2,16,16,4], index: 0, kind: input, shape index: {}]   ;;  %s5285_s1 = inlined_call_operand.vmem [shape: f32[9,4], index: 1, kind: input, shape index: {}]   ;;  %s5286_s2 = inlined_call_operand.vmem [shape: bf16[4,8], index: 2, kind: input, shape index: {}]   ;;  %s5287_s3 = inlined_call_operand.vmem [shape: f32[1,8], index: 3, kind: input, shape index: {}]   ;;  %s5288_s4 = inlined_call_operand.vmem [shape: f32[9,8], index: 4, kind: input, shape index: {}]   ;;  %s5289_s5 = inlined_call_operand.vmem [shape: bf16[8,8], index: 5, kind: input, shape index: {}]   ;;  %s5290_s6 = inlined_call_operand.vmem [shape: f32[1,8], index: 6, kind: input, shape index: {}]   ;;  %s5291_s7 = inlined_call_operand.vmem [shape: bf16[4,8], index: 7, kind: input, shape index: {}]   ;;  %s5292_s8 = inlined_call_operand.vmem [shape: f32[1,8], index: 8, kind: input, shape index: {}]   ;;  %s5293_s9 = inlined_call_operand.hbm [shape: f32[2,8,8,8], index: 9, kind: output, shape index: {}]  }
   0x1   :  { %16 = vsyncpa [#allocation6 + $0x1], 0  ;;  %s3320_s30 = smov 0   ;;  %s3322_s10 = smov 0  }
   0x2   :  { %s3324_s11 = smov 0   ;;  %s3326_s12 = smov 0  }
   0x3 LB: > { %s3341_s13 = sadd.s32 4294967295, %s3264_s12   ;;  %s3098_s14 = sadd.s32 4294967294, %s3264_s12   ;;  %s3264_s12 = sphi %s3326_s12, %s5376_s12   ;;  %s3260_s11 = sphi %s3324_s11, %s5375_s11   ;;  %s3256_s10 = sphi %s3322_s10, %s5374_s10   ;;  %s3252_s30 = sphi %s3320_s30, %s5373_s30  }
   0x4   : > { %s3345_s15 = sadd.s32 1, %s3264_s12   ;;  %s223_s16 = sadd.s32 1, %s3260_s11 }
   0x5   : > { %s220_s17 = ssub.s32 %s3264_s12, %s3345_s15  ;;  %p233_p0 = scmp.ne.s32.totalorder %s3260_s11, %s3256_s10 }
   0x6   : > { %p221_p1 = scmp.eq.s32.totalorder %s220_s17, 0  ;;  %p234_p2 = scmp.eq.s32.totalorder %s3341_s13, 1 }
   0x7   : > { %p239_p3 = scmp.ne.s32.totalorder %s3256_s10, %s3252_s30  ;;  %p240_p4 = scmp.eq.s32.totalorder %s3098_s14, 1 }
   0x8   : > { %s3356_s18 = scalar_select %p221_p1, %s3260_s11, %s223_s16  }
   0x9   : > { %p3358_p5 = por %p234_p2, %p233_p0  ;;  %p3362_p6 = por %p240_p4, %p239_p3 }
   0xa   : > { %p3101_p7 = scmp.ge.s32.totalorder %s3264_s12, 1  ;;  %p290_p8 = scmp.lt.s32.totalorder %s3264_s12, 3 }
   0xc   : > { %p291_p9 = pnand %p3101_p7, %p290_p8 }
   0xe   : > { %294 = sbr.rel (%p291_p9) target bundleno = 640 (0x280), region = 56 }
  0x13   : > { %v1336_v0 = vld [vmem:[%s5286_s2] sm:$0x3]  ;;  %vm1385_vm0 = vcmask 1041408   ;;  %p326_p10 = scmp.lt.s32.totalorder %s3341_s13, 1  ;;  %vm332_vm1 = vcmask 64512   ;;  %v3266_v2 = vmov 0.0  }
  0x14   : > { %v1387_v1 = vsel %vm1385_vm0, %v1336_v0, 0  ;;  %333 = vst.msk [vmem:[#allocation2] sm:$0xff] %vm332_vm1, %v3266_v2  ;;  %vm335_vm2 = vcmask 58368   ;;  %vm341_vm3 = vcmask 57344   ;;  %v3381_v3 = vld [vmem:[%s5285_s1] sm:$0xff]  ;;  %vm443_vm4 = vcmask 31744  }
  0x15   : > { %1396 = vmatpush.bf16.msra.mxu0 %v1387_v1  ;;  %s327_s23 = scalar_select %p326_p10, %s3341_s13, 1  ;;  %334 = vst.msk [vmem:[#allocation2 + $0x8] sm:$0xff] %vm332_vm1, %v3266_v2  ;;  %3148 = vmatpush.bf16.msra.mxu3 %v1387_v1  ;;  %v3395_v4 = vperm.slane %v3381_v3, 0  ;;  %v3403_v8 = vperm.slane %v3381_v3, 1  ;;  %v3411_v13 = vperm.slane %v3381_v3, 2  ;;  %v3425_v28 = vperm.slane %v3381_v3, 3 }
  0x16   : > { %336 = vst.msk [vmem:[#allocation2 + $0x10] sm:$0x3] %vm335_vm2, %v3266_v2  ;;  %v3428_v29 = vperm.slane %v3381_v3, 4  ;;  %v3436_v32 = vperm.slane %v3381_v3, 5  ;;  %v3445_v41 = vperm.slane %v3381_v3, 6  ;;  %v3459_v49 = vperm.slane %v3381_v3, 7 }
  0x17   : > { %s3146_s26 = sshll.u32 %s327_s23, 8  ;;  %342 = vst.msk [vmem:[#allocation2] sm:$0x1] %vm341_vm3, %v3266_v2  ;;  %v3475_v56 = vld [vmem:[%s5285_s1 + $0x8] ss:$0 sm:$0xff]  ;;  %vm2486_vm5 = vcmask 1043456  }
  0x18   : > { %s3390_s29 = scalar_lea.vmem %s5284_s0, %s3146_s26  ;;  %343 = vst.msk [vmem:[#allocation2 + $0x18] sm:$0x1] %vm341_vm3, %v3266_v2  ;;  %s3147_s17 = sshll.u32 %s3341_s13, 6 }
  0x19   : > { %344 = vst.msk [vmem:[#allocation2 + $0x30] sm:$0x1] %vm341_vm3, %v3266_v2  ;;  %v378_v5 = vld [vmem:[%s3390_s29] sm:$0xff]  ;;  %v379_v6 = vld [vmem:[%s3390_s29 + $0x8] sm:$0xff]  ;;  %v380_v7 = vld [vmem:[%s3390_s29 + $0x10] sm:$0xff]  ;;  %s3032_s23 = scalar_lea.hbm %s5293_s9, %s3147_s17  ;;  %s3222_s17 = scalar_lea.hbm %s5293_s9, 128 }
  0x1a   : > { %360 = vst.msk [vmem:[#allocation2 + $0x11] sm:$0x1] %vm341_vm3, %v3266_v2  ;;  %v381_v9 = vld [vmem:[%s3390_s29 + $0x18] sm:$0xff]  ;;  %v410_v10 = vmax.f32 %v378_v5, 0.0  ;;  %v411_v11 = vmax.f32 %v379_v6, 0.0  ;;  %v412_v12 = vmax.f32 %v380_v7, 0.0 }
  0x1b   : > { %361 = vst.msk [vmem:[#allocation2 + $0x29] sm:$0x1] %vm341_vm3, %v3266_v2  ;;  %v413_v14 = vmax.f32 %v381_v9, 0.0  ;;  %s3035_s25 = sshll.u32 %s3032_s23, 4  ;;  %s3036_s25 = int_to_ptr.hbm [resolvable:$true] %s3035_s25 }
  0x1c   : > { %362 = vst.msk [vmem:[#allocation2 + $0x41] sm:$0x1] %vm341_vm3, %v3266_v2  ;;  %v479_v15 = vld [vmem:[#allocation2 + $0x8] sm:$0xff]  ;;  %s3216_s26 = sshra.s32 %s3036_s25, 4  ;;  %s3217_s26 = int_to_ptr.hbm [resolvable:$true] %s3216_s26 }
  0x1d   : > { %v543_v16 = vld [vmem:[#allocation2 + $0x1] sm:$0xff]  ;;  %444 = vst.msk [vmem:[#allocation2 + $0x19] sm:$0xff] %vm443_vm4, %v410_v10  ;;  %v512_v18 = vmul.f32 %v3395_v4, %v479_v15  ;;  %v544_v19 = vld [vmem:[#allocation2 + $0x9] sm:$0xff]  ;;  %p3223_p0 = scmp.lt.s32.totalorder %s3217_s26, %s5293_s9 }
  0x1e   : > { %v640_v17 = vld [vmem:[#allocation2 + $0x2] sm:$0xff]  ;;  %v576_v20 = vmul.f32 %v3403_v8, %v543_v16  ;;  %445 = vst.msk [vmem:[#allocation2 + $0x21] sm:$0xff] %vm443_vm4, %v411_v11  ;;  %v577_v22 = vmul.f32 %v3403_v8, %v544_v19 }
  0x1f   : > { %v478_v21 = vld [vmem:[#allocation2] sm:$0xff]  ;;  %446 = vst.msk [vmem:[#allocation2 + $0x31] sm:$0xff] %vm443_vm4, %v412_v12  ;;  %v673_v24 = vmul.f32 %v3411_v13, %v640_v17 }
  0x20   : > { %v511_v23 = vmul.f32 %v3395_v4, %v478_v21  ;;  %447 = vst.msk [vmem:[#allocation2 + $0x39] sm:$0xff] %vm443_vm4, %v413_v14  ;;  %v609_v25 = vadd.f32 %v577_v22, %v512_v18  ;;  %v382_v22 = vld [vmem:[%s3390_s29 + $0x20] sm:$0xff] }
  0x21   : > { %v641_v27 = vld [vmem:[#allocation2 + $0xa] sm:$0xff]  ;;  %338 = vst.msk [vmem:[#allocation2 + $0x198] sm:$0xff] %vm332_vm1, %v3266_v2 }
  0x22   : > { %v608_v26 = vadd.f32 %v576_v20, %v511_v23  ;;  %v674_v30 = vmul.f32 %v3411_v13, %v641_v27  ;;  %339 = vst.msk [vmem:[#allocation2 + $0x1a0] sm:$0xff] %vm332_vm1, %v3266_v2  ;;  %v383_v23 = vld [vmem:[%s3390_s29 + $0x28] sm:$0xff] }
  0x23   : > { %340 = vst.msk [vmem:[#allocation2 + $0x1a8] sm:$0x3] %vm335_vm2, %v3266_v2 }
  0x24   : > { %v705_v31 = vadd.f32 %v673_v24, %v608_v26  ;;  %v706_v33 = vadd.f32 %v674_v30, %v609_v25  ;;  %v737_v34 = vld [vmem:[#allocation2 + $0x18] sm:$0xff]  ;;  %345 = vst.msk [vmem:[#allocation2 + $0x48] sm:$0x1] %vm341_vm3, %v3266_v2  ;;  %v414_v30 = vmax.f32 %v382_v22, 0.0 }
  0x25   : > { %v834_v35 = vld [vmem:[#allocation2 + $0x19] sm:$0xff]  ;;  %v770_v37 = vmul.f32 %v3425_v28, %v737_v34  ;;  %v835_v38 = vld [vmem:[#allocation2 + $0x21] sm:$0xff]  ;;  %346 = vst.msk [vmem:[#allocation2 + $0x60] sm:$0x1] %vm341_vm3, %v3266_v2  ;;  %v513_v12 = vmul.f32 %v737_v34, %v3395_v4 }
  0x26   : > { %v738_v36 = vld [vmem:[#allocation2 + $0x20] sm:$0xff]  ;;  %v867_v39 = vmul.f32 %v3428_v29, %v834_v35  ;;  %v868_v43 = vmul.f32 %v3428_v29, %v835_v38  ;;  %v3451_v45 = vld [vmem:[#allocation2 + $0x30] sm:$0xff]  ;;  %347 = vst.msk [vmem:[#allocation2 + $0x78] sm:$0x1] %vm341_vm3, %v3266_v2  ;;  %v578_v14 = vmul.f32 %v834_v35, %v3403_v8  ;;  %v579_v16 = vmul.f32 %v835_v38, %v3403_v8 }
  0x27   : > { %v931_v40 = vld [vmem:[#allocation2 + $0x1a] sm:$0xff]  ;;  %v771_v42 = vmul.f32 %v3425_v28, %v738_v36  ;;  %v932_v44 = vld [vmem:[#allocation2 + $0x22] sm:$0xff]  ;;  %v802_v46 = vadd.f32 %v770_v37, %v705_v31  ;;  %348 = vst.msk [vmem:[#allocation2 + $0x90] sm:$0x1] %vm341_vm3, %v3266_v2  ;;  %v3464_v52 = vld [vmem:[#allocation2 + $0x31] sm:$0xff]  ;;  %v1062_v54 = vmul.f32 %v3445_v41, %v3451_v45  ;;  %v514_v15 = vmul.f32 %v738_v36, %v3395_v4 }
  0x28   : > { %v964_v47 = vmul.f32 %v3436_v32, %v931_v40  ;;  %v3456_v48 = vld [vmem:[#allocation2 + $0x38] sm:$0xff]  ;;  %v965_v51 = vmul.f32 %v3436_v32, %v932_v44  ;;  %349 = vst.msk [vmem:[#allocation2 + $0xa8] sm:$0x1] %vm341_vm3, %v3266_v2  ;;  %v1159_v61 = vmul.f32 %v3459_v49, %v3464_v52  ;;  %v610_v18 = vadd.f32 %v578_v14, %v513_v12 }
  0x29   : > { %v803_v50 = vadd.f32 %v771_v42, %v706_v33  ;;  %v899_v53 = vadd.f32 %v867_v39, %v802_v46  ;;  %v3470_v55 = vld [vmem:[#allocation2 + $0x39] sm:$0xff]  ;;  %350 = vst.msk [vmem:[#allocation2 + $0xc0] sm:$0x1] %vm341_vm3, %v3266_v2  ;;  %v1063_v58 = vmul.f32 %v3445_v41, %v3456_v48  ;;  %v675_v19 = vmul.f32 %v931_v40, %v3411_v13  ;;  %v384_v33 = vld [vmem:[%s3390_s29 + $0x30] sm:$0xff]  ;;  %v387_v46 = vld [vmem:[%s3390_s29 + $0x48] sm:$0xff] }
  0x2a   : > { %v3481_v59 = vld [vmem:[#allocation2 + $0x32] sm:$0xff]  ;;  %351 = vst.msk [vmem:[#allocation2 + $0xd8] sm:$0x1] %vm341_vm3, %v3266_v2  ;;  %v3487_v62 = vld [vmem:[#allocation2 + $0x3a] sm:$0xff]  ;;  %v1160_v0 = vmul.f32 %v3459_v49, %v3470_v55  ;;  %v611_v20 = vadd.f32 %v579_v16, %v514_v15  ;;  %v676_v21 = vmul.f32 %v932_v44, %v3411_v13  ;;  %v772_v25 = vmul.f32 %v3451_v45, %v3425_v28 }
  0x2b   : > { %v900_v57 = vadd.f32 %v868_v43, %v803_v50  ;;  %v996_v60 = vadd.f32 %v964_v47, %v899_v53  ;;  %352 = vst.msk [vmem:[#allocation2 + $0xf0] sm:$0x1] %vm341_vm3, %v3266_v2  ;;  %v1256_v3 = vmul.f32 %v3475_v56, %v3481_v59  ;;  %v1257_v6 = vmul.f32 %v3475_v56, %v3487_v62  ;;  %v385_v36 = vld [vmem:[%s3390_s29 + $0x38] sm:$0xff]  ;;  %v386_v44 = vld [vmem:[%s3390_s29 + $0x40] sm:$0xff] }
  0x2c   : > { %353 = vst.msk [vmem:[#allocation2 + $0x108] sm:$0x1] %vm341_vm3, %v3266_v2  ;;  %v707_v24 = vadd.f32 %v675_v19, %v610_v18  ;;  %v708_v26 = vadd.f32 %v676_v21, %v611_v20  ;;  %v773_v27 = vmul.f32 %v3456_v48, %v3425_v28  ;;  %v415_v31 = vmax.f32 %v383_v23, 0.0 }
  0x2d   : > { %v997_v63 = vadd.f32 %v965_v51, %v900_v57  ;;  %v1094_v1 = vadd.f32 %v1062_v54, %v996_v60  ;;  %354 = vst.msk [vmem:[#allocation2 + $0x120] sm:$0x1] %vm341_vm3, %v3266_v2  ;;  %v869_v35 = vmul.f32 %v3464_v52, %v3428_v29  ;;  %v515_v37 = vmul.f32 %v3451_v45, %v3395_v4 }
  0x2e   : > { %355 = vst.msk [vmem:[#allocation2 + $0x138] sm:$0x1] %vm341_vm3, %v3266_v2  ;;  %v804_v34 = vadd.f32 %v772_v25, %v707_v24  ;;  %v580_v38 = vmul.f32 %v3464_v52, %v3403_v8  ;;  %v805_v39 = vadd.f32 %v773_v27, %v708_v26  ;;  %v870_v40 = vmul.f32 %v3470_v55, %v3428_v29 }
  0x2f   : > { %v1095_v5 = vadd.f32 %v1063_v58, %v997_v63  ;;  %v1191_v7 = vadd.f32 %v1159_v61, %v1094_v1  ;;  %356 = vst.msk [vmem:[#allocation2 + $0x150] sm:$0x1] %vm341_vm3, %v3266_v2  ;;  %v516_v42 = vmul.f32 %v3456_v48, %v3395_v4  ;;  %v581_v43 = vmul.f32 %v3470_v55, %v3403_v8 }
  0x30   : > { %357 = vst.msk [vmem:[#allocation2 + $0x168] sm:$0x1] %vm341_vm3, %v3266_v2  ;;  %v416_v45 = vmax.f32 %v384_v33, 0.0  ;;  %v966_v47 = vmul.f32 %v3481_v59, %v3436_v32  ;;  %v967_v50 = vmul.f32 %v3487_v62, %v3436_v32  ;;  %v417_v51 = vmax.f32 %v385_v36, 0.0 }
  0x31   : > { %v1192_v9 = vadd.f32 %v1160_v0, %v1095_v5  ;;  %v1288_v10 = vadd.f32 %v1256_v3, %v1191_v7  ;;  %358 = vst.msk [vmem:[#allocation2 + $0x180] sm:$0x1] %vm341_vm3, %v3266_v2  ;;  %v901_v52 = vadd.f32 %v869_v35, %v804_v34  ;;  %v612_v48 = vadd.f32 %v580_v38, %v515_v37 }
  0x32   : > { %363 = vst.msk [vmem:[#allocation2 + $0x59] sm:$0x1] %vm341_vm3, %v3266_v2  ;;  %v677_v53 = vmul.f32 %v3481_v59, %v3411_v13  ;;  %v418_v54 = vmax.f32 %v386_v44, 0.0  ;;  %v902_v55 = vadd.f32 %v870_v40, %v805_v39  ;;  %v613_v57 = vadd.f32 %v581_v43, %v516_v42 }
  0x33   : > { %v1289_v11 = vadd.f32 %v1257_v6, %v1192_v9  ;;  %364 = vst.msk [vmem:[#allocation2 + $0x71] sm:$0x1] %vm341_vm3, %v3266_v2  ;;  %v678_v58 = vmul.f32 %v3487_v62, %v3411_v13  ;;  %v419_v60 = vmax.f32 %v387_v46, 0.0  ;;  %v998_v61 = vadd.f32 %v966_v47, %v901_v52 }
  0x34   : > { %365 = vst.msk [vmem:[#allocation2 + $0x89] sm:$0x1] %vm341_vm3, %v3266_v2  ;;  %v709_v63 = vadd.f32 %v677_v53, %v612_v48  ;;  %v999_v0 = vadd.f32 %v967_v50, %v902_v55 }
  0x35   : > { %v1320_v17 = vpack.c.bf16 %v1289_v11, %v1288_v10  ;;  %366 = vst.msk [vmem:[#allocation2 + $0xa1] sm:$0x1] %vm341_vm3, %v3266_v2  ;;  %v710_v3 = vadd.f32 %v678_v58, %v613_v57 }
  0x36   : > { %367 = vst.msk [vmem:[#allocation2 + $0xb9] sm:$0x1] %vm341_vm3, %v3266_v2 }
  0x37   : > { %3105 = vmatmul.msk.bf16.vlgmr.msra.gmra.mxu0 %vm443_vm4, %v1320_v17  ;;  %368 = vst.msk [vmem:[#allocation2 + $0xd1] sm:$0x1] %vm341_vm3, %v3266_v2 }
  0x38   : > { %369 = vst.msk [vmem:[#allocation2 + $0xe9] sm:$0x1] %vm341_vm3, %v3266_v2 }
  0x39   : > { %370 = vst.msk [vmem:[#allocation2 + $0x101] sm:$0x1] %vm341_vm3, %v3266_v2 }
  0x3a   : > { %371 = vst.msk [vmem:[#allocation2 + $0x119] sm:$0x1] %vm341_vm3, %v3266_v2 }
  0x3b   : > { %372 = vst.msk [vmem:[#allocation2 + $0x131] sm:$0x1] %vm341_vm3, %v3266_v2 }
  0x3c   : > { %373 = vst.msk [vmem:[#allocation2 + $0x149] sm:$0x1] %vm341_vm3, %v3266_v2 }
  0x3d   : > { %374 = vst.msk [vmem:[#allocation2 + $0x161] sm:$0x1] %vm341_vm3, %v3266_v2 }
  0x3e   : > { %375 = vst.msk [vmem:[#allocation2 + $0x179] sm:$0x1] %vm341_vm3, %v3266_v2 }
  0x3f   : > { %376 = vst.msk [vmem:[#allocation2 + $0x191] sm:$0x1] %vm341_vm3, %v3266_v2 }
  0x40   : > { %448 = vst.msk [vmem:[#allocation2 + $0x49] sm:$0xff] %vm443_vm4, %v414_v30 }
  0x41   : > { %449 = vst.msk [vmem:[#allocation2 + $0x51] sm:$0xff] %vm443_vm4, %v415_v31 }
  0x42   : > { %359 = vst.msk [vmem:[#allocation2 + $0x198] sm:$0x1] %vm341_vm3, %v3266_v2 }
  0x43   : > { %377 = vst.msk [vmem:[#allocation2 + $0x1a9] sm:$0x1] %vm341_vm3, %v3266_v2 }
  0x44   : > { %450 = vst.msk [vmem:[#allocation2 + $0x61] sm:$0xff] %vm443_vm4, %v416_v45 }
  0x45   : > { %451 = vst.msk [vmem:[#allocation2 + $0x69] sm:$0xff] %vm443_vm4, %v417_v51 }
  0x46   : > { %452 = vst.msk [vmem:[#allocation2 + $0x79] sm:$0xff] %vm443_vm4, %v418_v54 }
  0x47   : > { %v1031_v59 = vld [vmem:[#allocation2 + $0x48] sm:$0xff]  ;;  %453 = vst.msk [vmem:[#allocation2 + $0x81] sm:$0xff] %vm443_vm4, %v419_v60 }
  0x48   : > { %v1128_v1 = vld [vmem:[#allocation2 + $0x49] sm:$0xff]  ;;  %v1064_v5 = vmul.f32 %v3445_v41, %v1031_v59  ;;  %v1129_v6 = vld [vmem:[#allocation2 + $0x51] sm:$0xff]  ;;  %v774_v9 = vmul.f32 %v1031_v59, %v3425_v28  ;;  %v517_v51 = vmul.f32 %v1031_v59, %v3395_v4 }
  0x49   : > { %v1032_v2 = vld [vmem:[#allocation2 + $0x50] sm:$0xff]  ;;  %v1161_v62 = vmul.f32 %v3459_v49, %v1128_v1  ;;  %v871_v10 = vmul.f32 %v1128_v1, %v3428_v29  ;;  %v1162_v12 = vmul.f32 %v3459_v49, %v1129_v6  ;;  %v872_v20 = vmul.f32 %v1129_v6, %v3428_v29 }
  0x4a   : > { %v1225_v7 = vld [vmem:[#allocation2 + $0x4a] sm:$0xff]  ;;  %v1065_v11 = vmul.f32 %v3445_v41, %v1032_v2  ;;  %v1226_v14 = vld [vmem:[#allocation2 + $0x52] sm:$0xff]  ;;  %v775_v16 = vmul.f32 %v1032_v2, %v3425_v28  ;;  %v1096_v17 = vadd.f32 %v1064_v5, %v998_v61  ;;  %v806_v19 = vadd.f32 %v774_v9, %v709_v63 }
  0x4b   : > { %v1258_v15 = vmul.f32 %v3475_v56, %v1225_v7  ;;  %v1259_v18 = vmul.f32 %v3475_v56, %v1226_v14  ;;  %v968_v23 = vmul.f32 %v1225_v7, %v3436_v32  ;;  %v969_v24 = vmul.f32 %v1226_v14, %v3436_v32  ;;  %v3596_v25 = vld [vmem:[#allocation2 + $0x60] sm:$0xff] }
  0x4c   : > { %v1097_v21 = vadd.f32 %v1065_v11, %v999_v0  ;;  %v807_v22 = vadd.f32 %v775_v16, %v710_v3  ;;  %v3598_v26 = vld [vmem:[#allocation2 + $0x61] sm:$0xff]  ;;  %v1193_v27 = vadd.f32 %v1161_v62, %v1096_v17  ;;  %v903_v30 = vadd.f32 %v871_v10, %v806_v19  ;;  %v1131_v34 = vld [vmem:[#allocation2 + $0x69] sm:$0xff]  ;;  %v389_v17 = vld [vmem:[%s3390_s29 + $0x58] sm:$0xff] }
  0x4d   : > { %v1034_v31 = vld [vmem:[#allocation2 + $0x68] sm:$0xff]  ;;  %v1066_v33 = vmul.f32 %v3445_v41, %v3596_v25  ;;  %v1163_v35 = vmul.f32 %v3459_v49, %v3598_v26  ;;  %v1164_v40 = vmul.f32 %v3459_v49, %v1131_v34  ;;  %v518_v52 = vmul.f32 %v1032_v2, %v3395_v4  ;;  %v3617_v2 = vld [vmem:[#allocation2 + $0x78] sm:$0xff]  ;;  %v388_v16 = vld [vmem:[%s3390_s29 + $0x50] sm:$0xff] }
  0x4e   : > { %v1227_v36 = vld [vmem:[#allocation2 + $0x62] sm:$0xff]  ;;  %v1194_v37 = vadd.f32 %v1162_v12, %v1097_v21  ;;  %v904_v38 = vadd.f32 %v872_v20, %v807_v22  ;;  %v1067_v39 = vmul.f32 %v3445_v41, %v1034_v31  ;;  %v1228_v42 = vld [vmem:[#allocation2 + $0x6a] sm:$0xff]  ;;  %v1290_v43 = vadd.f32 %v1258_v15, %v1193_v27  ;;  %v3632_v15 = vld [vmem:[#allocation2 + $0x7a] sm:$0xff] }
  0x4f   : > { %v1000_v44 = vadd.f32 %v968_v23, %v903_v30  ;;  %v1260_v45 = vmul.f32 %v3475_v56, %v1227_v36  ;;  %v1261_v46 = vmul.f32 %v3475_v56, %v1228_v42  ;;  %v582_v53 = vmul.f32 %v1128_v1, %v3403_v8  ;;  %v3619_v1 = vld [vmem:[#allocation2 + $0x80] sm:$0xff] }
  0x50   : > { %v1291_v47 = vadd.f32 %v1259_v18, %v1194_v37  ;;  %v1001_v50 = vadd.f32 %v969_v24, %v904_v38  ;;  %v583_v54 = vmul.f32 %v1129_v6, %v3403_v8  ;;  %v679_v55 = vmul.f32 %v1225_v7, %v3411_v13  ;;  %v3625_v7 = vld [vmem:[#allocation2 + $0x79] sm:$0xff]  ;;  %v3627_v9 = vld [vmem:[#allocation2 + $0x81] sm:$0xff] }
  0x51   : > { %v1098_v48 = vadd.f32 %v1066_v33, %v1000_v44  ;;  %v680_v60 = vmul.f32 %v1226_v14, %v3411_v13  ;;  %v776_v61 = vmul.f32 %v3596_v25, %v3425_v28  ;;  %v614_v0 = vadd.f32 %v582_v53, %v517_v51  ;;  %v3649_v33 = vld [vmem:[#allocation2 + $0x82] sm:$0xff] }
  0x52   : > { %v1321_v57 = vpack.c.bf16 %v1291_v47, %v1290_v43  ;;  %v1099_v58 = vadd.f32 %v1067_v39, %v1001_v50  ;;  %v615_v59 = vadd.f32 %v583_v54, %v518_v52  ;;  %v777_v3 = vmul.f32 %v1034_v31, %v3425_v28  ;;  %v396_v54 = vld [vmem:[%s3390_s29 + $0x90] sm:$0xff] }
  0x53   : > { %v1195_v63 = vadd.f32 %v1163_v35, %v1098_v48  ;;  %v873_v6 = vmul.f32 %v3598_v26, %v3428_v29  ;;  %v874_v62 = vmul.f32 %v1131_v34, %v3428_v29  ;;  %v711_v11 = vadd.f32 %v679_v55, %v614_v0  ;;  %v395_v48 = vld [vmem:[%s3390_s29 + $0x88] sm:$0xff]  ;;  %v397_v55 = vld [vmem:[%s3390_s29 + $0x98] sm:$0xff] }
  0x54   : > { %3106 = vmatmul.msk.bf16.gmra.mxu0 %vm443_vm4, %v1321_v57  ;;  %v1196_v5 = vadd.f32 %v1164_v40, %v1099_v58  ;;  %v712_v12 = vadd.f32 %v680_v60, %v615_v59  ;;  %v970_v14 = vmul.f32 %v1227_v36, %v3436_v32  ;;  %v971_v19 = vmul.f32 %v1228_v42, %v3436_v32 }
  0x55   : > { %v3629_v10 = vadd.f32 %v1260_v45, %v1195_v63  ;;  %v1068_v20 = vmul.f32 %v3445_v41, %v3617_v2  ;;  %v1069_v21 = vmul.f32 %v3445_v41, %v3619_v1  ;;  %v808_v22 = vadd.f32 %v776_v61, %v711_v11  ;;  %v398_v63 = vld [vmem:[%s3390_s29 + $0xa0] sm:$0xff] }
  0x56   : > { %v3636_v18 = vadd.f32 %v1261_v46, %v1196_v5  ;;  %v809_v23 = vadd.f32 %v777_v3, %v712_v12  ;;  %v1165_v24 = vmul.f32 %v3459_v49, %v3625_v7  ;;  %v1166_v27 = vmul.f32 %v3459_v49, %v3627_v9  ;;  %v399_v3 = vld [vmem:[%s3390_s29 + $0xa8] sm:$0xff] }
  0x57   : > { %v1262_v35 = vmul.f32 %v3475_v56, %v3632_v15  ;;  %v420_v37 = vmax.f32 %v388_v16, 0.0  ;;  %v421_v38 = vmax.f32 %v389_v17, 0.0  ;;  %v905_v39 = vadd.f32 %v873_v6, %v808_v22  ;;  %v390_v16 = vld [vmem:[%s3390_s29 + $0x60] sm:$0xff]  ;;  %v391_v17 = vld [vmem:[%s3390_s29 + $0x68] sm:$0xff] }
  0x58   : > { %v1322_v30 = vpack.c.bf16 %v3636_v18, %v3629_v10  ;;  %v906_v40 = vadd.f32 %v874_v62, %v809_v23  ;;  %v519_v43 = vmul.f32 %v3596_v25, %v3395_v4  ;;  %v520_v44 = vmul.f32 %v1034_v31, %v3395_v4 }
  0x59   : > { %454 = vst.msk [vmem:[#allocation2 + $0x91] sm:$0xff] %vm443_vm4, %v420_v37  ;;  %v584_v45 = vmul.f32 %v3598_v26, %v3403_v8  ;;  %v585_v46 = vmul.f32 %v1131_v34, %v3403_v8  ;;  %v681_v47 = vmul.f32 %v1227_v36, %v3411_v13  ;;  %v682_v50 = vmul.f32 %v1228_v42, %v3411_v13  ;;  %v394_v26 = vld [vmem:[%s3390_s29 + $0x80] sm:$0xff] }
  0x5a   : > { %v1002_v51 = vadd.f32 %v970_v14, %v905_v39  ;;  %v1003_v52 = vadd.f32 %v971_v19, %v906_v40  ;;  %v1263_v25 = vmul.f32 %v3475_v56, %v3649_v33  ;;  %455 = vst.msk [vmem:[#allocation2 + $0x99] sm:$0xff] %vm443_vm4, %v421_v38  ;;  %v778_v31 = vmul.f32 %v3617_v2, %v3425_v28 }
  0x5b   : > { %v616_v53 = vadd.f32 %v584_v45, %v519_v43  ;;  %v617_v34 = vadd.f32 %v585_v46, %v520_v44  ;;  %v779_v36 = vmul.f32 %v3619_v1, %v3425_v28  ;;  %v875_v42 = vmul.f32 %v3625_v7, %v3428_v29 }
  0x5c   : > { %v1100_v57 = vadd.f32 %v1068_v20, %v1002_v51  ;;  %v1101_v58 = vadd.f32 %v1069_v21, %v1003_v52  ;;  %v876_v60 = vmul.f32 %v3627_v9, %v3428_v29  ;;  %v972_v61 = vmul.f32 %v3632_v15, %v3436_v32 }
  0x5d   : > { %v713_v0 = vadd.f32 %v681_v47, %v616_v53  ;;  %v714_v59 = vadd.f32 %v682_v50, %v617_v34  ;;  %v426_v5 = vmax.f32 %v394_v26, 0.0  ;;  %v427_v6 = vmax.f32 %v395_v48, 0.0 }
  0x5e   : > { %v1197_v62 = vadd.f32 %v1165_v24, %v1100_v57  ;;  %v1198_v11 = vadd.f32 %v1166_v27, %v1101_v58  ;;  %v428_v12 = vmax.f32 %v396_v54, 0.0  ;;  %v429_v14 = vmax.f32 %v397_v55, 0.0 }
  0x5f   : > { %v810_v19 = vadd.f32 %v778_v31, %v713_v0  ;;  %v811_v20 = vadd.f32 %v779_v36, %v714_v59  ;;  %v973_v21 = vmul.f32 %v3649_v33, %v3436_v32  ;;  %v430_v22 = vmax.f32 %v398_v63, 0.0  ;;  %460 = vst.msk [vmem:[#allocation2 + $0xd9] sm:$0xff] %vm443_vm4, %v426_v5 }
  0x60   : > { %v3686_v23 = vadd.f32 %v1262_v35, %v1197_v62  ;;  %v3688_v37 = vadd.f32 %v1263_v25, %v1198_v11  ;;  %v3690_v38 = vld [vmem:[#allocation2 + $0x90] sm:$0xff]  ;;  %v431_v27 = vmax.f32 %v399_v3, 0.0  ;;  %461 = vst.msk [vmem:[#allocation2 + $0xe1] sm:$0xff] %vm443_vm4, %v427_v6  ;;  %v422_v39 = vmax.f32 %v390_v16, 0.0 }
  0x61   : > { %v3692_v24 = vld [vmem:[#allocation2 + $0x91] sm:$0xff]  ;;  %v907_v40 = vadd.f32 %v875_v42, %v810_v19  ;;  %v908_v43 = vadd.f32 %v876_v60, %v811_v20  ;;  %v1070_v45 = vmul.f32 %v3445_v41, %v3690_v38  ;;  %v3699_v46 = vld [vmem:[#allocation2 + $0x99] sm:$0xff]  ;;  %462 = vst.msk [vmem:[#allocation2 + $0xf1] sm:$0xff] %vm443_vm4, %v428_v12  ;;  %v423_v47 = vmax.f32 %v391_v17, 0.0 }
  0x62   : > { %v3695_v44 = vld [vmem:[#allocation2 + $0x98] sm:$0xff]  ;;  %v1167_v52 = vmul.f32 %v3459_v49, %v3692_v24  ;;  %v1168_v25 = vmul.f32 %v3459_v49, %v3699_v46  ;;  %463 = vst.msk [vmem:[#allocation2 + $0xf9] sm:$0xff] %vm443_vm4, %v429_v14  ;;  %v521_v34 = vmul.f32 %v3617_v2, %v3395_v4  ;;  %v522_v36 = vmul.f32 %v3619_v1, %v3395_v4 }
  0x63   : > { %v3701_v35 = vld [vmem:[#allocation2 + $0x92] sm:$0xff]  ;;  %v1071_v51 = vmul.f32 %v3445_v41, %v3695_v44  ;;  %v3712_v31 = vld [vmem:[#allocation2 + $0x9a] sm:$0xff]  ;;  %v1004_v26 = vadd.f32 %v972_v61, %v907_v40  ;;  %v1005_v48 = vadd.f32 %v973_v21, %v908_v43  ;;  %464 = vst.msk [vmem:[#allocation2 + $0x109] sm:$0xff] %vm443_vm4, %v430_v22  ;;  %v586_v10 = vmul.f32 %v3625_v7, %v3403_v8 }
  0x64   : > { %3107 = vmatmul.msk.bf16.gmra.mxu0 %vm443_vm4, %v1322_v30  ;;  %v1264_v53 = vmul.f32 %v3475_v56, %v3701_v35  ;;  %465 = vst.msk [vmem:[#allocation2 + $0x111] sm:$0xff] %vm443_vm4, %v431_v27  ;;  %v587_v18 = vmul.f32 %v3627_v9, %v3403_v8  ;;  %v1265_v54 = vmul.f32 %v3475_v56, %v3712_v31 }
  0x65   : > { %v1102_v30 = vadd.f32 %v1070_v45, %v1004_v26  ;;  %v1103_v42 = vadd.f32 %v1071_v51, %v1005_v48  ;;  %456 = vst.msk [vmem:[#allocation2 + $0xa9] sm:$0xff] %vm443_vm4, %v422_v39  ;;  %v683_v55 = vmul.f32 %v3632_v15, %v3411_v13  ;;  %v618_v1 = vadd.f32 %v586_v10, %v521_v34 }
  0x66   : > { %v3736_v2 = vld [vmem:[#allocation2 + $0xd8] sm:$0xff]  ;;  %457 = vst.msk [vmem:[#allocation2 + $0xb1] sm:$0xff] %vm443_vm4, %v423_v47  ;;  %v619_v7 = vadd.f32 %v587_v18, %v522_v36  ;;  %v684_v9 = vmul.f32 %v3649_v33, %v3411_v13  ;;  %v780_v58 = vmul.f32 %v3690_v38, %v3425_v28  ;;  %v781_v14 = vmul.f32 %v3695_v44, %v3425_v28 }
  0x67   : > { %5327 = vst [vmem:[#allocation8_spill] sm:$0xff] %v3736_v2  ;;  %v3738_v57 = vld [vmem:[#allocation2 + $0xd9] sm:$0xff]  ;;  %v1199_v60 = vadd.f32 %v1167_v52, %v1102_v30  ;;  %v1200_v61 = vadd.f32 %v1168_v25, %v1103_v42  ;;  %v529_v15 = vmul.f32 %v3395_v4, %v3736_v2  ;;  %v3749_v0 = vld [vmem:[#allocation2 + $0xe1] sm:$0xff]  ;;  %v715_v27 = vadd.f32 %v683_v55, %v618_v1 }
  0x68   : > { %5328 = vst [vmem:[#allocation9_spill] sm:$0xff] %v3738_v57  ;;  %v3745_v63 = vld [vmem:[#allocation2 + $0xe0] sm:$0xff]  ;;  %v594_v59 = vmul.f32 %v3403_v8, %v3738_v57  ;;  %v595_v5 = vmul.f32 %v3403_v8, %v3749_v0  ;;  %v3763_v11 = vld [vmem:[#allocation2 + $0xf0] sm:$0xff]  ;;  %v878_v50 = vmul.f32 %v3699_v46, %v3428_v29  ;;  %v401_v2 = vld [vmem:[%s3390_s29 + $0xb8] sm:$0xff] }
  0x69   : > { %5329 = vst [vmem:[#allocation10_spill] sm:$0xff] %v3745_v63  ;;  %v3753_v3 = vld [vmem:[#allocation2 + $0xda] sm:$0xff]  ;;  %v530_v33 = vmul.f32 %v3395_v4, %v3745_v63  ;;  %v3759_v6 = vld [vmem:[#allocation2 + $0xe2] sm:$0xff]  ;;  %v3765_v12 = vld [vmem:[#allocation2 + $0xf1] sm:$0xff]  ;;  %v3769_v16 = vadd.f32 %v1264_v53, %v1199_v60  ;;  %v3779_v39 = vadd.f32 %v1265_v54, %v1200_v61  ;;  %v788_v43 = vmul.f32 %v3425_v28, %v3763_v11 }
  0x6a   : > { %5330 = vst [vmem:[#allocation11_spill] sm:$0xff] %v3749_v0  ;;  %v691_v62 = vmul.f32 %v3411_v13, %v3753_v3  ;;  %v626_v17 = vadd.f32 %v594_v59, %v529_v15  ;;  %v692_v19 = vmul.f32 %v3411_v13, %v3759_v6  ;;  %v3773_v20 = vld [vmem:[#allocation2 + $0xf8] sm:$0xff]  ;;  %v3787_v51 = vld [vmem:[#allocation2 + $0x108] sm:$0xff]  ;;  %v885_v26 = vmul.f32 %v3428_v29, %v3765_v12 }
  0x6b   : > { %5331 = vst [vmem:[#allocation12_spill] sm:$0xff] %v3753_v3  ;;  %v3775_v21 = vld [vmem:[#allocation2 + $0xf9] sm:$0xff]  ;;  %v627_v40 = vadd.f32 %v595_v5, %v530_v33  ;;  %v789_v45 = vmul.f32 %v3425_v28, %v3773_v20  ;;  %v3789_v52 = vld [vmem:[#allocation2 + $0x109] sm:$0xff]  ;;  %v3799_v36 = vld [vmem:[#allocation2 + $0x111] sm:$0xff]  ;;  %v1080_v42 = vmul.f32 %v3445_v41, %v3787_v51 }
  0x6c   : > { %5332 = vst [vmem:[#allocation13_spill] sm:$0xff] %v3759_v6  ;;  %v3777_v22 = vld [vmem:[#allocation2 + $0xf2] sm:$0xff]  ;;  %v3785_v47 = vld [vmem:[#allocation2 + $0xfa] sm:$0xff]  ;;  %v723_v25 = vadd.f32 %v691_v62, %v626_v17  ;;  %v886_v48 = vmul.f32 %v3428_v29, %v3775_v21  ;;  %v3801_v10 = vld [vmem:[#allocation2 + $0x10a] sm:$0xff]  ;;  %v1177_v60 = vmul.f32 %v3459_v49, %v3789_v52  ;;  %v1178_v61 = vmul.f32 %v3459_v49, %v3799_v36 }
  0x6d   : > { %5333 = vst [vmem:[#allocation14_spill] sm:$0xff] %v3785_v47  ;;  %v982_v53 = vmul.f32 %v3436_v32, %v3777_v22  ;;  %v3797_v34 = vld [vmem:[#allocation2 + $0x110] sm:$0xff]  ;;  %v724_v18 = vadd.f32 %v692_v19, %v627_v40  ;;  %v983_v30 = vmul.f32 %v3436_v32, %v3785_v47  ;;  %v1274_v15 = vmul.f32 %v3475_v56, %v3801_v10  ;;  %v3817_v59 = vld [vmem:[#allocation2 + $0xa8] sm:$0xff] }
  0x6e   : > { %v1081_v54 = vmul.f32 %v3445_v41, %v3797_v34  ;;  %v3809_v55 = vld [vmem:[#allocation2 + $0x112] sm:$0xff]  ;;  %v820_v1 = vadd.f32 %v788_v43, %v723_v25  ;;  %5334 = vst [vmem:[#allocation15_spill] sm:$0xff] %v3817_v59  ;;  %v716_v62 = vadd.f32 %v684_v9, %v619_v7  ;;  %v812_v17 = vadd.f32 %v780_v58, %v715_v27  ;;  %v3823_v40 = vld [vmem:[#allocation2 + $0xa9] sm:$0xff] }
  0x6f   : > { %v821_v33 = vadd.f32 %v789_v45, %v724_v18  ;;  %v1275_v5 = vmul.f32 %v3475_v56, %v3809_v55  ;;  %v3821_v19 = vld [vmem:[#allocation2 + $0xb0] sm:$0xff]  ;;  %5335 = vst [vmem:[#allocation16_spill] sm:$0xff] %v3823_v40  ;;  %v877_v25 = vmul.f32 %v3692_v24, %v3428_v29  ;;  %v974_v45 = vmul.f32 %v3701_v35, %v3436_v32 }
  0x70   : > { %v917_v43 = vadd.f32 %v885_v26, %v820_v1  ;;  %v3831_v18 = vld [vmem:[#allocation2 + $0xb1] sm:$0xff]  ;;  %v813_v9 = vadd.f32 %v781_v14, %v716_v62  ;;  %v975_v58 = vmul.f32 %v3712_v31, %v3436_v32  ;;  %v1072_v27 = vmul.f32 %v3445_v41, %v3817_v59 }
  0x71   : > { %5336 = vst [vmem:[#allocation17_spill] sm:$0xff] %v3831_v18  ;;  %v3833_v6 = vld [vmem:[#allocation2 + $0xaa] sm:$0xff]  ;;  %v918_v7 = vadd.f32 %v886_v48, %v821_v33  ;;  %v3839_v26 = vld [vmem:[#allocation2 + $0xb2] sm:$0xff]  ;;  %v909_v0 = vadd.f32 %v877_v25, %v812_v17  ;;  %v1073_v57 = vmul.f32 %v3445_v41, %v3821_v19  ;;  %v1169_v63 = vmul.f32 %v3459_v49, %v3823_v40 }
  0x72   : > { %v400_v1 = vld [vmem:[%s3390_s29 + $0xb0] sm:$0xff]  ;;  %v1014_v3 = vadd.f32 %v982_v53, %v917_v43  ;;  %v910_v14 = vadd.f32 %v878_v50, %v813_v9  ;;  %v1170_v33 = vmul.f32 %v3459_v49, %v3831_v18  ;;  %v1266_v62 = vmul.f32 %v3475_v56, %v3833_v6 }
  0x73   : > { %v1015_v48 = vadd.f32 %v983_v30, %v918_v7  ;;  %v5337_v59 = vpack.c.bf16 %v3688_v37, %v3686_v23  ;;  %v1006_v17 = vadd.f32 %v974_v45, %v909_v0  ;;  %v1267_v43 = vmul.f32 %v3475_v56, %v3839_v26 }
  0x74   : > { %v1112_v53 = vadd.f32 %v1080_v42, %v1014_v3  ;;  %v432_v25 = vmax.f32 %v400_v1, 0.0  ;;  %v1007_v30 = vadd.f32 %v975_v58, %v910_v14  ;;  %v433_v50 = vmax.f32 %v401_v2, 0.0 }
  0x75   : > { %3108 = vmatmul.msk.bf16.gmra.mxu0 %vm443_vm4, %v5337_v59  ;;  %v1113_v40 = vadd.f32 %v1081_v54, %v1015_v48  ;;  %v531_v7 = vmul.f32 %v3763_v11, %v3395_v4  ;;  %v1104_v18 = vadd.f32 %v1072_v27, %v1006_v17  ;;  %v532_v23 = vmul.f32 %v3773_v20, %v3395_v4 }
  0x76   : > { %v1209_v9 = vadd.f32 %v1177_v60, %v1112_v53  ;;  %466 = vst.msk [vmem:[#allocation2 + $0x121] sm:$0xff] %vm443_vm4, %v432_v25  ;;  %v596_v37 = vmul.f32 %v3765_v12, %v3403_v8  ;;  %v1105_v3 = vadd.f32 %v1073_v57, %v1007_v30  ;;  %v597_v2 = vmul.f32 %v3775_v21, %v3403_v8 }
  0x77   : > { %v1210_v0 = vadd.f32 %v1178_v61, %v1113_v40  ;;  %467 = vst.msk [vmem:[#allocation2 + $0x129] sm:$0xff] %vm443_vm4, %v433_v50  ;;  %v693_v42 = vmul.f32 %v3777_v22, %v3411_v13  ;;  %v1201_v60 = vadd.f32 %v1169_v63, %v1104_v18  ;;  %v694_v45 = vmul.f32 %v3785_v47, %v3411_v13  ;;  %v392_v61 = vld [vmem:[%s3390_s29 + $0x70] sm:$0xff] }
  0x78   : > { %v1306_v54 = vadd.f32 %v1274_v15, %v1209_v9  ;;  %v628_v59 = vadd.f32 %v596_v37, %v531_v7  ;;  %v1202_v27 = vadd.f32 %v1170_v33, %v1105_v3  ;;  %v629_v1 = vadd.f32 %v597_v2, %v532_v23  ;;  %v393_v15 = vld [vmem:[%s3390_s29 + $0x78] sm:$0xff] }
  0x79   : > { %v1307_v58 = vadd.f32 %v1275_v5, %v1210_v0  ;;  %v790_v57 = vmul.f32 %v3787_v51, %v3425_v28  ;;  %v3874_v40 = vadd.f32 %v1266_v62, %v1201_v60  ;;  %v791_v14 = vmul.f32 %v3797_v34, %v3425_v28 }
  0x7a   : > { %v725_v48 = vadd.f32 %v693_v42, %v628_v59  ;;  %v887_v63 = vmul.f32 %v3789_v52, %v3428_v29  ;;  %v3881_v53 = vadd.f32 %v1267_v43, %v1202_v27  ;;  %v726_v5 = vadd.f32 %v694_v45, %v629_v1 }
  0x7b   : > { %v1329_v18 = vpack.c.bf16 %v1307_v58, %v1306_v54  ;;  %v888_v33 = vmul.f32 %v3799_v36, %v3428_v29  ;;  %v1324_v17 = vpack.c.bf16 %v3779_v39, %v3769_v16  ;;  %v984_v25 = vmul.f32 %v3801_v10, %v3436_v32 }
  0x7c   : > { %v822_v62 = vadd.f32 %v790_v57, %v725_v48  ;;  %v424_v30 = vmax.f32 %v392_v61, 0.0  ;;  %v823_v7 = vadd.f32 %v791_v14, %v726_v5  ;;  %v985_v43 = vmul.f32 %v3809_v55, %v3436_v32 }
  0x7d   : > { %3114 = vmatmul.msk.bf16.vlgmr.msra.gmra.mxu3 %vm443_vm4, %v1329_v18  ;;  %v3894_v9 = vld [vmem:[#allocation2 + $0x120] sm:$0xff]  ;;  %v425_v37 = vmax.f32 %v393_v15, 0.0  ;;  %v523_v42 = vmul.f32 %v3690_v38, %v3395_v4  ;;  %v524_v54 = vmul.f32 %v3695_v44, %v3395_v4  ;;  %v588_v44 = vmul.f32 %v3692_v24, %v3403_v8 }
  0x7e   : > { %v3896_v23 = vld [vmem:[#allocation2 + $0x121] sm:$0xff]  ;;  %v919_v16 = vadd.f32 %v887_v63, %v822_v62  ;;  %v1082_v0 = vmul.f32 %v3445_v41, %v3894_v9  ;;  %v3902_v3 = vld [vmem:[#allocation2 + $0x129] sm:$0xff]  ;;  %458 = vst.msk [vmem:[#allocation2 + $0xc1] sm:$0xff] %vm443_vm4, %v424_v30  ;;  %v920_v60 = vadd.f32 %v888_v33, %v823_v7  ;;  %v589_v57 = vmul.f32 %v3699_v46, %v3403_v8 }
  0x7f   : > { %v3898_v39 = vld [vmem:[#allocation2 + $0x128] sm:$0xff]  ;;  %v1179_v45 = vmul.f32 %v3459_v49, %v3896_v23  ;;  %v1180_v58 = vmul.f32 %v3459_v49, %v3902_v3  ;;  %459 = vst.msk [vmem:[#allocation2 + $0xc9] sm:$0xff] %vm443_vm4, %v425_v37  ;;  %v685_v48 = vmul.f32 %v3701_v35, %v3411_v13  ;;  %v686_v14 = vmul.f32 %v3712_v31, %v3411_v13  ;;  %v402_v24 = vld [vmem:[%s3390_s29 + $0xc0] sm:$0xff]  ;;  %v5339_v35 = vld [vmem:[#allocation16_spill] sm:$0xff] }
  0x80   : > { %v3904_v2 = vld [vmem:[#allocation2 + $0x122] sm:$0xff]  ;;  %v1083_v59 = vmul.f32 %v3445_v41, %v3898_v39  ;;  %v1016_v27 = vadd.f32 %v984_v25, %v919_v16  ;;  %v3918_v1 = vld [vmem:[#allocation2 + $0x12a] sm:$0xff]  ;;  %v1017_v61 = vadd.f32 %v985_v43, %v920_v60  ;;  %v620_v5 = vadd.f32 %v588_v44, %v523_v42  ;;  %v5340_v31 = vld [vmem:[#allocation17_spill] sm:$0xff] }
  0x81   : > { %v1276_v38 = vmul.f32 %v3475_v56, %v3904_v2  ;;  %v5338_v63 = vld [vmem:[#allocation15_spill] sm:$0xff]  ;;  %v621_v33 = vadd.f32 %v589_v57, %v524_v54  ;;  %v783_v62 = vmul.f32 %v3821_v19, %v3425_v28  ;;  %v1277_v46 = vmul.f32 %v3475_v56, %v3918_v1 }
  0x82   : > { %v782_v15 = vmul.f32 %v5338_v63, %v3425_v28  ;;  %v1114_v18 = vadd.f32 %v1082_v0, %v1016_v27  ;;  %v403_v25 = vld [vmem:[%s3390_s29 + $0xc8] sm:$0xff]  ;;  %v1115_v30 = vadd.f32 %v1083_v59, %v1017_v61  ;;  %v879_v7 = vmul.f32 %v5339_v35, %v3428_v29 }
  0x83   : > { %v880_v43 = vmul.f32 %v5340_v31, %v3428_v29  ;;  %v717_v16 = vadd.f32 %v685_v48, %v620_v5  ;;  %v718_v0 = vadd.f32 %v686_v14, %v621_v33  ;;  %v976_v42 = vmul.f32 %v3833_v6, %v3436_v32 }
  0x84   : > { %v1211_v37 = vadd.f32 %v1179_v45, %v1114_v18  ;;  %v1212_v54 = vadd.f32 %v1180_v58, %v1115_v30  ;;  %v977_v60 = vmul.f32 %v3839_v26, %v3436_v32  ;;  %v434_v44 = vmax.f32 %v402_v24, 0.0 }
  0x85   : > { %3109 = vmatmul.msk.bf16.gmra.mxu0 %vm443_vm4, %v1324_v17  ;;  %v3947_v59 = vld [vmem:[#allocation2 + $0xc0] sm:$0xff]  ;;  %v435_v57 = vmax.f32 %v403_v25, 0.0  ;;  %v814_v50 = vadd.f32 %v782_v15, %v717_v16  ;;  %v815_v47 = vadd.f32 %v783_v62, %v718_v0  ;;  %v533_v58 = vmul.f32 %v3787_v51, %v3395_v4 }
  0x86   : > { %v3949_v27 = vld [vmem:[#allocation2 + $0xc1] sm:$0xff]  ;;  %v1308_v61 = vadd.f32 %v1276_v38, %v1211_v37  ;;  %v3953_v45 = vld [vmem:[#allocation2 + $0xc9] sm:$0xff]  ;;  %v1309_v14 = vadd.f32 %v1277_v46, %v1212_v54  ;;  %v1074_v18 = vmul.f32 %v3445_v41, %v3947_v59  ;;  %468 = vst.msk [vmem:[#allocation2 + $0x139] sm:$0xff] %vm443_vm4, %v434_v44  ;;  %v534_v30 = vmul.f32 %v3797_v34, %v3395_v4 }
  0x87   : > { %v3951_v17 = vld [vmem:[#allocation2 + $0xc8] sm:$0xff]  ;;  %v1171_v38 = vmul.f32 %v3459_v49, %v3949_v27  ;;  %v911_v15 = vadd.f32 %v879_v7, %v814_v50  ;;  %v912_v33 = vadd.f32 %v880_v43, %v815_v47  ;;  %v1172_v62 = vmul.f32 %v3459_v49, %v3953_v45  ;;  %469 = vst.msk [vmem:[#allocation2 + $0x141] sm:$0xff] %vm443_vm4, %v435_v57 }
  0x88   : > { %v3955_v48 = vld [vmem:[#allocation2 + $0xc2] sm:$0xff]  ;;  %v1075_v5 = vmul.f32 %v3445_v41, %v3951_v17  ;;  %v1330_v24 = vpack.c.bf16 %v1309_v14, %v1308_v61  ;;  %v3971_v25 = vld [vmem:[#allocation2 + $0xca] sm:$0xff]  ;;  %v598_v46 = vmul.f32 %v3789_v52, %v3403_v8  ;;  %v599_v47 = vmul.f32 %v3799_v36, %v3403_v8 }
  0x89   : > { %v1268_v51 = vmul.f32 %v3475_v56, %v3955_v48  ;;  %v1008_v50 = vadd.f32 %v976_v42, %v911_v15  ;;  %v1009_v7 = vadd.f32 %v977_v60, %v912_v33  ;;  %v695_v43 = vmul.f32 %v3801_v10, %v3411_v13 }
  0x8a   : > { %v696_v37 = vmul.f32 %v3809_v55, %v3411_v13  ;;  %v630_v16 = vadd.f32 %v598_v46, %v533_v58  ;;  %v631_v0 = vadd.f32 %v599_v47, %v534_v30  ;;  %v792_v54 = vmul.f32 %v3894_v9, %v3425_v28 }
  0x8b   : > { %v793_v34 = vmul.f32 %v3898_v39, %v3425_v28  ;;  %v1106_v52 = vadd.f32 %v1074_v18, %v1008_v50  ;;  %v1107_v44 = vadd.f32 %v1075_v5, %v1009_v7  ;;  %v1269_v36 = vmul.f32 %v3475_v56, %v3971_v25 }
  0x8c   : > { %v889_v42 = vmul.f32 %v3896_v23, %v3428_v29  ;;  %v727_v10 = vadd.f32 %v695_v43, %v630_v16  ;;  %v728_v55 = vadd.f32 %v696_v37, %v631_v0  ;;  %v890_v60 = vmul.f32 %v3902_v3, %v3428_v29 }
  0x8d   : > { %3115 = vmatmul.msk.bf16.gmra.mxu3 %vm443_vm4, %v1330_v24  ;;  %v986_v57 = vmul.f32 %v3904_v2, %v3436_v32  ;;  %v1203_v61 = vadd.f32 %v1171_v38, %v1106_v52  ;;  %v1204_v58 = vadd.f32 %v1172_v62, %v1107_v44  ;;  %v987_v14 = vmul.f32 %v3918_v1, %v3436_v32  ;;  %v3998_v18 = vld [vmem:[#allocation2 + $0x138] sm:$0xff] }
  0x8e   : > { %v4000_v5 = vld [vmem:[#allocation2 + $0x139] sm:$0xff]  ;;  %v525_v15 = vmul.f32 %v5338_v63, %v3395_v4  ;;  %v824_v33 = vadd.f32 %v792_v54, %v727_v10  ;;  %v825_v24 = vadd.f32 %v793_v34, %v728_v55  ;;  %v1084_v46 = vmul.f32 %v3445_v41, %v3998_v18  ;;  %v4008_v47 = vld [vmem:[#allocation2 + $0x141] sm:$0xff] }
  0x8f   : > { %v4004_v30 = vld [vmem:[#allocation2 + $0x140] sm:$0xff]  ;;  %v526_v62 = vmul.f32 %v3821_v19, %v3395_v4  ;;  %v4014_v50 = vadd.f32 %v1268_v51, %v1203_v61  ;;  %v4016_v7 = vadd.f32 %v1269_v36, %v1204_v58  ;;  %v1181_v43 = vmul.f32 %v3459_v49, %v4000_v5 }
  0x90   : > { %v4010_v38 = vld [vmem:[#allocation2 + $0x13a] sm:$0xff]  ;;  %v1085_v63 = vmul.f32 %v3445_v41, %v4004_v30  ;;  %v4022_v37 = vld [vmem:[#allocation2 + $0x142] sm:$0xff]  ;;  %v921_v16 = vadd.f32 %v889_v42, %v824_v33  ;;  %v922_v0 = vadd.f32 %v890_v60, %v825_v24  ;;  %v1182_v54 = vmul.f32 %v3459_v49, %v4008_v47  ;;  %v404_v33 = vld [vmem:[%s3390_s29 + $0xd0] sm:$0xff] }
  0x91   : > { %v1278_v19 = vmul.f32 %v3475_v56, %v4010_v38  ;;  %v1279_v51 = vmul.f32 %v3475_v56, %v4022_v37  ;;  %v590_v34 = vmul.f32 %v5339_v35, %v3403_v8  ;;  %v591_v52 = vmul.f32 %v5340_v31, %v3403_v8 }
  0x92   : > { %v687_v44 = vmul.f32 %v3833_v6, %v3411_v13  ;;  %v1018_v42 = vadd.f32 %v986_v57, %v921_v16  ;;  %v1019_v10 = vadd.f32 %v987_v14, %v922_v0  ;;  %v688_v55 = vmul.f32 %v3839_v26, %v3411_v13  ;;  %v5342_v16 = vld [vmem:[#allocation8_spill] sm:$0xff] }
  0x93   : > { %v5341_v56 = vpack.c.bf16 %v3881_v53, %v3874_v40  ;;  %v622_v35 = vadd.f32 %v590_v34, %v525_v15  ;;  %v623_v60 = vadd.f32 %v591_v52, %v526_v62  ;;  %v784_v6 = vmul.f32 %v3947_v59, %v3425_v28  ;;  %v405_v34 = vld [vmem:[%s3390_s29 + $0xd8] sm:$0xff] }
  0x94   : > { %v785_v31 = vmul.f32 %v3951_v17, %v3425_v28  ;;  %v1116_v57 = vadd.f32 %v1084_v46, %v1018_v42  ;;  %v1117_v61 = vadd.f32 %v1085_v63, %v1019_v10  ;;  %v881_v58 = vmul.f32 %v3949_v27, %v3428_v29  ;;  %v5343_v63 = vld [vmem:[#allocation10_spill] sm:$0xff] }
  0x95   : > { %3110 = vmatmul.msk.bf16.gmra.mxu0 %vm443_vm4, %v5341_v56  ;;  %v882_v26 = vmul.f32 %v3953_v45, %v3428_v29  ;;  %v719_v40 = vadd.f32 %v687_v44, %v622_v35  ;;  %v720_v53 = vadd.f32 %v688_v55, %v623_v60  ;;  %v978_v14 = vmul.f32 %v3955_v48, %v3436_v32  ;;  %v5344_v44 = vld [vmem:[#allocation9_spill] sm:$0xff]  ;;  %v5345_v55 = vld [vmem:[#allocation11_spill] sm:$0xff] }
  0x96   : > { %v979_v15 = vmul.f32 %v3971_v25, %v3436_v32  ;;  %v1213_v24 = vadd.f32 %v1181_v43, %v1116_v57  ;;  %v1214_v62 = vadd.f32 %v1182_v54, %v1117_v61  ;;  %v1076_v46 = vmul.f32 %v3445_v41, %v5342_v16  ;;  %v4069_v43 = vld [vmem:[%s5285_s1 + $0x8] ss:$0 sm:$0xff]  ;;  %v5346_v54 = vld [vmem:[#allocation12_spill] sm:$0xff] }
  0x97   : > { %v1077_v0 = vmul.f32 %v3445_v41, %v5343_v63  ;;  %v816_v52 = vadd.f32 %v784_v6, %v719_v40  ;;  %v817_v42 = vadd.f32 %v785_v31, %v720_v53  ;;  %v1173_v10 = vmul.f32 %v3459_v49, %v5344_v44 }
  0x98   : > { %v1174_v56 = vmul.f32 %v3459_v49, %v5345_v55  ;;  %v1310_v35 = vadd.f32 %v1278_v19, %v1213_v24  ;;  %v1311_v60 = vadd.f32 %v1279_v51, %v1214_v62  ;;  %v1270_v57 = vmul.f32 %v4069_v43, %v5346_v54 }
  0x99   : > { %v436_v61 = vmax.f32 %v404_v33, 0.0  ;;  %v913_v36 = vadd.f32 %v881_v58, %v816_v52  ;;  %v914_v6 = vadd.f32 %v882_v26, %v817_v42  ;;  %v437_v31 = vmax.f32 %v405_v34, 0.0 }
  0x9a   : > { %v535_v40 = vmul.f32 %v3894_v9, %v3395_v4  ;;  %v1331_v53 = vpack.c.bf16 %v1311_v60, %v1310_v35  ;;  %v536_v19 = vmul.f32 %v3898_v39, %v3395_v4  ;;  %v600_v51 = vmul.f32 %v3896_v23, %v3403_v8 }
  0x9b   : > { %470 = vst.msk [vmem:[#allocation2 + $0x151] sm:$0xff] %vm443_vm4, %v436_v61  ;;  %v601_v24 = vmul.f32 %v3902_v3, %v3403_v8  ;;  %v1010_v62 = vadd.f32 %v978_v14, %v913_v36  ;;  %v1011_v33 = vadd.f32 %v979_v15, %v914_v6  ;;  %v697_v58 = vmul.f32 %v3904_v2, %v3411_v13  ;;  %v5347_v15 = vld [vmem:[#allocation13_spill] sm:$0xff] }
  0x9c   : > { %471 = vst.msk [vmem:[#allocation2 + $0x159] sm:$0xff] %vm443_vm4, %v437_v31  ;;  %v698_v9 = vmul.f32 %v3918_v1, %v3411_v13  ;;  %v632_v26 = vadd.f32 %v600_v51, %v535_v40  ;;  %v794_v23 = vmul.f32 %v3998_v18, %v3425_v28  ;;  %v795_v3 = vmul.f32 %v4004_v30, %v3425_v28 }
  0x9d   : > { %3116 = vmatmul.msk.bf16.gmra.mxu3 %vm443_vm4, %v1331_v53  ;;  %v633_v39 = vadd.f32 %v601_v24, %v536_v19  ;;  %v1108_v36 = vadd.f32 %v1076_v46, %v1010_v62  ;;  %v1109_v14 = vadd.f32 %v1077_v0, %v1011_v33  ;;  %v1271_v34 = vmul.f32 %v4069_v43, %v5347_v15 }
  0x9e   : > { %v891_v2 = vmul.f32 %v4000_v5, %v3428_v29  ;;  %v729_v52 = vadd.f32 %v697_v58, %v632_v26  ;;  %v892_v42 = vmul.f32 %v4008_v47, %v3428_v29  ;;  %v988_v35 = vmul.f32 %v4010_v38, %v3436_v32 }
  0x9f   : > { %v730_v1 = vadd.f32 %v698_v9, %v633_v39  ;;  %v1205_v60 = vadd.f32 %v1173_v10, %v1108_v36  ;;  %v1206_v61 = vadd.f32 %v1174_v56, %v1109_v14  ;;  %v989_v46 = vmul.f32 %v4022_v37, %v3436_v32 }
  0xa0   : > { %v527_v0 = vmul.f32 %v3947_v59, %v3395_v4  ;;  %v826_v6 = vadd.f32 %v794_v23, %v729_v52  ;;  %v528_v40 = vmul.f32 %v3951_v17, %v3395_v4  ;;  %v592_v53 = vmul.f32 %v3949_v27, %v3403_v8 }
  0xa1   : > { %v827_v31 = vadd.f32 %v795_v3, %v730_v1  ;;  %v4108_v19 = vadd.f32 %v1270_v57, %v1205_v60  ;;  %v4110_v51 = vadd.f32 %v1271_v34, %v1206_v61  ;;  %v593_v24 = vmul.f32 %v3953_v45, %v3403_v8 }
  0xa2   : > { %v4112_v10 = vld [vmem:[#allocation2 + $0x150] sm:$0xff]  ;;  %v689_v59 = vmul.f32 %v3955_v48, %v3411_v13  ;;  %v923_v62 = vadd.f32 %v891_v2, %v826_v6  ;;  %v690_v9 = vmul.f32 %v3971_v25, %v3411_v13  ;;  %v5348_v45 = vpack.c.bf16 %v4016_v7, %v4014_v50 }
  0xa3   : > { %v4114_v56 = vld [vmem:[#allocation2 + $0x151] sm:$0xff]  ;;  %v924_v33 = vadd.f32 %v892_v42, %v827_v31  ;;  %v1086_v27 = vmul.f32 %v3445_v41, %v4112_v10  ;;  %v4124_v57 = vld [vmem:[#allocation2 + $0x159] sm:$0xff]  ;;  %v1327_v48 = vpack.c.bf16 %v4110_v51, %v4108_v19  ;;  %v624_v7 = vadd.f32 %v592_v53, %v527_v0 }
  0xa4   : > { %v4120_v17 = vld [vmem:[#allocation2 + $0x158] sm:$0xff]  ;;  %v1183_v39 = vmul.f32 %v3459_v49, %v4114_v56  ;;  %v1184_v23 = vmul.f32 %v3459_v49, %v4124_v57  ;;  %v1020_v25 = vadd.f32 %v988_v35, %v923_v62  ;;  %v625_v34 = vadd.f32 %v593_v24, %v528_v40  ;;  %v406_v53 = vld [vmem:[%s3390_s29 + $0xe0] sm:$0xff]  ;;  %v407_v24 = vld [vmem:[%s3390_s29 + $0xe8] sm:$0xff] }
  0xa5   : > { %v4126_v58 = vld [vmem:[#allocation2 + $0x152] sm:$0xff]  ;;  %3111 = vmatmul.msk.bf16.gmra.mxu0 %vm443_vm4, %v5348_v45  ;;  %v1087_v26 = vmul.f32 %v3445_v41, %v4120_v17  ;;  %v4142_v3 = vld [vmem:[#allocation2 + $0x15a] sm:$0xff]  ;;  %v1021_v36 = vadd.f32 %v989_v46, %v924_v33  ;;  %v786_v2 = vmul.f32 %v3425_v28, %v5342_v16  ;;  %v787_v52 = vmul.f32 %v3425_v28, %v5343_v63 }
  0xa6   : > { %v1280_v50 = vmul.f32 %v4069_v43, %v4126_v58  ;;  %v1281_v14 = vmul.f32 %v4069_v43, %v4142_v3  ;;  %v1118_v1 = vadd.f32 %v1086_v27, %v1020_v25  ;;  %v721_v35 = vadd.f32 %v689_v59, %v624_v7  ;;  %v409_v7 = vld [vmem:[%s3390_s29 + $0xf8] sm:$0xff] }
  0xa7   : > { %v1119_v42 = vadd.f32 %v1087_v26, %v1021_v36  ;;  %v883_v60 = vmul.f32 %v3428_v29, %v5344_v44  ;;  %v722_v61 = vadd.f32 %v690_v9, %v625_v34  ;;  %v884_v46 = vmul.f32 %v3428_v29, %v5345_v55 }
  0xa8   : > { %v980_v0 = vmul.f32 %v3436_v32, %v5346_v54  ;;  %v981_v6 = vmul.f32 %v3436_v32, %v5347_v15  ;;  %v1215_v16 = vadd.f32 %v1183_v39, %v1118_v1  ;;  %v818_v40 = vadd.f32 %v786_v2, %v721_v35  ;;  %v5349_v2 = vld [vmem:[#allocation14_spill] sm:$0xff] }
  0xa9   : > { %v1216_v31 = vadd.f32 %v1184_v23, %v1119_v42  ;;  %v1078_v63 = vmul.f32 %v3445_v41, %v3763_v11  ;;  %v819_v44 = vadd.f32 %v787_v52, %v722_v61  ;;  %v1079_v59 = vmul.f32 %v3445_v41, %v3773_v20  ;;  %v408_v20 = vld [vmem:[%s3390_s29 + $0xf0] sm:$0xff] }
  0xaa   : > { %v1175_v55 = vmul.f32 %v3459_v49, %v3765_v12  ;;  %v1176_v54 = vmul.f32 %v3459_v49, %v3775_v21  ;;  %v1312_v15 = vadd.f32 %v1280_v50, %v1215_v16  ;;  %v915_v33 = vadd.f32 %v883_v60, %v818_v40 }
  0xab   : > { %v1313_v62 = vadd.f32 %v1281_v14, %v1216_v31  ;;  %v1272_v27 = vmul.f32 %v4069_v43, %v3777_v22  ;;  %v916_v9 = vadd.f32 %v884_v46, %v819_v44  ;;  %v438_v11 = vmax.f32 %v406_v53, 0.0 }
  0xac   : > { %v439_v45 = vmax.f32 %v407_v24, 0.0  ;;  %v537_v26 = vmul.f32 %v3998_v18, %v3395_v4  ;;  %v1012_v23 = vadd.f32 %v980_v0, %v915_v33  ;;  %v538_v12 = vmul.f32 %v4004_v30, %v3395_v4 }
  0xad   : > { %v1332_v39 = vpack.c.bf16 %v1313_v62, %v1312_v15  ;;  %v602_v21 = vmul.f32 %v4000_v5, %v3403_v8  ;;  %v1013_v25 = vadd.f32 %v981_v6, %v916_v9  ;;  %472 = vst.msk [vmem:[#allocation2 + $0x169] sm:$0xff] %vm443_vm4, %v438_v11  ;;  %v603_v22 = vmul.f32 %v4008_v47, %v3403_v8 }
  0xae   : > { %v699_v36 = vmul.f32 %v4010_v38, %v3411_v13  ;;  %v700_v18 = vmul.f32 %v4022_v37, %v3411_v13  ;;  %v1110_v50 = vadd.f32 %v1078_v63, %v1012_v23  ;;  %473 = vst.msk [vmem:[#allocation2 + $0x171] sm:$0xff] %vm443_vm4, %v439_v45  ;;  %v796_v5 = vmul.f32 %v4112_v10, %v3425_v28  ;;  %v4198_v37 = vld [vmem:[%s5287_s3] ss:$0 sm:$0xff] }
  0xaf   : > { %3117 = vmatmul.msk.bf16.gmra.mxu3 %vm443_vm4, %v1332_v39  ;;  %v634_v30 = vadd.f32 %v602_v21, %v537_v26  ;;  %v440_v14 = vmax.f32 %v408_v20, 0.0  ;;  %v1111_v34 = vadd.f32 %v1079_v59, %v1013_v25  ;;  %v1273_v47 = vmul.f32 %v4069_v43, %v5349_v2 }
  0xb0   : > { %v635_v52 = vadd.f32 %v603_v22, %v538_v12  ;;  %v797_v38 = vmul.f32 %v4120_v17, %v3425_v28  ;;  %v1207_v1 = vadd.f32 %v1175_v55, %v1110_v50  ;;  %v893_v35 = vmul.f32 %v4114_v56, %v3428_v29 }
  0xb1   : > { %v731_v42 = vadd.f32 %v699_v36, %v634_v30  ;;  %v894_v60 = vmul.f32 %v4124_v57, %v3428_v29  ;;  %474 = vst.msk [vmem:[#allocation2 + $0x181] sm:$0xff] %vm443_vm4, %v440_v14  ;;  %v1208_v61 = vadd.f32 %v1176_v54, %v1111_v34  ;;  %v990_v0 = vmul.f32 %v4126_v58, %v3436_v32 }
  0xb2   : > { %v732_v46 = vadd.f32 %v700_v18, %v635_v52  ;;  %v441_v6 = vmax.f32 %v409_v7, 0.0  ;;  %v4207_v16 = vadd.f32 %v1272_v27, %v1207_v1  ;;  %v991_v40 = vmul.f32 %v4142_v3, %v3436_v32 }
  0xb3   : > { %v828_v31 = vadd.f32 %v796_v5, %v731_v42  ;;  %v539_v63 = vmul.f32 %v4112_v10, %v3395_v4  ;;  %v540_v44 = vmul.f32 %v4120_v17, %v3395_v4  ;;  %v604_v59 = vmul.f32 %v4114_v56, %v3403_v8 }
  0xb4   : > { %v1398_v53 = vpop.f32.mrf.mxu0  ;;  %v829_v24 = vadd.f32 %v797_v38, %v732_v46  ;;  %475 = vst.msk [vmem:[#allocation2 + $0x189] sm:$0xff] %vm443_vm4, %v441_v6  ;;  %v4223_v54 = vadd.f32 %v1273_v47, %v1208_v61  ;;  %v1055_v15 = vld [vmem:[#allocation2 + $0x168] sm:$0xff]  ;;  %v605_v19 = vmul.f32 %v4124_v57, %v3403_v8  ;;  %v701_v56 = vmul.f32 %v4126_v58, %v3411_v13 }
  0xb5   : > { %3112 = vmatmul.msk.bf16.gmra.mxu0 %vm443_vm4, %v1327_v48  ;;  %v1482_v55 = vadd.f32 %v4198_v37, %v1398_v53  ;;  %v925_v10 = vadd.f32 %v893_v35, %v828_v31  ;;  %v1152_v62 = vld [vmem:[#allocation2 + $0x169] sm:$0xff]  ;;  %v1088_v33 = vmul.f32 %v3445_v41, %v1055_v15  ;;  %v1153_v27 = vld [vmem:[#allocation2 + $0x171] sm:$0xff]  ;;  %v636_v21 = vadd.f32 %v604_v59, %v539_v63 }
  0xb6   : > { %v926_v51 = vadd.f32 %v894_v60, %v829_v24  ;;  %v1056_v48 = vld [vmem:[#allocation2 + $0x170] sm:$0xff]  ;;  %v1185_v17 = vmul.f32 %v3459_v49, %v1152_v62  ;;  %v1186_v20 = vmul.f32 %v3459_v49, %v1153_v27  ;;  %v637_v22 = vadd.f32 %v605_v19, %v540_v44 }
  0xb7   : > { %v1249_v9 = vld [vmem:[#allocation2 + $0x16a] sm:$0xff]  ;;  %v1514_v11 = vmax.f32 %v1482_v55, 0.0  ;;  %v1022_v45 = vadd.f32 %v990_v0, %v925_v10  ;;  %v1089_v26 = vmul.f32 %v3445_v41, %v1056_v48  ;;  %v1250_v39 = vld [vmem:[#allocation2 + $0x172] sm:$0xff]  ;;  %v702_v58 = vmul.f32 %v4142_v3, %v3411_v13 }
  0xb8   : > { %v1023_v23 = vadd.f32 %v991_v40, %v926_v51  ;;  %v1282_v57 = vmul.f32 %v4069_v43, %v1249_v9  ;;  %v1283_v12 = vmul.f32 %v4069_v43, %v1250_v39  ;;  %v798_v36 = vmul.f32 %v1055_v15, %v3425_v28  ;;  %v1057_v2 = vld [vmem:[#allocation2 + $0x180] sm:$0xff] }
  0xb9   : > { %1546 = vst.msk [vmem:[#allocation2 + $0x19] sm:$0xff] %vm332_vm1, %v1514_v11  ;;  %v1120_v25 = vadd.f32 %v1088_v33, %v1022_v45  ;;  %v733_v50 = vadd.f32 %v701_v56, %v636_v21  ;;  %v799_v30 = vmul.f32 %v1056_v48, %v3425_v28  ;;  %v895_v5 = vmul.f32 %v1152_v62, %v3428_v29  ;;  %v1154_v3 = vld [vmem:[#allocation2 + $0x181] sm:$0xff] }
  0xba   : > { %v1121_v18 = vadd.f32 %v1089_v26, %v1023_v23  ;;  %v734_v14 = vadd.f32 %v702_v58, %v637_v22  ;;  %v896_v34 = vmul.f32 %v1153_v27, %v3428_v29  ;;  %v992_v1 = vmul.f32 %v1249_v9, %v3436_v32 }
  0xbb   : > { %v1217_v7 = vadd.f32 %v1185_v17, %v1120_v25  ;;  %v830_v38 = vadd.f32 %v798_v36, %v733_v50  ;;  %v1058_v42 = vld [vmem:[#allocation2 + $0x188] sm:$0xff]  ;;  %v993_v46 = vmul.f32 %v1250_v39, %v3436_v32  ;;  %v1328_v0 = vpack.c.bf16 %v4223_v54, %v4207_v16  ;;  %v4271_v36 = vld [vmem:[%s5288_s4] sm:$0xff] }
  0xbc   : > { %v1400_v47 = vpop.f32.mrf.mxu0  ;;  %v1218_v52 = vadd.f32 %v1186_v20, %v1121_v18  ;;  %v831_v61 = vadd.f32 %v799_v30, %v734_v14  ;;  %v1090_v40 = vmul.f32 %v3445_v41, %v1057_v2  ;;  %v1091_v24 = vmul.f32 %v3445_v41, %v1058_v42  ;;  %v1155_v44 = vld [vmem:[#allocation2 + $0x189] sm:$0xff]  ;;  %v1060_v14 = vld [vmem:[#allocation2 + $0x1a0] sm:$0xff] }
  0xbd   : > { %v1483_v35 = vadd.f32 %v4198_v37, %v1400_v47  ;;  %v1314_v60 = vadd.f32 %v1282_v57, %v1217_v7  ;;  %v927_v31 = vadd.f32 %v895_v5, %v830_v38  ;;  %v1187_v59 = vmul.f32 %v3459_v49, %v1154_v3  ;;  %v1251_v45 = vld [vmem:[#allocation2 + $0x182] sm:$0xff]  ;;  %v1252_v26 = vld [vmem:[#allocation2 + $0x18a] sm:$0xff]  ;;  %v1059_v7 = vld [vmem:[#allocation2 + $0x198] sm:$0xff] }
  0xbe   : > { %v1315_v6 = vadd.f32 %v1283_v12, %v1218_v52  ;;  %v928_v53 = vadd.f32 %v896_v34, %v831_v61  ;;  %v541_v19 = vmul.f32 %v1055_v15, %v3395_v4  ;;  %v542_v51 = vmul.f32 %v1056_v48, %v3395_v4  ;;  %v1156_v38 = vld [vmem:[#allocation2 + $0x199] sm:$0xff] }
  0xbf   : > { %v1515_v63 = vmax.f32 %v1483_v35, 0.0  ;;  %v1024_v10 = vadd.f32 %v992_v1, %v927_v31  ;;  %v606_v54 = vmul.f32 %v1152_v62, %v3403_v8  ;;  %v607_v33 = vmul.f32 %v1153_v27, %v3403_v8  ;;  %v1157_v1 = vld [vmem:[#allocation2 + $0x1a1] sm:$0xff] }
  0xc0   : > { %v1333_v55 = vpack.c.bf16 %v1315_v6, %v1314_v60  ;;  %v1025_v16 = vadd.f32 %v993_v46, %v928_v53  ;;  %v703_v17 = vmul.f32 %v1249_v9, %v3411_v13  ;;  %v1188_v11 = vmul.f32 %v3459_v49, %v1155_v44  ;;  %v1645_v46 = vld [vmem:[#allocation2 + $0x1] sm:$0xff] }
  0xc1   : > { %1547 = vst.msk [vmem:[#allocation2 + $0x21] sm:$0xff] %vm332_vm1, %v1515_v63  ;;  %v1122_v56 = vadd.f32 %v1090_v40, %v1024_v10  ;;  %v704_v15 = vmul.f32 %v1250_v39, %v3411_v13  ;;  %v800_v4 = vmul.f32 %v1057_v2, %v3425_v28  ;;  %v638_v20 = vadd.f32 %v606_v54, %v541_v19  ;;  %v1580_v2 = vld [vmem:[#allocation2] sm:$0xff] }
  0xc2   : > { %3118 = vmatmul.msk.bf16.gmra.mxu3 %vm443_vm4, %v1333_v55  ;;  %v1123_v48 = vadd.f32 %v1091_v24, %v1025_v16  ;;  %v639_v23 = vadd.f32 %v607_v33, %v542_v51  ;;  %v801_v62 = vmul.f32 %v1058_v42, %v3425_v28  ;;  %v1284_v8 = vmul.f32 %v4069_v43, %v1251_v45  ;;  %v1581_v42 = vld [vmem:[#allocation2 + $0x8] sm:$0xff] }
  0xc3   : > { %v1285_v27 = vmul.f32 %v4069_v43, %v1252_v26  ;;  %v735_v9 = vadd.f32 %v703_v17, %v638_v20  ;;  %v1219_v12 = vadd.f32 %v1187_v59, %v1122_v56  ;;  %v897_v25 = vmul.f32 %v1154_v3, %v3428_v29  ;;  %v1254_v51 = vld [vmem:[#allocation2 + $0x1a2] sm:$0xff]  ;;  %v1743_v16 = vld [vmem:[#allocation2 + $0xa] sm:$0xff] }
  0xc4   : > { %v736_v57 = vadd.f32 %v704_v15, %v639_v23  ;;  %v1220_v21 = vadd.f32 %v1188_v11, %v1123_v48  ;;  %v898_v13 = vmul.f32 %v1155_v44, %v3428_v29  ;;  %v994_v58 = vmul.f32 %v1251_v45, %v3436_v32  ;;  %v2437_v29 = vld [vmem:[%s5289_s5] sm:$0xf]  ;;  %v1839_v23 = vld [vmem:[#allocation2 + $0x18] sm:$0xff] }
  0xc5   : > { %3113 = vmatmul.msk.bf16.gmra.mxu0 %vm443_vm4, %v1328_v0  ;;  %v832_v39 = vadd.f32 %v800_v4, %v735_v9  ;;  %v995_v28 = vmul.f32 %v1252_v26, %v3436_v32  ;;  %v1316_v18 = vadd.f32 %v1284_v8, %v1219_v12  ;;  %v2488_v34 = vsel %vm2486_vm5, %v2437_v29, 0  ;;  %v1646_v0 = vld [vmem:[#allocation2 + $0x9] sm:$0xff] }
  0xc6   : > { %v833_v22 = vadd.f32 %v801_v62, %v736_v57  ;;  %v1317_v50 = vadd.f32 %v1285_v27, %v1220_v21  ;;  %v4277_v32 = vperm.slane %v4271_v36, 0  ;;  %2497 = vmatpush.bf16.msra.mxu1 %v2488_v34  ;;  %v1092_v47 = vmul.f32 %v3445_v41, %v1059_v7  ;;  %3150 = vmatpush.bf16.msrb.mxu3 %v2488_v34  ;;  %v1742_v44 = vld [vmem:[#allocation2 + $0x2] sm:$0xff] }
  0xc7   : > { %v929_v30 = vadd.f32 %v897_v25, %v832_v39  ;;  %v1093_v52 = vmul.f32 %v3445_v41, %v1060_v14  ;;  %v4282_v3 = vperm.slane %v4271_v36, 1  ;;  %3149 = vmatpush.bf16.msra.mxu2 %v2488_v34  ;;  %v1189_v6 = vmul.f32 %v3459_v49, %v1156_v38 }
  0xc8   : > { %v930_v5 = vadd.f32 %v898_v13, %v833_v22  ;;  %v1334_v35 = vpack.c.bf16 %v1317_v50, %v1316_v18  ;;  %v1190_v31 = vmul.f32 %v3459_v49, %v1157_v1  ;;  %v1613_v40 = vmul.f32 %v4277_v32, %v1580_v2  ;;  %v1253_v49 = vld [vmem:[#allocation2 + $0x19a] sm:$0xff]  ;;  %v2034_v8 = vld [vmem:[#allocation2 + $0x22] sm:$0xff] }
  0xc9   : > { %5350 = vst [vmem:[#allocation15_spill] sm:$0xff] %v4282_v3  ;;  %v1026_v60 = vadd.f32 %v994_v58, %v929_v30  ;;  %v1614_v41 = vmul.f32 %v4277_v32, %v1581_v42  ;;  %v1678_v53 = vmul.f32 %v4282_v3, %v1645_v46  ;;  %v1679_v24 = vmul.f32 %v4282_v3, %v1646_v0  ;;  %v1840_v62 = vld [vmem:[#allocation2 + $0x20] sm:$0xff] }
  0xca   : > { %v1027_v61 = vadd.f32 %v995_v28, %v930_v5  ;;  %v4291_v59 = vperm.slane %v4271_v36, 2  ;;  %v5314_v54 = vmov -1e+30   ;;  %v4300_v17 = vperm.slane %v4271_v36, 3  ;;  %v1936_v28 = vld [vmem:[#allocation2 + $0x19] sm:$0xff]  ;;  %v1937_v30 = vld [vmem:[#allocation2 + $0x21] sm:$0xff] }
  0xcb   : > { %v1124_v10 = vadd.f32 %v1092_v47, %v1026_v60  ;;  %2615 = vst.msk [vmem:[#allocation2] sm:$0xff] %vm332_vm1, %v5314_v54  ;;  %v1286_v56 = vmul.f32 %v4069_v43, %v1253_v49  ;;  %v1287_v11 = vmul.f32 %v4069_v43, %v1254_v51  ;;  %v1710_v45 = vadd.f32 %v1678_v53, %v1613_v40  ;;  %v2033_v18 = vld [vmem:[#allocation2 + $0x1a] sm:$0xff] }
  0xcc   : > { %v1125_v19 = vadd.f32 %v1093_v52, %v1027_v61  ;;  %2616 = vst.msk [vmem:[#allocation2 + $0x8] sm:$0xff] %vm332_vm1, %v5314_v54  ;;  %v1775_v26 = vmul.f32 %v4291_v59, %v1742_v44  ;;  %v1711_v48 = vadd.f32 %v1679_v24, %v1614_v41  ;;  %v1776_v20 = vmul.f32 %v4291_v59, %v1743_v16 }
  0xcd   : > { %2617 = vst.msk [vmem:[#allocation2 + $0x10] sm:$0x3] %vm335_vm2, %v5314_v54  ;;  %v1221_v15 = vadd.f32 %v1189_v6, %v1124_v10  ;;  %v1872_v9 = vmul.f32 %v4300_v17, %v1839_v23  ;;  %v1873_v57 = vmul.f32 %v4300_v17, %v1840_v62  ;;  %v4321_v39 = vperm.slane %v4271_v36, 4 }
  0xce   : > { %2621 = vst.msk [vmem:[#allocation2] sm:$0x1] %vm341_vm3, %v5314_v54  ;;  %v1222_v4 = vadd.f32 %v1190_v31, %v1125_v19  ;;  %v1807_v27 = vadd.f32 %v1775_v26, %v1710_v45  ;;  %v1808_v13 = vadd.f32 %v1776_v20, %v1711_v48  ;;  %v4324_v22 = vperm.slane %v4271_v36, 5  ;;  %v4348_v31 = vld [vmem:[%s5288_s4 + $0x8] ss:$0 sm:$0xff] }
  0xcf   : > { %2639 = vst.msk [vmem:[#allocation2 + $0x11] sm:$0x1] %vm341_vm3, %v5314_v54  ;;  %v1318_v21 = vadd.f32 %v1286_v56, %v1221_v15  ;;  %v4327_v5 = vperm.slane %v4271_v36, 6  ;;  %v1969_v34 = vmul.f32 %v4321_v39, %v1936_v28  ;;  %v1970_v47 = vmul.f32 %v4321_v39, %v1937_v30 }
  0xd0   : > { %2622 = vst.msk [vmem:[#allocation2 + $0x18] sm:$0x1] %vm341_vm3, %v5314_v54  ;;  %v1319_v25 = vadd.f32 %v1287_v11, %v1222_v4  ;;  %v1904_v50 = vadd.f32 %v1872_v9, %v1807_v27  ;;  %v1905_v14 = vadd.f32 %v1873_v57, %v1808_v13  ;;  %v2066_v2 = vmul.f32 %v4324_v22, %v2033_v18 }
  0xd1   : > { %v1403_v63 = vpop.f32.mrf.mxu0  ;;  %2640 = vst.msk [vmem:[#allocation2 + $0x29] sm:$0x1] %vm341_vm3, %v5314_v54  ;;  %v4342_v61 = vperm.slane %v4271_v36, 7  ;;  %v2067_v0 = vmul.f32 %v4324_v22, %v2034_v8  ;;  %v1616_v40 = vmul.f32 %v1840_v62, %v4277_v32  ;;  %v1681_v41 = vmul.f32 %v1937_v30, %v4282_v3 }
  0xd2   : > { %v1484_v55 = vadd.f32 %v4198_v37, %v1403_v63  ;;  %3119 = vmatmul.msk.bf16.gmra.mxu3 %vm443_vm4, %v1334_v35  ;;  %5351 = vst [vmem:[#allocation16_spill] sm:$0xff] %v4327_v5  ;;  %v1335_v7 = vpack.c.bf16 %v1319_v25, %v1318_v21  ;;  %v2001_v38 = vadd.f32 %v1969_v34, %v1904_v50 }
  0xd3   : > { %v2002_v35 = vadd.f32 %v1970_v47, %v1905_v14  ;;  %v1615_v36 = vmul.f32 %v1839_v23, %v4277_v32  ;;  %v1777_v16 = vmul.f32 %v2033_v18, %v4291_v59  ;;  %v1713_v45 = vadd.f32 %v1681_v41, %v1616_v40 }
  0xd4   : > { %v1516_v33 = vmax.f32 %v1484_v55, 0.0  ;;  %v2098_v60 = vadd.f32 %v2066_v2, %v2001_v38  ;;  %v1680_v55 = vmul.f32 %v1936_v28, %v4282_v3  ;;  %v1778_v48 = vmul.f32 %v2034_v8, %v4291_v59 }
  0xd5   : > { %v2099_v10 = vadd.f32 %v2067_v0, %v2002_v35 }
  0xd6   : > { %1548 = vst.msk [vmem:[#allocation2 + $0x31] sm:$0xff] %vm332_vm1, %v1516_v33  ;;  %v1712_v4 = vadd.f32 %v1680_v55, %v1615_v36  ;;  %v1810_v25 = vadd.f32 %v1778_v48, %v1713_v45 }
  0xd8   : > { %v1809_v9 = vadd.f32 %v1777_v16, %v1712_v4 }
  0xd9   : > { %v1405_v43 = vpop.f32.mrf.mxu0 }
  0xda   : > { %v1485_v12 = vadd.f32 %v4198_v37, %v1405_v43 }
  0xdc   : > { %v1517_v58 = vmax.f32 %v1485_v12, 0.0 }
  0xdd   : > { %v4330_v29 = vld [vmem:[#allocation2 + $0x30] sm:$0xff] }
  0xde   : > { %1549 = vst.msk [vmem:[#allocation2 + $0x39] sm:$0xff] %vm332_vm1, %v1517_v58  ;;  %v2163_v1 = vmul.f32 %v4327_v5, %v4330_v29  ;;  %v2227_v6 = vld [vmem:[#allocation2 + $0x31] sm:$0xff]  ;;  %v1874_v20 = vmul.f32 %v4330_v29, %v4300_v17 }
  0xdf   : > { %2623 = vst.msk [vmem:[#allocation2 + $0x30] sm:$0x1] %vm341_vm3, %v5314_v54  ;;  %v2260_v51 = vmul.f32 %v4342_v61, %v2227_v6  ;;  %v1971_v18 = vmul.f32 %v2227_v6, %v4321_v39  ;;  %v1682_v36 = vmul.f32 %v2227_v6, %v4282_v3 }
  0xe0   : > { %v2195_v53 = vadd.f32 %v2163_v1, %v2098_v60  ;;  %v1906_v13 = vadd.f32 %v1874_v20, %v1809_v9 }
  0xe1   : > { %v1408_v52 = vpop.f32.mrf.mxu0 }
  0xe2   : > { %v1486_v42 = vadd.f32 %v4198_v37, %v1408_v52  ;;  %3120 = vmatmul.msk.bf16.gmra.mxu3 %vm443_vm4, %v1335_v7  ;;  %v2292_v15 = vadd.f32 %v2260_v51, %v2195_v53  ;;  %v2003_v14 = vadd.f32 %v1971_v18, %v1906_v13  ;;  %v1617_v53 = vmul.f32 %v4330_v29, %v4277_v32 }
  0xe4   : > { %v1518_v46 = vmax.f32 %v1486_v42, 0.0 }
  0xe5   : > { %v2131_v63 = vld [vmem:[#allocation2 + $0x38] sm:$0xff] }
  0xe6   : > { %v2228_v24 = vld [vmem:[#allocation2 + $0x39] sm:$0xff]  ;;  %1550 = vst.msk [vmem:[#allocation2 + $0x49] sm:$0xff] %vm332_vm1, %v1518_v46  ;;  %v2164_v19 = vmul.f32 %v4327_v5, %v2131_v63  ;;  %v1875_v27 = vmul.f32 %v2131_v63, %v4300_v17  ;;  %v1618_v35 = vmul.f32 %v2131_v63, %v4277_v32 }
  0xe7   : > { %v2324_v44 = vld [vmem:[#allocation2 + $0x32] sm:$0xff]  ;;  %v4356_v49 = vld [vmem:[#allocation2 + $0x3a] sm:$0xff]  ;;  %v2261_v56 = vmul.f32 %v4342_v61, %v2228_v24  ;;  %v1972_v30 = vmul.f32 %v2228_v24, %v4321_v39  ;;  %v1683_v60 = vmul.f32 %v2228_v24, %v4282_v3 }
  0xe8   : > { %2641 = vst.msk [vmem:[#allocation2 + $0x41] sm:$0x1] %vm341_vm3, %v5314_v54  ;;  %v2196_v33 = vadd.f32 %v2164_v19, %v2099_v10  ;;  %v2357_v11 = vmul.f32 %v4348_v31, %v2324_v44  ;;  %v2358_v43 = vmul.f32 %v4348_v31, %v4356_v49  ;;  %v1907_v58 = vadd.f32 %v1875_v27, %v1810_v25 }
  0xe9   : > { %v1410_v26 = vpop.f32.mrf.mxu0  ;;  %v2068_v50 = vmul.f32 %v2324_v44, %v4324_v22  ;;  %v2069_v1 = vmul.f32 %v4356_v49, %v4324_v22  ;;  %v1779_v24 = vmul.f32 %v2324_v44, %v4291_v59  ;;  %v1715_v6 = vadd.f32 %v1683_v60, %v1618_v35 }
  0xea   : > { %v1487_v23 = vadd.f32 %v4198_v37, %v1410_v26  ;;  %v2293_v62 = vadd.f32 %v2261_v56, %v2196_v33  ;;  %v2389_v12 = vadd.f32 %v2357_v11, %v2292_v15  ;;  %v2004_v47 = vadd.f32 %v1972_v30, %v1907_v58 }
  0xeb   : > { %v2100_v52 = vadd.f32 %v2068_v50, %v2003_v14  ;;  %v1714_v11 = vadd.f32 %v1682_v36, %v1617_v53  ;;  %v1780_v45 = vmul.f32 %v4356_v49, %v4291_v59 }
  0xec   : > { %v1519_v57 = vmax.f32 %v1487_v23, 0.0  ;;  %v2390_v21 = vadd.f32 %v2358_v43, %v2293_v62  ;;  %v2101_v55 = vadd.f32 %v2069_v1, %v2004_v47 }
  0xed   : > { %v4372_v28 = vld [vmem:[#allocation2 + $0x48] sm:$0xff]  ;;  %v1811_v20 = vadd.f32 %v1779_v24, %v1714_v11  ;;  %v1812_v27 = vadd.f32 %v1780_v45, %v1715_v6 }
  0xee   : > { %1551 = vst.msk [vmem:[#allocation2 + $0x51] sm:$0xff] %vm332_vm1, %v1519_v57  ;;  %v2421_v8 = vpack.c.bf16 %v2390_v21, %v2389_v12  ;;  %v2165_v34 = vmul.f32 %v4327_v5, %v4372_v28  ;;  %v2229_v42 = vld [vmem:[#allocation2 + $0x49] sm:$0xff]  ;;  %v1876_v26 = vmul.f32 %v4372_v28, %v4300_v17  ;;  %v1619_v47 = vmul.f32 %v4372_v28, %v4277_v32 }
  0xef   : > { %2624 = vst.msk [vmem:[#allocation2 + $0x48] sm:$0x1] %vm341_vm3, %v5314_v54  ;;  %v2262_v63 = vmul.f32 %v4342_v61, %v2229_v42  ;;  %v1973_v21 = vmul.f32 %v2229_v42, %v4321_v39 }
  0xf0   : > { %3121 = vmatmul.msk.bf16.vlgmr.msra.gmra.mxu1 %vm332_vm1, %v2421_v8  ;;  %v2197_v0 = vadd.f32 %v2165_v34, %v2100_v52  ;;  %v1908_v9 = vadd.f32 %v1876_v26, %v1811_v20  ;;  %v1684_v52 = vmul.f32 %v2229_v42, %v4282_v3 }
  0xf2   : > { %v1413_v7 = vpop.f32.mrf.mxu0  ;;  %v2294_v56 = vadd.f32 %v2262_v63, %v2197_v0  ;;  %v2005_v18 = vadd.f32 %v1973_v21, %v1908_v9 }
  0xf3   : > { %v1488_v2 = vadd.f32 %v4198_v37, %v1413_v7 }
  0xf5   : > { %v1520_v38 = vmax.f32 %v1488_v2, 0.0  ;;  %v2133_v46 = vld [vmem:[#allocation2 + $0x50] sm:$0xff] }
  0xf6   : > { %v2230_v40 = vld [vmem:[#allocation2 + $0x51] sm:$0xff]  ;;  %v2166_v10 = vmul.f32 %v4327_v5, %v2133_v46  ;;  %v1877_v48 = vmul.f32 %v2133_v46, %v4300_v17  ;;  %v1620_v60 = vmul.f32 %v2133_v46, %v4277_v32 }
  0xf7   : > { %v4387_v41 = vld [vmem:[#allocation2 + $0x4a] sm:$0xff]  ;;  %1552 = vst.msk [vmem:[#allocation2 + $0x61] sm:$0xff] %vm332_vm1, %v1520_v38  ;;  %v4394_v19 = vld [vmem:[#allocation2 + $0x52] sm:$0xff]  ;;  %v2263_v16 = vmul.f32 %v4342_v61, %v2230_v40  ;;  %v1974_v13 = vmul.f32 %v2230_v40, %v4321_v39  ;;  %v1685_v0 = vmul.f32 %v2230_v40, %v4282_v3 }
  0xf8   : > { %2642 = vst.msk [vmem:[#allocation2 + $0x59] sm:$0x1] %vm341_vm3, %v5314_v54  ;;  %v2198_v51 = vadd.f32 %v2166_v10, %v2101_v55  ;;  %v2359_v29 = vmul.f32 %v4348_v31, %v4387_v41  ;;  %v2360_v4 = vmul.f32 %v4348_v31, %v4394_v19  ;;  %v1909_v57 = vadd.f32 %v1877_v48, %v1812_v27 }
  0xf9   : > { %v2070_v25 = vmul.f32 %v4387_v41, %v4324_v22  ;;  %v2071_v1 = vmul.f32 %v4394_v19, %v4324_v22  ;;  %v1781_v46 = vmul.f32 %v4387_v41, %v4291_v59  ;;  %v1782_v26 = vmul.f32 %v4394_v19, %v4291_v59 }
  0xfa   : > { %v1415_v33 = vpop.f32.mrf.mxu0  ;;  %v2295_v15 = vadd.f32 %v2263_v16, %v2198_v51  ;;  %v2391_v62 = vadd.f32 %v2359_v29, %v2294_v56  ;;  %v2006_v14 = vadd.f32 %v1974_v13, %v1909_v57  ;;  %v1716_v51 = vadd.f32 %v1684_v52, %v1619_v47 }
  0xfb   : > { %v1489_v44 = vadd.f32 %v4198_v37, %v1415_v33  ;;  %v2102_v34 = vadd.f32 %v2070_v25, %v2005_v18  ;;  %v1717_v33 = vadd.f32 %v1685_v0, %v1620_v60 }
  0xfc   : > { %v2392_v43 = vadd.f32 %v2360_v4, %v2295_v15  ;;  %v2103_v28 = vadd.f32 %v2071_v1, %v2006_v14 }
  0xfd   : > { %v1521_v23 = vmax.f32 %v1489_v44, 0.0  ;;  %v1814_v9 = vadd.f32 %v1782_v26, %v1717_v33 }
  0xfe   : > { %v2422_v49 = vpack.c.bf16 %v2392_v43, %v2391_v62  ;;  %v4412_v12 = vld [vmem:[#allocation2 + $0x60] sm:$0xff] }
  0xff   : > { %1553 = vst.msk [vmem:[#allocation2 + $0x69] sm:$0xff] %vm332_vm1, %v1521_v23  ;;  %v2167_v50 = vmul.f32 %v4327_v5, %v4412_v12  ;;  %v2231_v35 = vld [vmem:[#allocation2 + $0x61] sm:$0xff]  ;;  %v1878_v41 = vmul.f32 %v4412_v12, %v4300_v17  ;;  %v1813_v23 = vadd.f32 %v1781_v46, %v1716_v51 }
 0x100   : > { %2625 = vst.msk [vmem:[#allocation2 + $0x60] sm:$0x1] %vm341_vm3, %v5314_v54  ;;  %3122 = vmatmul.msk.bf16.gmra.mxu1 %vm332_vm1, %v2422_v49  ;;  %v1443_v8 = vpop.f32.mrf.mxu3  ;;  %v2264_v24 = vmul.f32 %v4342_v61, %v2231_v35  ;;  %v1975_v25 = vmul.f32 %v2231_v35, %v4321_v39  ;;  %v1686_v47 = vmul.f32 %v2231_v35, %v4282_v3 }
 0x101   : > { %v1500_v30 = vadd.f32 %v4198_v37, %v1443_v8  ;;  %v2199_v36 = vadd.f32 %v2167_v50, %v2102_v34  ;;  %v1910_v19 = vadd.f32 %v1878_v41, %v1813_v23 }
 0x102   : > { %v1418_v58 = vpop.f32.mrf.mxu0 }
 0x103   : > { %v1490_v7 = vadd.f32 %v4198_v37, %v1418_v58  ;;  %v1532_v2 = vmax.f32 %v1500_v30, 0.0  ;;  %v2296_v11 = vadd.f32 %v2264_v24, %v2199_v36  ;;  %v2007_v50 = vadd.f32 %v1975_v25, %v1910_v19 }
 0x105   : > { %v1522_v38 = vmax.f32 %v1490_v7, 0.0  ;;  %1564 = vst.msk [vmem:[#allocation2 + $0xf1] sm:$0xff] %vm332_vm1, %v1532_v2  ;;  %v1621_v2 = vmul.f32 %v4412_v12, %v4277_v32 }
 0x106   : > { %v2135_v53 = vld [vmem:[#allocation2 + $0x68] sm:$0xff] }
 0x107   : > { %v2232_v55 = vld [vmem:[#allocation2 + $0x69] sm:$0xff]  ;;  %1554 = vst.msk [vmem:[#allocation2 + $0x79] sm:$0xff] %vm332_vm1, %v1522_v38  ;;  %v2168_v42 = vmul.f32 %v4327_v5, %v2135_v53  ;;  %v1879_v48 = vmul.f32 %v2135_v53, %v4300_v17  ;;  %v1622_v1 = vmul.f32 %v2135_v53, %v4277_v32 }
 0x108   : > { %v2328_v10 = vld [vmem:[#allocation2 + $0x62] sm:$0xff]  ;;  %v4435_v63 = vld [vmem:[#allocation2 + $0x6a] sm:$0xff]  ;;  %v2265_v16 = vmul.f32 %v4342_v61, %v2232_v55  ;;  %v1445_v6 = vpop.f32.mrf.mxu3  ;;  %v1976_v8 = vmul.f32 %v2232_v55, %v4321_v39  ;;  %v1687_v60 = vmul.f32 %v2232_v55, %v4282_v3 }
 0x109   : > { %2643 = vst.msk [vmem:[#allocation2 + $0x71] sm:$0x1] %vm341_vm3, %v5314_v54  ;;  %v2200_v40 = vadd.f32 %v2168_v42, %v2103_v28  ;;  %v2361_v29 = vmul.f32 %v4348_v31, %v2328_v10  ;;  %v1501_v45 = vadd.f32 %v4198_v37, %v1445_v6  ;;  %v2362_v4 = vmul.f32 %v4348_v31, %v4435_v63 }
 0x10a   : > { %v1420_v56 = vpop.f32.mrf.mxu0  ;;  %v1911_v57 = vadd.f32 %v1879_v48, %v1814_v9  ;;  %v2072_v13 = vmul.f32 %v2328_v10, %v4324_v22  ;;  %v2073_v36 = vmul.f32 %v4435_v63, %v4324_v22  ;;  %v1783_v12 = vmul.f32 %v2328_v10, %v4291_v59 }
 0x10b   : > { %v1491_v44 = vadd.f32 %v4198_v37, %v1420_v56  ;;  %v2297_v15 = vadd.f32 %v2265_v16, %v2200_v40  ;;  %v1533_v20 = vmax.f32 %v1501_v45, 0.0  ;;  %v2393_v43 = vadd.f32 %v2361_v29, %v2296_v11 }
 0x10c   : > { %v2008_v34 = vadd.f32 %v1976_v8, %v1911_v57  ;;  %v2104_v52 = vadd.f32 %v2072_v13, %v2007_v50  ;;  %v1718_v16 = vadd.f32 %v1686_v47, %v1621_v2  ;;  %v1719_v29 = vadd.f32 %v1687_v60, %v1622_v1 }
 0x10d   : > { %v1523_v62 = vmax.f32 %v1491_v44, 0.0  ;;  %v2394_v27 = vadd.f32 %v2362_v4, %v2297_v15  ;;  %1565 = vst.msk [vmem:[#allocation2 + $0xf9] sm:$0xff] %vm332_vm1, %v1533_v20  ;;  %v1784_v44 = vmul.f32 %v4435_v63, %v4291_v59 }
 0x10e   : > { %v4455_v21 = vld [vmem:[#allocation2 + $0x78] sm:$0xff]  ;;  %v2105_v35 = vadd.f32 %v2073_v36, %v2008_v34  ;;  %v1815_v15 = vadd.f32 %v1783_v12, %v1718_v16 }
 0x10f   : > { %1555 = vst.msk [vmem:[#allocation2 + $0x81] sm:$0xff] %vm332_vm1, %v1523_v62  ;;  %v2423_v49 = vpack.c.bf16 %v2394_v27, %v2393_v43  ;;  %v2169_v30 = vmul.f32 %v4327_v5, %v4455_v21  ;;  %v2233_v28 = vld [vmem:[#allocation2 + $0x79] sm:$0xff]  ;;  %v1880_v11 = vmul.f32 %v4455_v21, %v4300_v17  ;;  %v1816_v43 = vadd.f32 %v1784_v44, %v1719_v29 }
 0x110   : > { %2626 = vst.msk [vmem:[#allocation2 + $0x78] sm:$0x1] %vm341_vm3, %v5314_v54  ;;  %v1448_v58 = vpop.f32.mrf.mxu3  ;;  %v2266_v55 = vmul.f32 %v4342_v61, %v2233_v28  ;;  %v1977_v25 = vmul.f32 %v2233_v28, %v4321_v39  ;;  %v1688_v1 = vmul.f32 %v2233_v28, %v4282_v3 }
 0x111   : > { %3123 = vmatmul.msk.bf16.gmra.mxu1 %vm332_vm1, %v2423_v49  ;;  %v1502_v7 = vadd.f32 %v4198_v37, %v1448_v58  ;;  %v2201_v24 = vadd.f32 %v2169_v30, %v2104_v52  ;;  %v1912_v49 = vadd.f32 %v1880_v11, %v1815_v15 }
 0x112   : > { %v1423_v18 = vpop.f32.mrf.mxu0 }
 0x113   : > { %v1492_v14 = vadd.f32 %v4198_v37, %v1423_v18  ;;  %v1534_v38 = vmax.f32 %v1502_v7, 0.0  ;;  %v2298_v26 = vadd.f32 %v2266_v55, %v2201_v24  ;;  %v2009_v18 = vadd.f32 %v1977_v25, %v1912_v49 }
 0x115   : > { %v1524_v0 = vmax.f32 %v1492_v14, 0.0  ;;  %1566 = vst.msk [vmem:[#allocation2 + $0x109] sm:$0xff] %vm332_vm1, %v1534_v38  ;;  %v1623_v38 = vmul.f32 %v4455_v21, %v4277_v32 }
 0x116   : > { %v2137_v42 = vld [vmem:[#allocation2 + $0x80] sm:$0xff] }
 0x117   : > { %v2234_v51 = vld [vmem:[#allocation2 + $0x81] sm:$0xff]  ;;  %1556 = vst.msk [vmem:[#allocation2 + $0x91] sm:$0xff] %vm332_vm1, %v1524_v0  ;;  %v2170_v53 = vmul.f32 %v4327_v5, %v2137_v42  ;;  %v1881_v23 = vmul.f32 %v2137_v42, %v4300_v17  ;;  %v1624_v34 = vmul.f32 %v2137_v42, %v4277_v32 }
 0x118   : > { %v2330_v46 = vld [vmem:[#allocation2 + $0x7a] sm:$0xff]  ;;  %v4478_v40 = vld [vmem:[#allocation2 + $0x82] sm:$0xff]  ;;  %v2267_v33 = vmul.f32 %v4342_v61, %v2234_v51  ;;  %v1450_v10 = vpop.f32.mrf.mxu3  ;;  %v1978_v58 = vmul.f32 %v2234_v51, %v4321_v39  ;;  %v1689_v2 = vmul.f32 %v2234_v51, %v4282_v3 }
 0x119   : > { %2644 = vst.msk [vmem:[#allocation2 + $0x89] sm:$0x1] %vm341_vm3, %v5314_v54  ;;  %v2202_v6 = vadd.f32 %v2170_v53, %v2105_v35  ;;  %v2363_v56 = vmul.f32 %v4348_v31, %v2330_v46  ;;  %v1503_v41 = vadd.f32 %v4198_v37, %v1450_v10  ;;  %v2364_v20 = vmul.f32 %v4348_v31, %v4478_v40 }
 0x11a   : > { %v1425_v45 = vpop.f32.mrf.mxu0  ;;  %v1913_v57 = vadd.f32 %v1881_v23, %v1816_v43  ;;  %v2074_v8 = vmul.f32 %v2330_v46, %v4324_v22  ;;  %v2075_v24 = vmul.f32 %v4478_v40, %v4324_v22  ;;  %v1785_v35 = vmul.f32 %v2330_v46, %v4291_v59 }
 0x11b   : > { %v1493_v4 = vadd.f32 %v4198_v37, %v1425_v45  ;;  %v2299_v48 = vadd.f32 %v2267_v33, %v2202_v6  ;;  %v1535_v62 = vmax.f32 %v1503_v41, 0.0  ;;  %v2395_v9 = vadd.f32 %v2363_v56, %v2298_v26 }
 0x11c   : > { %v2010_v52 = vadd.f32 %v1978_v58, %v1913_v57  ;;  %v2106_v60 = vadd.f32 %v2074_v8, %v2009_v18  ;;  %v1721_v16 = vadd.f32 %v1689_v2, %v1624_v34  ;;  %v1720_v6 = vadd.f32 %v1688_v1, %v1623_v38  ;;  %v4545_v1 = vld [vmem:[#allocation2 + $0xf8] sm:$0xff] }
 0x11d   : > { %v1525_v27 = vmax.f32 %v1493_v4, 0.0  ;;  %v2396_v19 = vadd.f32 %v2364_v20, %v2299_v48  ;;  %1567 = vst.msk [vmem:[#allocation2 + $0x111] sm:$0xff] %vm332_vm1, %v1535_v62  ;;  %v1786_v33 = vmul.f32 %v4478_v40, %v4291_v59 }
 0x11e   : > { %v2138_v13 = vld [vmem:[#allocation2 + $0x90] sm:$0xff]  ;;  %v2107_v21 = vadd.f32 %v2075_v24, %v2010_v52  ;;  %v1817_v44 = vadd.f32 %v1785_v35, %v1720_v6  ;;  %v4551_v35 = vld [vmem:[#allocation2 + $0x108] sm:$0xff] }
 0x11f   : > { %1557 = vst.msk [vmem:[#allocation2 + $0x99] sm:$0xff] %vm332_vm1, %v1525_v27  ;;  %v2424_v63 = vpack.c.bf16 %v2396_v19, %v2395_v9  ;;  %v2171_v7 = vmul.f32 %v4327_v5, %v2138_v13  ;;  %v2235_v12 = vld [vmem:[#allocation2 + $0x91] sm:$0xff]  ;;  %v1882_v10 = vmul.f32 %v2138_v13, %v4300_v17  ;;  %v1818_v48 = vadd.f32 %v1786_v33, %v1721_v16 }
 0x120   : > { %2627 = vst.msk [vmem:[#allocation2 + $0x90] sm:$0x1] %vm341_vm3, %v5314_v54  ;;  %v1453_v50 = vpop.f32.mrf.mxu3  ;;  %v2268_v56 = vmul.f32 %v4342_v61, %v2235_v12  ;;  %v1625_v20 = vmul.f32 %v2138_v13, %v4277_v32  ;;  %v1690_v27 = vmul.f32 %v2235_v12, %v4282_v3  ;;  %v4530_v9 = vld [vmem:[#allocation2 + $0xf0] sm:$0xff]  ;;  %v1979_v18 = vmul.f32 %v2235_v12, %v4321_v39 }
 0x121   : > { %3124 = vmatmul.msk.bf16.gmra.mxu1 %vm332_vm1, %v2424_v63  ;;  %v1504_v14 = vadd.f32 %v4198_v37, %v1453_v50  ;;  %v2203_v53 = vadd.f32 %v2171_v7, %v2106_v60  ;;  %v1914_v63 = vadd.f32 %v1882_v10, %v1817_v44  ;;  %2631 = vst.msk [vmem:[#allocation2 + $0xf0] sm:$0x1] %vm341_vm3, %v5314_v54  ;;  %v4547_v60 = vld [vmem:[#allocation2 + $0xfa] sm:$0xff] }
 0x122   : > { %v1428_v30 = vpop.f32.mrf.mxu0  ;;  %v1722_v52 = vadd.f32 %v1690_v27, %v1625_v20  ;;  %2649 = vst.msk [vmem:[#allocation2 + $0x101] sm:$0x1] %vm341_vm3, %v5314_v54 }
 0x123   : > { %v1494_v47 = vadd.f32 %v4198_v37, %v1428_v30  ;;  %v1536_v0 = vmax.f32 %v1504_v14, 0.0  ;;  %v2300_v4 = vadd.f32 %v2268_v56, %v2203_v53  ;;  %v2011_v2 = vadd.f32 %v1979_v18, %v1914_v63  ;;  %2632 = vst.msk [vmem:[#allocation2 + $0x108] sm:$0x1] %vm341_vm3, %v5314_v54 }
 0x125   : > { %v1526_v36 = vmax.f32 %v1494_v47, 0.0  ;;  %1568 = vst.msk [vmem:[#allocation2 + $0x121] sm:$0xff] %vm332_vm1, %v1536_v0 }
 0x126   : > { %v2139_v42 = vld [vmem:[#allocation2 + $0x98] sm:$0xff] }
 0x127   : > { %v2236_v51 = vld [vmem:[#allocation2 + $0x99] sm:$0xff]  ;;  %1558 = vst.msk [vmem:[#allocation2 + $0xa9] sm:$0xff] %vm332_vm1, %v1526_v36  ;;  %v2172_v28 = vmul.f32 %v4327_v5, %v2139_v42  ;;  %v1883_v11 = vmul.f32 %v2139_v42, %v4300_v17  ;;  %v1626_v13 = vmul.f32 %v2139_v42, %v4277_v32 }
 0x128   : > { %v2332_v55 = vld [vmem:[#allocation2 + $0x92] sm:$0xff]  ;;  %v2333_v29 = vld [vmem:[#allocation2 + $0x9a] sm:$0xff]  ;;  %v2269_v26 = vmul.f32 %v4342_v61, %v2236_v51  ;;  %v1455_v41 = vpop.f32.mrf.mxu3  ;;  %v1691_v58 = vmul.f32 %v2236_v51, %v4282_v3  ;;  %v1980_v50 = vmul.f32 %v2236_v51, %v4321_v39 }
 0x129   : > { %v2365_v46 = vmul.f32 %v4348_v31, %v2332_v55  ;;  %2645 = vst.msk [vmem:[#allocation2 + $0xa1] sm:$0x1] %vm341_vm3, %v5314_v54  ;;  %v2204_v45 = vadd.f32 %v2172_v28, %v2107_v21  ;;  %v1505_v40 = vadd.f32 %v4198_v37, %v1455_v41  ;;  %v2366_v43 = vmul.f32 %v4348_v31, %v2333_v29  ;;  %v4557_v21 = vld [vmem:[#allocation2 + $0x112] sm:$0xff] }
 0x12a   : > { %v1430_v15 = vpop.f32.mrf.mxu0  ;;  %v1915_v57 = vadd.f32 %v1883_v11, %v1818_v48  ;;  %v2076_v30 = vmul.f32 %v2332_v55, %v4324_v22  ;;  %v1787_v34 = vmul.f32 %v2332_v55, %v4291_v59  ;;  %v1723_v38 = vadd.f32 %v1691_v58, %v1626_v13  ;;  %2650 = vst.msk [vmem:[#allocation2 + $0x119] sm:$0x1] %vm341_vm3, %v5314_v54 }
 0x12b   : > { %v1495_v23 = vadd.f32 %v4198_v37, %v1430_v15  ;;  %v2301_v62 = vadd.f32 %v2269_v26, %v2204_v45  ;;  %v2397_v19 = vadd.f32 %v2365_v46, %v2300_v4  ;;  %v1537_v49 = vmax.f32 %v1505_v40, 0.0  ;;  %v4581_v26 = vld [vmem:[#allocation2 + $0xf2] sm:$0xff] }
 0x12c   : > { %v2012_v47 = vadd.f32 %v1980_v50, %v1915_v57  ;;  %v2077_v36 = vmul.f32 %v2333_v29, %v4324_v22  ;;  %v2108_v24 = vadd.f32 %v2076_v30, %v2011_v2  ;;  %v1788_v55 = vmul.f32 %v2333_v29, %v4291_v59  ;;  %5352 = vst [vmem:[#allocation17_spill] sm:$0xff] %v4581_v26  ;;  %v4583_v41 = vld [vmem:[#allocation2 + $0x120] sm:$0xff] }
 0x12d   : > { %v1527_v25 = vmax.f32 %v1495_v23, 0.0  ;;  %v2398_v8 = vadd.f32 %v2366_v43, %v2301_v62  ;;  %1569 = vst.msk [vmem:[#allocation2 + $0x129] sm:$0xff] %vm332_vm1, %v1537_v49  ;;  %v1819_v16 = vadd.f32 %v1787_v34, %v1722_v52  ;;  %v4561_v28 = vmul.f32 %v4530_v9, %v4277_v32 }
 0x12e   : > { %v2140_v14 = vld [vmem:[#allocation2 + $0xa8] sm:$0xff]  ;;  %v2109_v6 = vadd.f32 %v2077_v36, %v2012_v47  ;;  %v4569_v46 = vmul.f32 %v4545_v1, %v4277_v32  ;;  %v1820_v10 = vadd.f32 %v1788_v55, %v1723_v38  ;;  %v4575_v11 = vmul.f32 %v4300_v17, %v4530_v9  ;;  %2633 = vst.msk [vmem:[#allocation2 + $0x120] sm:$0x1] %vm341_vm3, %v5314_v54  ;;  %v4625_v38 = vld [vmem:[%s5287_s3] ss:$0 sm:$0xff] }
 0x12f   : > { %1559 = vst.msk [vmem:[#allocation2 + $0xb1] sm:$0xff] %vm332_vm1, %v1527_v25  ;;  %v2425_v7 = vpack.c.bf16 %v2398_v8, %v2397_v19  ;;  %v2173_v12 = vmul.f32 %v4327_v5, %v2140_v14  ;;  %v2237_v53 = vld [vmem:[#allocation2 + $0xa9] sm:$0xff]  ;;  %v1884_v56 = vmul.f32 %v2140_v14, %v4300_v17  ;;  %v4579_v45 = vmul.f32 %v4300_v17, %v4545_v1  ;;  %v1955_v19 = vld [vmem:[#allocation2 + $0xf9] sm:$0xff] }
 0x130   : > { %2628 = vst.msk [vmem:[#allocation2 + $0xa8] sm:$0x1] %vm341_vm3, %v5314_v54  ;;  %v1627_v20 = vmul.f32 %v2140_v14, %v4277_v32  ;;  %v1692_v23 = vmul.f32 %v2237_v53, %v4282_v3  ;;  %v2270_v43 = vmul.f32 %v4342_v61, %v2237_v53  ;;  %v1981_v27 = vmul.f32 %v2237_v53, %v4321_v39 }
 0x131   : > { %3125 = vmatmul.msk.bf16.gmra.mxu1 %vm332_vm1, %v2425_v7  ;;  %v2205_v15 = vadd.f32 %v2173_v12, %v2108_v24  ;;  %v1916_v25 = vadd.f32 %v1884_v56, %v1819_v16  ;;  %v4599_v8 = vmul.f32 %v4321_v39, %v1955_v19  ;;  %v4603_v13 = vmul.f32 %v4324_v22, %v4581_v26 }
 0x132   : > { %v1433_v0 = vpop.f32.mrf.mxu0  ;;  %v1458_v51 = vpop.f32.mrf.mxu3  ;;  %v4611_v30 = vmul.f32 %v4324_v22, %v4547_v60  ;;  %v1724_v2 = vadd.f32 %v1692_v23, %v1627_v20  ;;  %v4617_v47 = vmul.f32 %v4327_v5, %v4530_v9  ;;  %v4635_v56 = vmul.f32 %v4327_v5, %v4545_v1 }
 0x133   : > { %v1496_v42 = vadd.f32 %v4198_v37, %v1433_v0  ;;  %v1506_v33 = vadd.f32 %v4198_v37, %v1458_v51  ;;  %v1954_v37 = vld [vmem:[#allocation2 + $0xf1] sm:$0xff]  ;;  %v2302_v34 = vadd.f32 %v2270_v43, %v2205_v15  ;;  %v1796_v1 = vmul.f32 %v4547_v60, %v4291_v59 }
 0x134   : > { %v4594_v49 = vmul.f32 %v4321_v39, %v1954_v37  ;;  %v4613_v7 = vld [vmem:[#allocation2 + $0x12a] sm:$0xff]  ;;  %v1698_v52 = vmul.f32 %v1954_v37, %v4282_v3 }
 0x135   : > { %v1528_v29 = vmax.f32 %v1496_v42, 0.0  ;;  %v1538_v48 = vmax.f32 %v1506_v33, 0.0  ;;  %2651 = vst.msk [vmem:[#allocation2 + $0x131] sm:$0x1] %vm341_vm3, %v5314_v54  ;;  %v1699_v42 = vmul.f32 %v1955_v19, %v4282_v3 }
 0x136   : > { %v2141_v44 = vld [vmem:[#allocation2 + $0xb0] sm:$0xff] }
 0x137   : > { %v2238_v4 = vld [vmem:[#allocation2 + $0xb1] sm:$0xff]  ;;  %1560 = vst.msk [vmem:[#allocation2 + $0xc1] sm:$0xff] %vm332_vm1, %v1528_v29  ;;  %v2174_v62 = vmul.f32 %v4327_v5, %v2141_v44  ;;  %v1885_v57 = vmul.f32 %v2141_v44, %v4300_v17  ;;  %v1628_v51 = vmul.f32 %v2141_v44, %v4277_v32 }
 0x138   : > { %v2334_v40 = vld [vmem:[#allocation2 + $0xaa] sm:$0xff]  ;;  %v2335_v63 = vld [vmem:[#allocation2 + $0xb2] sm:$0xff]  ;;  %1570 = vst.msk [vmem:[#allocation2 + $0x139] sm:$0xff] %vm332_vm1, %v1538_v48  ;;  %v2271_v18 = vmul.f32 %v4342_v61, %v2238_v4  ;;  %v1693_v55 = vmul.f32 %v2238_v4, %v4282_v3  ;;  %v1982_v15 = vmul.f32 %v2238_v4, %v4321_v39  ;;  %v4639_v48 = vmul.f32 %v4342_v61, %v1954_v37 }
 0x139   : > { %v2206_v58 = vadd.f32 %v2174_v62, %v2109_v6  ;;  %v2367_v50 = vmul.f32 %v4348_v31, %v2334_v40  ;;  %2646 = vst.msk [vmem:[#allocation2 + $0xb9] sm:$0x1] %vm341_vm3, %v5314_v54  ;;  %v2368_v24 = vmul.f32 %v4348_v31, %v2335_v63  ;;  %v1917_v53 = vadd.f32 %v1885_v57, %v1820_v10  ;;  %v4649_v37 = vld [vmem:[#allocation2 + $0x110] sm:$0xff] }
 0x13a   : > { %v1435_v14 = vpop.f32.mrf.mxu0  ;;  %v1460_v12 = vpop.f32.mrf.mxu3  ;;  %5353 = vst [vmem:[#allocation8_spill] sm:$0xff] %v4639_v48  ;;  %v1795_v10 = vmul.f32 %v4581_v26, %v4291_v59  ;;  %v2078_v20 = vmul.f32 %v2334_v40, %v4324_v22  ;;  %v1789_v62 = vmul.f32 %v2334_v40, %v4291_v59  ;;  %v1725_v43 = vadd.f32 %v1693_v55, %v1628_v51 }
 0x13b   : > { %v1497_v0 = vadd.f32 %v4625_v38, %v1435_v14  ;;  %v2303_v36 = vadd.f32 %v2271_v18, %v2206_v58  ;;  %v1507_v9 = vadd.f32 %v4625_v38, %v1460_v12  ;;  %v2399_v6 = vadd.f32 %v2367_v50, %v2302_v34 }
 0x13c   : > { %v2014_v4 = vadd.f32 %v1982_v15, %v1917_v53  ;;  %v1730_v57 = vadd.f32 %v1698_v52, %v4561_v28  ;;  %v1731_v58 = vadd.f32 %v1699_v42, %v4569_v46  ;;  %v2013_v18 = vadd.f32 %v1981_v27, %v1916_v25 }
 0x13d   : > { %v1529_v16 = vmax.f32 %v1497_v0, 0.0  ;;  %v2400_v33 = vadd.f32 %v2368_v24, %v2303_v36  ;;  %v1539_v29 = vmax.f32 %v1507_v9, 0.0  ;;  %v4655_v50 = vmul.f32 %v4342_v61, %v1955_v19 }
 0x13e   : > { %v2142_v23 = vld [vmem:[#allocation2 + $0xc0] sm:$0xff]  ;;  %v4659_v40 = vmul.f32 %v4348_v31, %v4547_v60  ;;  %v1892_v14 = vmul.f32 %v4551_v35, %v4300_v17  ;;  %v2079_v0 = vmul.f32 %v2335_v63, %v4324_v22  ;;  %v1790_v46 = vmul.f32 %v2335_v63, %v4291_v59 }
 0x13f   : > { %1561 = vst.msk [vmem:[#allocation2 + $0xc9] sm:$0xff] %vm332_vm1, %v1529_v16  ;;  %v2426_v44 = vpack.c.bf16 %v2400_v33, %v2399_v6  ;;  %v2175_v28 = vmul.f32 %v4327_v5, %v2142_v23  ;;  %v2239_v52 = vld [vmem:[#allocation2 + $0xc1] sm:$0xff]  ;;  %v1886_v27 = vmul.f32 %v2142_v23, %v4300_v17  ;;  %v2110_v60 = vadd.f32 %v2078_v20, %v2013_v18  ;;  %v4681_v16 = vld [vmem:[#allocation2 + $0x109] sm:$0xff] }
 0x140   : > { %1571 = vst.msk [vmem:[#allocation2 + $0x141] sm:$0xff] %vm332_vm1, %v1539_v29  ;;  %v1821_v25 = vadd.f32 %v1789_v62, %v1724_v2  ;;  %v1893_v36 = vmul.f32 %v4649_v37, %v4300_v17  ;;  %v2111_v24 = vadd.f32 %v2079_v0, %v2014_v4  ;;  %v1822_v12 = vadd.f32 %v1790_v46, %v1725_v43  ;;  %v4683_v2 = vld [vmem:[#allocation2 + $0x138] sm:$0xff] }
 0x141   : > { %3126 = vmatmul.msk.bf16.gmra.mxu1 %vm332_vm1, %v2426_v44  ;;  %5354 = vst [vmem:[#allocation10_spill] sm:$0xff] %v4659_v40  ;;  %v1827_v42 = vadd.f32 %v1795_v10, %v1730_v57  ;;  %v1828_v9 = vadd.f32 %v1796_v1, %v1731_v58  ;;  %v2272_v51 = vmul.f32 %v4342_v61, %v2239_v52  ;;  %v4695_v58 = vld [vmem:[#allocation2 + $0x111] sm:$0xff] }
 0x142   : > { %v1438_v34 = vpop.f32.mrf.mxu0  ;;  %2629 = vst.msk [vmem:[#allocation2 + $0xc0] sm:$0x1] %vm341_vm3, %v5314_v54  ;;  %v4675_v63 = vmul.f32 %v4327_v5, %v4551_v35  ;;  %v4679_v55 = vmul.f32 %v4327_v5, %v4649_v37  ;;  %v2207_v33 = vadd.f32 %v2175_v28, %v2110_v60  ;;  %v1918_v44 = vadd.f32 %v1886_v27, %v1821_v25 }
 0x143   : > { %v1498_v19 = vadd.f32 %v4625_v38, %v1438_v34  ;;  %5355 = vst [vmem:[#allocation9_spill] sm:$0xff] %v4683_v2  ;;  %v1629_v20 = vmul.f32 %v2142_v23, %v4277_v32  ;;  %v1694_v62 = vmul.f32 %v2239_v52, %v4282_v3  ;;  %v1983_v57 = vmul.f32 %v2239_v52, %v4321_v39 }
 0x144   : > { %2634 = vst.msk [vmem:[#allocation2 + $0x138] sm:$0x1] %vm341_vm3, %v5314_v54  ;;  %v4699_v23 = vmul.f32 %v4342_v61, %v4681_v16  ;;  %v1924_v0 = vadd.f32 %v1892_v14, %v1827_v42  ;;  %v1925_v28 = vadd.f32 %v1893_v36, %v1828_v9  ;;  %v1989_v52 = vmul.f32 %v4681_v16, %v4321_v39  ;;  %v4719_v9 = vld [vmem:[#allocation2 + $0x10a] sm:$0xff] }
 0x145   : > { %v1530_v53 = vmax.f32 %v1498_v19, 0.0  ;;  %v1463_v10 = vpop.f32.mrf.mxu3  ;;  %v1726_v2 = vadd.f32 %v1694_v62, %v1629_v20  ;;  %v1990_v40 = vmul.f32 %v4695_v58, %v4321_v39 }
 0x146   : > { %v2143_v6 = vld [vmem:[#allocation2 + $0xc8] sm:$0xff]  ;;  %v1508_v43 = vadd.f32 %v4625_v38, %v1463_v10  ;;  %v2015_v10 = vadd.f32 %v1983_v57, %v1918_v44  ;;  %v2947_v44 = vld [vmem:[%s5291_s7] sm:$0x3] }
 0x147   : > { %v2240_v29 = vld [vmem:[#allocation2 + $0xc9] sm:$0xff]  ;;  %1562 = vst.msk [vmem:[#allocation2 + $0xd9] sm:$0xff] %vm332_vm1, %v1530_v53  ;;  %v2176_v1 = vmul.f32 %v4327_v5, %v2143_v6  ;;  %v1887_v34 = vmul.f32 %v2143_v6, %v4300_v17  ;;  %v2304_v53 = vadd.f32 %v2272_v51, %v2207_v33  ;;  %v1630_v20 = vmul.f32 %v2143_v6, %v4277_v32 }
 0x148   : > { %v2336_v15 = vld [vmem:[#allocation2 + $0xc2] sm:$0xff]  ;;  %v4691_v4 = vld [vmem:[#allocation2 + $0xca] sm:$0xff]  ;;  %v2273_v27 = vmul.f32 %v4342_v61, %v2240_v29  ;;  %v1540_v19 = vmax.f32 %v1508_v43, 0.0  ;;  %v1695_v62 = vmul.f32 %v2240_v29, %v4282_v3  ;;  %v2961_v57 = vsel %vm1385_vm0, %v2947_v44, 0 }
 0x149   : > { %v2369_v18 = vmul.f32 %v4348_v31, %v2336_v15  ;;  %2647 = vst.msk [vmem:[#allocation2 + $0xd1] sm:$0x1] %vm341_vm3, %v5314_v54  ;;  %v2208_v46 = vadd.f32 %v2176_v1, %v2111_v24  ;;  %v4708_v60 = vld [vmem:[#allocation2 + $0x142] sm:$0xff]  ;;  %v2370_v24 = vmul.f32 %v4348_v31, %v4691_v4  ;;  %v2080_v42 = vmul.f32 %v2336_v15, %v4324_v22 }
 0x14a   : > { %5356 = vst [vmem:[#allocation11_spill] sm:$0xff] %v4708_v60  ;;  %v1440_v25 = vpop.f32.mrf.mxu0  ;;  %v1919_v33 = vadd.f32 %v1887_v34, %v1822_v12  ;;  %2970 = vmatpush.bf16.msrb.mxu2 %v2961_v57  ;;  %v2021_v12 = vadd.f32 %v1989_v52, %v1924_v0  ;;  %v2086_v34 = vmul.f32 %v4719_v9, %v4324_v22  ;;  %v4739_v0 = vld [vmem:[#allocation2 + $0x128] sm:$0xff] }
 0x14b   : > { %2652 = vst.msk [vmem:[#allocation2 + $0x149] sm:$0x1] %vm341_vm3, %v5314_v54  ;;  %v1499_v14 = vadd.f32 %v4625_v38, %v1440_v25  ;;  %v2305_v36 = vadd.f32 %v2273_v27, %v2208_v46  ;;  %v2401_v51 = vadd.f32 %v2369_v18, %v2304_v53  ;;  %v1791_v46 = vmul.f32 %v2336_v15, %v4291_v59 }
 0x14c   : > { %1572 = vst.msk [vmem:[#allocation2 + $0x151] sm:$0xff] %vm332_vm1, %v1540_v19  ;;  %v1984_v19 = vmul.f32 %v2240_v29, %v4321_v39  ;;  %v2087_v6 = vmul.f32 %v4557_v21, %v4324_v22  ;;  %v2112_v29 = vadd.f32 %v2080_v42, %v2015_v10  ;;  %v1727_v44 = vadd.f32 %v1695_v62, %v1630_v20 }
 0x14d   : > { %v1531_v1 = vmax.f32 %v1499_v14, 0.0  ;;  %v2402_v43 = vadd.f32 %v2370_v24, %v2305_v36  ;;  %v1465_v27 = vpop.f32.mrf.mxu3  ;;  %v2022_v36 = vadd.f32 %v1990_v40, %v1925_v28  ;;  %v4748_v28 = vmul.f32 %v4342_v61, %v4695_v58 }
 0x14e   : > { %v2144_v25 = vld [vmem:[#allocation2 + $0xd8] sm:$0xff]  ;;  %v1509_v14 = vadd.f32 %v4625_v38, %v1465_v27  ;;  %v2016_v24 = vadd.f32 %v1984_v19, %v1919_v33  ;;  %v4744_v27 = vld [vmem:[#allocation2 + $0x121] sm:$0xff]  ;;  %v4752_v10 = vmul.f32 %v4348_v31, %v4719_v9  ;;  %v4756_v42 = vmul.f32 %v4327_v5, %v4583_v41 }
 0x14f   : > { %v2241_v18 = vld [vmem:[#allocation2 + $0xd9] sm:$0xff]  ;;  %1563 = vst.msk [vmem:[#allocation2 + $0xe1] sm:$0xff] %vm332_vm1, %v1531_v1  ;;  %v2427_v53 = vpack.c.bf16 %v2402_v43, %v2401_v51  ;;  %v2177_v15 = vmul.f32 %v4327_v5, %v2144_v25  ;;  %v1888_v57 = vmul.f32 %v2144_v25, %v4300_v17  ;;  %v1631_v51 = vmul.f32 %v2144_v25, %v4277_v32 }
 0x150   : > { %2630 = vst.msk [vmem:[#allocation2 + $0xd8] sm:$0x1] %vm341_vm3, %v5314_v54  ;;  %v1541_v52 = vmax.f32 %v1509_v14, 0.0  ;;  %v1696_v1 = vmul.f32 %v2241_v18, %v4282_v3  ;;  %v1823_v43 = vadd.f32 %v1791_v46, %v1726_v2  ;;  %v2081_v2 = vmul.f32 %v4691_v4, %v4324_v22 }
 0x151   : > { %3127 = vmatmul.msk.bf16.gmra.mxu1 %vm332_vm1, %v2427_v53  ;;  %v2209_v40 = vadd.f32 %v2177_v15, %v2112_v29  ;;  %5357 = vst [vmem:[#allocation12_spill] sm:$0xff] %v4752_v10  ;;  %v1792_v33 = vmul.f32 %v4691_v4, %v4291_v59  ;;  %v4765_v62 = vmul.f32 %v4327_v5, %v4739_v0 }
 0x152   : > { %1573 = vst.msk [vmem:[#allocation2 + $0x159] sm:$0xff] %vm332_vm1, %v1541_v52  ;;  %v1920_v20 = vadd.f32 %v1888_v57, %v1823_v43  ;;  %v2274_v31 = vmul.f32 %v4342_v61, %v2241_v18  ;;  %v4768_v46 = vadd.f32 %v2086_v34, %v2021_v12  ;;  %v4770_v19 = vadd.f32 %v2087_v6, %v2022_v36 }
 0x153   : > { %v4774_v25 = vmul.f32 %v4342_v61, %v4744_v27  ;;  %v2113_v53 = vadd.f32 %v2081_v2, %v2016_v24  ;;  %v1728_v14 = vadd.f32 %v1696_v1, %v1631_v51  ;;  %v1824_v15 = vadd.f32 %v1792_v33, %v1727_v44  ;;  %v4777_v29 = vld [vmem:[#allocation2 + $0x150] sm:$0xff] }
 0x154   : > { %v1985_v4 = vmul.f32 %v2241_v18, %v4321_v39  ;;  %v2306_v43 = vadd.f32 %v2274_v31, %v2209_v40  ;;  %v1635_v12 = vmul.f32 %v4551_v35, %v4277_v32  ;;  %v1636_v34 = vmul.f32 %v4649_v37, %v4277_v32 }
 0x155   : > { %v1468_v60 = vpop.f32.mrf.mxu3  ;;  %v1700_v6 = vmul.f32 %v4681_v16, %v4282_v3  ;;  %v5358_v36 = vmov -1e+30   ;;  %v1701_v1 = vmul.f32 %v4695_v58, %v4282_v3  ;;  %v1797_v16 = vmul.f32 %v4719_v9, %v4291_v59 }
 0x156   : > { %v2145_v57 = vld [vmem:[#allocation2 + $0xe0] sm:$0xff]  ;;  %2635 = vst.msk [vmem:[#allocation2 + $0x150] sm:$0x1] %vm341_vm3, %v5358_v36  ;;  %v1510_v44 = vadd.f32 %v4625_v38, %v1468_v60  ;;  %v2017_v51 = vadd.f32 %v1985_v4, %v1920_v20  ;;  %v4802_v60 = vld [vmem:[%s5288_s4 + $0x8] ss:$0 sm:$0xff] }
 0x157   : > { %v2242_v52 = vld [vmem:[#allocation2 + $0xe1] sm:$0xff]  ;;  %v2178_v18 = vmul.f32 %v4327_v5, %v2145_v57  ;;  %v1632_v35 = vmul.f32 %v2145_v57, %v4277_v32  ;;  %v1889_v26 = vmul.f32 %v2145_v57, %v4300_v17 }
 0x158   : > { %v2338_v54 = vld [vmem:[#allocation2 + $0xda] sm:$0xff]  ;;  %v2339_v24 = vld [vmem:[#allocation2 + $0xe2] sm:$0xff]  ;;  %v1697_v40 = vmul.f32 %v2242_v52, %v4282_v3  ;;  %v2275_v33 = vmul.f32 %v4342_v61, %v2242_v52  ;;  %v1542_v20 = vmax.f32 %v1510_v44, 0.0 }
 0x159   : > { %v1793_v37 = vmul.f32 %v2338_v54, %v4291_v59  ;;  %2648 = vst.msk [vmem:[#allocation2 + $0xe9] sm:$0x1] %vm341_vm3, %v5358_v36  ;;  %v2210_v2 = vadd.f32 %v2178_v18, %v2113_v53  ;;  %v2371_v58 = vmul.f32 %v4802_v60, %v2338_v54  ;;  %v1794_v4 = vmul.f32 %v2339_v24, %v4291_v59  ;;  %v4811_v3 = vld [vmem:[#allocation2 + $0x15a] sm:$0xff] }
 0x15a   : > { %v1729_v31 = vadd.f32 %v1697_v40, %v1632_v35  ;;  %v2372_v9 = vmul.f32 %v4802_v60, %v2339_v24  ;;  %1574 = vst.msk [vmem:[#allocation2 + $0x169] sm:$0xff] %vm332_vm1, %v1542_v20  ;;  %v1732_v53 = vadd.f32 %v1700_v6, %v1635_v12  ;;  %v1798_v18 = vmul.f32 %v4557_v21, %v4291_v59 }
 0x15b   : > { %v1825_v5 = vadd.f32 %v1793_v37, %v1728_v14  ;;  %v2307_v48 = vadd.f32 %v2275_v33, %v2210_v2  ;;  %v1921_v35 = vadd.f32 %v1889_v26, %v1824_v15  ;;  %v1986_v40 = vmul.f32 %v2242_v52, %v4321_v39  ;;  %2653 = vst.msk [vmem:[#allocation2 + $0x161] sm:$0x1] %vm341_vm3, %v5358_v36 }
 0x15c   : > { %v1826_v10 = vadd.f32 %v1794_v4, %v1729_v31  ;;  %v2403_v14 = vadd.f32 %v2371_v58, %v2306_v43  ;;  %v2082_v37 = vmul.f32 %v2338_v54, %v4324_v22  ;;  %v1733_v2 = vadd.f32 %v1701_v1, %v1636_v34  ;;  %v4835_v1 = vld [vmem:[#allocation2 + $0x122] sm:$0xff] }
 0x15d   : > { %v1922_v44 = vadd.f32 %v4575_v11, %v1825_v5  ;;  %v2404_v57 = vadd.f32 %v2372_v9, %v2307_v48  ;;  %v1470_v33 = vpop.f32.mrf.mxu3  ;;  %v2018_v20 = vadd.f32 %v1986_v40, %v1921_v35  ;;  %v2083_v31 = vmul.f32 %v2339_v24, %v4324_v22  ;;  %v4821_v5 = vld [vmem:[#allocation2 + $0x129] sm:$0xff]  ;;  %v4862_v35 = vld [vmem:[#allocation2 + $0x158] sm:$0xff] }
 0x15e   : > { %v1923_v12 = vadd.f32 %v4579_v45, %v1826_v10  ;;  %v1511_v26 = vadd.f32 %v4625_v38, %v1470_v33  ;;  %v1829_v15 = vadd.f32 %v1797_v16, %v1732_v53  ;;  %v1894_v48 = vmul.f32 %v4583_v41, %v4300_v17 }
 0x15f   : > { %v2019_v6 = vadd.f32 %v4594_v49, %v1922_v44  ;;  %v2428_v11 = vpack.c.bf16 %v2404_v57, %v2403_v14  ;;  %v2115_v45 = vadd.f32 %v2083_v31, %v2018_v20  ;;  %v2215_v49 = vadd.f32 %v4756_v42, %v4768_v46  ;;  %v5360_v20 = vld [vmem:[#allocation15_spill] sm:$0xff] }
 0x160   : > { %v2020_v54 = vadd.f32 %v4599_v8, %v1923_v12  ;;  %v1543_v10 = vmax.f32 %v1511_v26, 0.0  ;;  %v2114_v43 = vadd.f32 %v2082_v37, %v2017_v51  ;;  %v2216_v34 = vadd.f32 %v4765_v62, %v4770_v19  ;;  %v4872_v37 = vld [vmem:[#allocation2 + $0x151] sm:$0xff] }
 0x161   : > { %v2116_v52 = vadd.f32 %v4603_v13, %v2019_v6  ;;  %3128 = vmatmul.msk.bf16.gmra.mxu1 %vm332_vm1, %v2428_v11  ;;  %v2281_v24 = vmul.f32 %v4342_v61, %v4821_v5  ;;  %v1830_v16 = vadd.f32 %v1798_v18, %v1733_v2  ;;  %v1895_v42 = vmul.f32 %v4739_v0, %v4300_v17  ;;  %v4857_v18 = vld [vmem:[#allocation2 + $0x168] sm:$0xff]  ;;  %v4874_v2 = vld [vmem:[#allocation2 + $0x159] sm:$0xff]  ;;  %v5359_v12 = vld [vmem:[#allocation12_spill] sm:$0xff] }
 0x162   : > { %v2117_v8 = vadd.f32 %v4611_v30, %v2020_v54  ;;  %v2376_v46 = vmul.f32 %v4802_v60, %v4557_v21  ;;  %1575 = vst.msk [vmem:[#allocation2 + $0x171] sm:$0xff] %vm332_vm1, %v1543_v10  ;;  %v2212_v62 = vadd.f32 %v4635_v56, %v2115_v45  ;;  %v1926_v19 = vadd.f32 %v1894_v48, %v1829_v15  ;;  %v5361_v26 = vld [vmem:[#allocation8_spill] sm:$0xff] }
 0x163   : > { %v2213_v13 = vadd.f32 %v4675_v63, %v2116_v52  ;;  %v1991_v51 = vmul.f32 %v4744_v27, %v4321_v39  ;;  %v2312_v63 = vadd.f32 %v4774_v25, %v2215_v49  ;;  %v2377_v4 = vmul.f32 %v4802_v60, %v4835_v1  ;;  %2636 = vst.msk [vmem:[#allocation2 + $0x168] sm:$0x1] %vm341_vm3, %v5358_v36 }
 0x164   : > { %v2214_v58 = vadd.f32 %v4679_v55, %v2117_v8  ;;  %v2211_v9 = vadd.f32 %v4617_v47, %v2114_v43  ;;  %v2313_v21 = vadd.f32 %v2281_v24, %v2216_v34  ;;  %v2378_v53 = vmul.f32 %v4802_v60, %v4613_v7  ;;  %v4893_v34 = vld [vmem:[%s5290_s6] ss:$0 sm:$0xff]  ;;  %v5362_v24 = vld [vmem:[#allocation17_spill] sm:$0xff] }
 0x165   : > { %v2310_v30 = vadd.f32 %v4699_v23, %v2213_v13  ;;  %v1992_v56 = vmul.f32 %v4821_v5, %v4321_v39  ;;  %v1473_v44 = vpop.f32.mrf.mxu3  ;;  %v1927_v23 = vadd.f32 %v1895_v42, %v1830_v16  ;;  %v2088_v25 = vmul.f32 %v4835_v1, %v4324_v22  ;;  %v5363_v13 = vld [vmem:[#allocation10_spill] sm:$0xff] }
 0x166   : > { %v2311_v55 = vadd.f32 %v4748_v28, %v2214_v58  ;;  %v1641_v47 = vmul.f32 %v4277_v32, %v4777_v29  ;;  %v2309_v40 = vadd.f32 %v4655_v50, %v2212_v62  ;;  %v1512_v14 = vadd.f32 %v4625_v38, %v1473_v44  ;;  %v4881_v50 = vld [vmem:[#allocation2 + $0x152] sm:$0xff]  ;;  %v4901_v62 = vld [vmem:[#allocation2 + $0x169] sm:$0xff] }
 0x167   : > { %v2023_v57 = vadd.f32 %v1991_v51, %v1926_v19  ;;  %v1642_v28 = vmul.f32 %v4277_v32, %v4862_v35  ;;  %v2407_v6 = vadd.f32 %v5359_v12, %v2310_v30  ;;  %v1706_v31 = vmul.f32 %v5360_v20, %v4872_v37  ;;  %v5364_v51 = vld [vmem:[#allocation9_spill] sm:$0xff]  ;;  %v5365_v58 = vld [vmem:[#allocation16_spill] sm:$0xff] }
 0x168   : > { %v2408_v33 = vadd.f32 %v2376_v46, %v2311_v55  ;;  %v1707_v11 = vmul.f32 %v5360_v20, %v4874_v2  ;;  %v2308_v15 = vadd.f32 %v5361_v26, %v2211_v9  ;;  %v1544_v48 = vmax.f32 %v1512_v14, 0.0 }
 0x169   : > { %v1803_v54 = vmul.f32 %v4291_v59, %v4881_v50  ;;  %v1804_v52 = vmul.f32 %v4291_v59, %v4811_v3  ;;  %v1738_v49 = vadd.f32 %v1706_v31, %v1641_v47  ;;  %v1900_v43 = vmul.f32 %v4300_v17, %v4857_v18  ;;  %v4906_v55 = vld [vmem:[#allocation2 + $0x170] sm:$0xff] }
 0x16a   : > { %v2430_v45 = vpack.c.bf16 %v2408_v33, %v2407_v6  ;;  %v1739_v10 = vadd.f32 %v1707_v11, %v1642_v28  ;;  %v2373_v8 = vmul.f32 %v4802_v60, %v5362_v24  ;;  %v2406_v16 = vadd.f32 %v5363_v13, %v2309_v40  ;;  %1576 = vst.msk [vmem:[#allocation2 + $0x181] sm:$0xff] %vm332_vm1, %v1544_v48  ;;  %v4910_v47 = vld [vmem:[#allocation2 + $0x172] sm:$0xff] }
 0x16b   : > { %v2024_v42 = vadd.f32 %v1992_v56, %v1927_v23  ;;  %v2089_v46 = vmul.f32 %v4613_v7, %v4324_v22  ;;  %v2120_v19 = vadd.f32 %v2088_v25, %v2023_v57  ;;  %v2185_v30 = vmul.f32 %v5365_v58, %v5364_v51  ;;  %5366 = vst [vmem:[#allocation13_spill] sm:$0xff] %v4910_v47  ;;  %v4912_v23 = vld [vmem:[#allocation2 + $0x140] sm:$0xff]  ;;  %v4918_v57 = vld [vmem:[#allocation2 + $0x16a] sm:$0xff] }
 0x16c   : > { %3130 = vmatmul.msk.bf16.vlgmr.msra.gmra.mxu2 %vm332_vm1, %v2430_v45  ;;  %v1835_v9 = vadd.f32 %v1803_v54, %v1738_v49  ;;  %v1997_v44 = vmul.f32 %v4321_v39, %v4901_v62  ;;  %v2405_v56 = vadd.f32 %v2373_v8, %v2308_v15  ;;  %v4914_v40 = vld [vmem:[#allocation2 + $0x139] sm:$0xff]  ;;  %v1836_v14 = vadd.f32 %v1804_v52, %v1739_v10  ;;  %v4938_v49 = vld [vmem:[#allocation2 + $0x141] sm:$0xff] }
 0x16d   : > { %v1901_v25 = vmul.f32 %v4300_v17, %v4906_v55  ;;  %5367 = vst [vmem:[#allocation14_spill] sm:$0xff] %v4918_v57  ;;  %v2499_v28 = vpop.f32.mrf.mxu1  ;;  %v4922_v12 = vadd.f32 %v2377_v4, %v2312_v63  ;;  %v4924_v6 = vadd.f32 %v2378_v53, %v2313_v21  ;;  %v1475_v33 = vpop.f32.mrf.mxu3  ;;  %v2094_v11 = vmul.f32 %v4324_v22, %v4918_v57  ;;  %v4934_v4 = vld [vmem:[#allocation2 + $0x171] sm:$0xff]  ;;  %v4940_v10 = vld [vmem:[#allocation2 + $0x13a] sm:$0xff] }
 0x16e   : > { %2654 = vst.msk [vmem:[#allocation2 + $0x179] sm:$0x1] %vm341_vm3, %v5358_v36  ;;  %v1932_v31 = vadd.f32 %v1900_v43, %v1835_v9  ;;  %v2583_v26 = vadd.f32 %v4893_v34, %v2499_v28  ;;  %v2429_v15 = vpack.c.bf16 %v2406_v16, %v2405_v56  ;;  %v1513_v48 = vadd.f32 %v4625_v38, %v1475_v33 }
 0x16f   : > { %v2121_v54 = vadd.f32 %v2089_v46, %v2024_v42  ;;  %v2186_v52 = vmul.f32 %v5365_v58, %v4912_v23  ;;  %v2217_v45 = vadd.f32 %v2185_v30, %v2120_v19  ;;  %v2282_v63 = vmul.f32 %v4342_v61, %v4914_v40  ;;  %5368 = vst [vmem:[#allocation12_spill] sm:$0xff] %v4934_v4 }
 0x170   : > { %v2029_v21 = vadd.f32 %v1997_v44, %v1932_v31  ;;  %2657 = vst.msk [vmem:[#allocation2 + $0x19] sm:$0xff] %vm332_vm1, %v2583_v26  ;;  %v1545_v53 = vmax.f32 %v1513_v48, 0.0  ;;  %v1933_v38 = vadd.f32 %v1901_v25, %v1836_v14  ;;  %v1998_v43 = vmul.f32 %v4321_v39, %v4934_v4 }
 0x171   : > { %3129 = vmatmul.msk.bf16.gmra.mxu1 %vm332_vm1, %v2429_v15  ;;  %v2431_v24 = vpack.c.bf16 %v4924_v6, %v4922_v12  ;;  %v2158_v13 = vld [vmem:[#allocation2 + $0x180] sm:$0xff]  ;;  %v1637_v16 = vmul.f32 %v4583_v41, %v4277_v32  ;;  %v1638_v19 = vmul.f32 %v4739_v0, %v4277_v32  ;;  %v1702_v30 = vmul.f32 %v4744_v27, %v5360_v20  ;;  %v5369_v0 = vld [vmem:[#allocation11_spill] sm:$0xff] }
 0x172   : > { %v2126_v8 = vadd.f32 %v2094_v11, %v2029_v21  ;;  %1577 = vst.msk [vmem:[#allocation2 + $0x189] sm:$0xff] %vm332_vm1, %v1545_v53  ;;  %v2191_v42 = vmul.f32 %v5365_v58, %v2158_v13  ;;  %v2255_v46 = vld [vmem:[#allocation2 + $0x181] sm:$0xff]  ;;  %v1703_v9 = vmul.f32 %v4821_v5, %v5360_v20  ;;  %v2218_v44 = vadd.f32 %v2186_v52, %v2121_v54 }
 0x173   : > { %v2283_v56 = vmul.f32 %v4342_v61, %v4938_v49  ;;  %v4958_v14 = vadd.f32 %v2282_v63, %v2217_v45  ;;  %v4962_v41 = vmul.f32 %v4802_v60, %v4940_v10  ;;  %2637 = vst.msk [vmem:[#allocation2 + $0x180] sm:$0x1] %vm341_vm3, %v5358_v36  ;;  %v4968_v25 = vmul.f32 %v4802_v60, %v5369_v0 }
 0x174   : > { %v2030_v27 = vadd.f32 %v1998_v43, %v1933_v38  ;;  %v2095_v5 = vmul.f32 %v4324_v22, %v4910_v47  ;;  %v1799_v28 = vmul.f32 %v4835_v1, %v4291_v59  ;;  %v2223_v6 = vadd.f32 %v2191_v42, %v2126_v8 }
 0x175   : > { %v2501_v12 = vpop.f32.mrf.mxu1  ;;  %v2288_v33 = vmul.f32 %v4342_v61, %v2255_v46  ;;  %v1643_v31 = vmul.f32 %v4857_v18, %v4277_v32  ;;  %v1644_v11 = vmul.f32 %v4906_v55, %v4277_v32  ;;  %v1734_v15 = vadd.f32 %v1702_v30, %v1637_v16 }
 0x176   : > { %v2584_v26 = vadd.f32 %v4893_v34, %v2501_v12  ;;  %v1735_v48 = vadd.f32 %v1703_v9, %v1638_v19  ;;  %v1800_v54 = vmul.f32 %v4613_v7, %v4291_v59  ;;  %v1708_v1 = vmul.f32 %v4901_v62, %v5360_v20 }
 0x177   : > { %v1709_v52 = vmul.f32 %v4934_v4, %v5360_v20  ;;  %v1805_v45 = vmul.f32 %v4918_v57, %v4291_v59  ;;  %v1806_v63 = vmul.f32 %v4910_v47, %v4291_v59  ;;  %v2315_v21 = vadd.f32 %v2283_v56, %v2218_v44 }
 0x178   : > { %2658 = vst.msk [vmem:[#allocation2 + $0x21] sm:$0xff] %vm332_vm1, %v2584_v26  ;;  %v2127_v53 = vadd.f32 %v2095_v5, %v2030_v27  ;;  %v1896_v38 = vmul.f32 %v5364_v51, %v4300_v17  ;;  %v1897_v7 = vmul.f32 %v4912_v23, %v4300_v17  ;;  %v2320_v16 = vadd.f32 %v2288_v33, %v2223_v6 }
 0x179   : > { %v2159_v43 = vld [vmem:[#allocation2 + $0x188] sm:$0xff]  ;;  %v1740_v19 = vadd.f32 %v1708_v1, %v1643_v31  ;;  %v1741_v30 = vadd.f32 %v1709_v52, %v1644_v11  ;;  %v1902_v9 = vmul.f32 %v2158_v13, %v4300_v17  ;;  %v1831_v27 = vadd.f32 %v1799_v28, %v1734_v15 }
 0x17a   : > { %v2256_v8 = vld [vmem:[#allocation2 + $0x189] sm:$0xff]  ;;  %v2192_v12 = vmul.f32 %v5365_v58, %v2159_v43  ;;  %v1832_v5 = vadd.f32 %v1800_v54, %v1735_v48  ;;  %v1993_v47 = vmul.f32 %v4914_v40, %v4321_v39  ;;  %v1994_v13 = vmul.f32 %v4938_v49, %v4321_v39 }
 0x17b   : > { %v2352_v42 = vld [vmem:[#allocation2 + $0x182] sm:$0xff]  ;;  %v2289_v26 = vmul.f32 %v4342_v61, %v2256_v8  ;;  %v2353_v44 = vld [vmem:[#allocation2 + $0x18a] sm:$0xff]  ;;  %v1837_v6 = vadd.f32 %v1805_v45, %v1740_v19  ;;  %v1838_v33 = vadd.f32 %v1806_v63, %v1741_v30  ;;  %v1903_v1 = vmul.f32 %v2159_v43, %v4300_v17  ;;  %v2160_v19 = vld [vmem:[#allocation2 + $0x198] sm:$0xff] }
 0x17c   : > { %v2385_v56 = vmul.f32 %v4802_v60, %v2352_v42  ;;  %3131 = vmatmul.msk.bf16.gmra.mxu2 %vm332_vm1, %v2431_v24  ;;  %v2224_v31 = vadd.f32 %v2192_v12, %v2127_v53  ;;  %v2386_v11 = vmul.f32 %v4802_v60, %v2353_v44  ;;  %2655 = vst.msk [vmem:[#allocation2 + $0x191] sm:$0x1] %vm341_vm3, %v5358_v36  ;;  %v2161_v30 = vld [vmem:[#allocation2 + $0x1a0] sm:$0xff] }
 0x17d   : > { %v2504_v28 = vpop.f32.mrf.mxu1  ;;  %v1934_v24 = vadd.f32 %v1902_v9, %v1837_v6  ;;  %v1999_v48 = vmul.f32 %v2255_v46, %v4321_v39  ;;  %v2000_v54 = vmul.f32 %v2256_v8, %v4321_v39  ;;  %v1935_v63 = vadd.f32 %v1903_v1, %v1838_v33  ;;  %v2258_v33 = vld [vmem:[#allocation2 + $0x1a1] sm:$0xff] }
 0x17e   : > { %v2417_v15 = vadd.f32 %v2385_v56, %v2320_v16  ;;  %v2585_v52 = vadd.f32 %v4893_v34, %v2504_v28  ;;  %v2321_v45 = vadd.f32 %v2289_v26, %v2224_v31  ;;  %v2096_v53 = vmul.f32 %v2352_v42, %v4324_v22  ;;  %v2257_v56 = vld [vmem:[#allocation2 + $0x199] sm:$0xff] }
 0x17f   : > { %v1928_v12 = vadd.f32 %v1896_v38, %v1831_v27  ;;  %v1929_v43 = vadd.f32 %v1897_v7, %v1832_v5  ;;  %v2031_v57 = vadd.f32 %v1999_v48, %v1934_v24  ;;  %v2097_v4 = vmul.f32 %v2353_v44, %v4324_v22  ;;  %v2354_v26 = vld [vmem:[#allocation2 + $0x19a] sm:$0xff]  ;;  %v2355_v38 = vld [vmem:[#allocation2 + $0x1a2] sm:$0xff] }
 0x180   : > { %2659 = vst.msk [vmem:[#allocation2 + $0x31] sm:$0xff] %vm332_vm1, %v2585_v52  ;;  %v2418_v16 = vadd.f32 %v2386_v11, %v2321_v45  ;;  %v2032_v9 = vadd.f32 %v2000_v54, %v1935_v63  ;;  %v2193_v46 = vmul.f32 %v5365_v58, %v2160_v19  ;;  %v2194_v8 = vmul.f32 %v5365_v58, %v2161_v30  ;;  %v2689_v52 = vld [vmem:[#allocation2] sm:$0xff]  ;;  %v2713_v45 = vld [vmem:[#allocation2 + $0x18] sm:$0xff] }
 0x181   : > { %v2411_v42 = vadd.f32 %v4962_v41, %v4958_v14  ;;  %v2128_v6 = vadd.f32 %v2096_v53, %v2031_v57  ;;  %2618 = vst.msk [vmem:[#allocation2 + $0x198] sm:$0xff] %vm332_vm1, %v5358_v36  ;;  %v2412_v7 = vadd.f32 %v4968_v25, %v2315_v21  ;;  %v2090_v27 = vmul.f32 %v4940_v10, %v4324_v22 }
 0x182   : > { %v2435_v44 = vpack.c.bf16 %v2418_v16, %v2417_v15  ;;  %v2129_v5 = vadd.f32 %v2097_v4, %v2032_v9  ;;  %2619 = vst.msk [vmem:[#allocation2 + $0x1a0] sm:$0xff] %vm332_vm1, %v5358_v36  ;;  %v2025_v31 = vadd.f32 %v1993_v47, %v1928_v12  ;;  %v2026_v11 = vadd.f32 %v1994_v13, %v1929_v43  ;;  %v2690_v12 = vld [vmem:[#allocation2 + $0x8] sm:$0xff] }
 0x183   : > { %v2091_v57 = vmul.f32 %v5369_v0, %v4324_v22  ;;  %v2290_v14 = vmul.f32 %v4342_v61, %v2257_v56  ;;  %2620 = vst.msk [vmem:[#allocation2 + $0x1a8] sm:$0x3] %vm335_vm2, %v5358_v36  ;;  %v2225_v41 = vadd.f32 %v2193_v46, %v2128_v6  ;;  %v2291_v21 = vmul.f32 %v4342_v61, %v2258_v33  ;;  %v2714_v56 = vld [vmem:[#allocation2 + $0x20] sm:$0xff] }
 0x184   : > { %3135 = vmatmul.msk.bf16.vlgmr.msrb.gmra.mxu3 %vm332_vm1, %v2435_v44  ;;  %v2226_v25 = vadd.f32 %v2194_v8, %v2129_v5  ;;  %2638 = vst.msk [vmem:[#allocation2 + $0x198] sm:$0x1] %vm341_vm3, %v5358_v36  ;;  %v1639_v47 = vmul.f32 %v5364_v51, %v4277_v32  ;;  %v1640_v13 = vmul.f32 %v4912_v23, %v4277_v32  ;;  %v2691_v8 = vld [vmem:[#allocation2 + $0x10] sm:$0x3] }
 0x185   : > { %v2506_v4 = vpop.f32.mrf.mxu1  ;;  %2656 = vst.msk [vmem:[#allocation2 + $0x1a9] sm:$0x1] %vm341_vm3, %v5358_v36  ;;  %v1704_v1 = vmul.f32 %v4914_v40, %v5360_v20  ;;  %v1705_v28 = vmul.f32 %v4938_v49, %v5360_v20  ;;  %v2432_v24 = vpack.c.bf16 %v2412_v7, %v2411_v42  ;;  %v2122_v48 = vadd.f32 %v2090_v27, %v2025_v31 }
 0x186   : > { %v2586_v15 = vadd.f32 %v4893_v34, %v2506_v4  ;;  %v2123_v54 = vadd.f32 %v2091_v57, %v2026_v11  ;;  %v2187_v36 = vmul.f32 %v5365_v58, %v4777_v29  ;;  %v2188_v51 = vmul.f32 %v5365_v58, %v4862_v35 }
 0x187   : > { %v2322_v32 = vadd.f32 %v2290_v14, %v2225_v41  ;;  %v2323_v23 = vadd.f32 %v2291_v21, %v2226_v25  ;;  %v2387_v40 = vmul.f32 %v4802_v60, %v2354_v26  ;;  %v2388_v20 = vmul.f32 %v4802_v60, %v2355_v38  ;;  %v5056_v30 = vld [vmem:[#allocation2 + $0x30] sm:$0xff]  ;;  %v2715_v26 = vld [vmem:[#allocation2 + $0x28] sm:$0x3] }
 0x188   : > { %2660 = vst.msk [vmem:[#allocation2 + $0x39] sm:$0xff] %vm332_vm1, %v2586_v15  ;;  %v1736_v49 = vadd.f32 %v1704_v1, %v1639_v47  ;;  %v1737_v63 = vadd.f32 %v1705_v28, %v1640_v13  ;;  %v1801_v53 = vmul.f32 %v4940_v10, %v4291_v59  ;;  %v1802_v19 = vmul.f32 %v5369_v0, %v4291_v59 }
 0x189   : > { %v2737_v43 = vmax.f32 %v2689_v52, %v2713_v45  ;;  %v2219_v16 = vadd.f32 %v2187_v36, %v2122_v48  ;;  %v2284_v9 = vmul.f32 %v4342_v61, %v4872_v37  ;;  %v2285_v46 = vmul.f32 %v4342_v61, %v4874_v2  ;;  %v2897_v52 = vld [vmem:[%s3390_s29 + $0x8] sm:$0xff]  ;;  %v2898_v45 = vld [vmem:[%s3390_s29 + $0x20] sm:$0xff] }
 0x18a   : > { %v2220_v10 = vadd.f32 %v2188_v51, %v2123_v54  ;;  %v2419_v42 = vadd.f32 %v2387_v40, %v2322_v32  ;;  %v2420_v6 = vadd.f32 %v2388_v20, %v2323_v23  ;;  %v1833_v33 = vadd.f32 %v1801_v53, %v1736_v49  ;;  %v2896_v51 = vld [vmem:[%s3390_s29] sm:$0xff]  ;;  %2913 = vst.msk [vmem:[#allocation4 + $0x8] sm:$0xff] %vm443_vm4, %v2897_v52 }
 0x18b   : > { %v2785_v59 = vmax.f32 %v2737_v43, %v5056_v30  ;;  %v1834_v38 = vadd.f32 %v1802_v19, %v1737_v63  ;;  %v1898_v7 = vmul.f32 %v4300_v17, %v4777_v29  ;;  %v1899_v44 = vmul.f32 %v4300_v17, %v4862_v35  ;;  %2912 = vst.msk [vmem:[#allocation4] sm:$0xff] %vm443_vm4, %v2896_v51  ;;  %v5370_v63 = vld [vmem:[#allocation12_spill] sm:$0xff]  ;;  %v2908_v52 = vld [vmem:[%s3390_s29 + $0xc0] sm:$0xff] }
 0x18c   : > { %3132 = vmatmul.msk.bf16.gmra.mxu2 %vm332_vm1, %v2432_v24  ;;  %v2738_v5 = vmax.f32 %v2690_v12, %v2714_v56  ;;  %v2739_v31 = vmax.f32 %v2691_v8, %v2715_v26  ;;  %v2316_v11 = vadd.f32 %v2284_v9, %v2219_v16  ;;  %v2381_v57 = vmul.f32 %v4802_v60, %v4881_v50  ;;  %v5371_v12 = vld [vmem:[#allocation14_spill] sm:$0xff]  ;;  %v5372_v16 = vld [vmem:[#allocation13_spill] sm:$0xff] }
 0x18d   : > { %2809 = vst.msk [vmem:[#allocation3] sm:$0xff] %vm332_vm1, %v2785_v59  ;;  %v2382_v14 = vmul.f32 %v4802_v60, %v4811_v3  ;;  %v2317_v29 = vadd.f32 %v2285_v46, %v2220_v10  ;;  %v2436_v17 = vpack.c.bf16 %v2420_v6, %v2419_v42  ;;  %v1930_v4 = vadd.f32 %v1898_v7, %v1833_v33  ;;  %v2900_v42 = vld [vmem:[%s3390_s29 + $0x40] sm:$0xff]  ;;  %v2901_v6 = vld [vmem:[%s3390_s29 + $0x48] sm:$0xff] }
 0x18e   : > { %v2509_v0 = vpop.f32.mrf.mxu1  ;;  %v1931_v47 = vadd.f32 %v1899_v44, %v1834_v38  ;;  %v1995_v13 = vmul.f32 %v4321_v39, %v4872_v37  ;;  %v1996_v1 = vmul.f32 %v4321_v39, %v4874_v2  ;;  %v2413_v28 = vadd.f32 %v2381_v57, %v2316_v11  ;;  %2914 = vst.msk [vmem:[#allocation4 + $0x10] sm:$0xff] %vm443_vm4, %v2898_v45  ;;  %v2902_v59 = vld [vmem:[%s3390_s29 + $0x60] sm:$0xff]  ;;  %v2903_v33 = vld [vmem:[%s3390_s29 + $0x68] sm:$0xff] }
 0x18f   : > { %v2587_v27 = vadd.f32 %v4893_v34, %v2509_v0  ;;  %v5074_v41 = vld [vmem:[#allocation2 + $0x38] sm:$0xff]  ;;  %v2763_v25 = vld [vmem:[#allocation2 + $0x40] sm:$0x3]  ;;  %v2414_v15 = vadd.f32 %v2382_v14, %v2317_v29  ;;  %v2092_v37 = vmul.f32 %v4324_v22, %v4881_v50  ;;  %v2093_v36 = vmul.f32 %v4324_v22, %v4811_v3  ;;  %v2899_v50 = vld [vmem:[%s3390_s29 + $0x28] sm:$0xff]  ;;  %2916 = vst.msk [vmem:[#allocation4 + $0x20] sm:$0xff] %vm443_vm4, %v2900_v42 }
 0x190   : > { %v2786_v35 = vmax.f32 %v2738_v5, %v5074_v41  ;;  %v2787_v21 = vmax.f32 %v2739_v31, %v2763_v25  ;;  %v2027_v48 = vadd.f32 %v1995_v13, %v1930_v4  ;;  %v2028_v54 = vadd.f32 %v1996_v1, %v1931_v47  ;;  %2915 = vst.msk [vmem:[#allocation4 + $0x18] sm:$0xff] %vm443_vm4, %v2899_v50  ;;  %v2694_v44 = vld [vmem:[#allocation2 + $0x40] sm:$0x3]  ;;  %v2905_v47 = vld [vmem:[%s3390_s29 + $0x88] sm:$0xff] }
 0x191   : > { %2661 = vst.msk [vmem:[#allocation2 + $0x49] sm:$0xff] %vm332_vm1, %v2587_v27  ;;  %v2433_v2 = vpack.c.bf16 %v2414_v15, %v2413_v28  ;;  %v2189_v40 = vmul.f32 %v5365_v58, %v4857_v18  ;;  %v2190_v20 = vmul.f32 %v5365_v58, %v4906_v55  ;;  %v2286_v18 = vmul.f32 %v4342_v61, %v4901_v62  ;;  %v2904_v4 = vld [vmem:[%s3390_s29 + $0x80] sm:$0xff]  ;;  %v2907_v1 = vld [vmem:[%s3390_s29 + $0xa8] sm:$0xff] }
 0x192   : > { %2810 = vst.msk [vmem:[#allocation3 + $0x8] sm:$0xff] %vm332_vm1, %v2786_v35  ;;  %v2124_v32 = vadd.f32 %v2092_v37, %v2027_v48  ;;  %v2125_v23 = vadd.f32 %v2093_v36, %v2028_v54  ;;  %v2287_v58 = vmul.f32 %v4342_v61, %v5370_v63  ;;  %v2383_v43 = vmul.f32 %v4802_v60, %v5371_v12  ;;  %v2928_v29 = vld [vmem:[#allocation4] ss:$2 sm:$0xff]  ;;  %v2906_v13 = vld [vmem:[%s3390_s29 + $0xa0] sm:$0xff]  ;;  %v2909_v45 = vld [vmem:[%s3390_s29 + $0xc8] sm:$0xff] }
 0x193   : > { %2811 = vst.msk [vmem:[#allocation3 + $0x10] sm:$0x3] %vm335_vm2, %v2787_v21  ;;  %v2384_v9 = vmul.f32 %v4802_v60, %v5372_v16 }
 0x194   : > { %3136 = vmatmul.msk.bf16.gmra.mxu3 %vm332_vm1, %v2436_v17  ;;  %v2221_v22 = vadd.f32 %v2189_v40, %v2124_v32  ;;  %v2222_v49 = vadd.f32 %v2190_v20, %v2125_v23  ;;  %2917 = vst.msk [vmem:[#allocation4 + $0x28] sm:$0xff] %vm443_vm4, %v2901_v6  ;;  %v2910_v32 = vld [vmem:[%s3390_s29 + $0xe0] sm:$0xff]  ;;  %v2911_v23 = vld [vmem:[%s3390_s29 + $0xe8] sm:$0xff]  ;;  %s323_s29 = sand.u32 1, %s3256_s10  }
 0x195   : > { %2918 = vst.msk [vmem:[#allocation4 + $0x30] sm:$0xff] %vm443_vm4, %v2902_v59  ;;  %s3102_s27 = sshll.u32 %s323_s29, 6  ;;  %s3021_s13 = scalar_lea.sflag [#allocation6], %s323_s29 }
 0x196   : > { %v2511_v24 = vpop.f32.mrf.mxu1  ;;  %v2318_v53 = vadd.f32 %v2286_v18, %v2221_v22  ;;  %v2319_v19 = vadd.f32 %v2287_v58, %v2222_v49  ;;  %2919 = vst.msk [vmem:[#allocation4 + $0x38] sm:$0xff] %vm443_vm4, %v2903_v33  ;;  %s5221_s16 = scalar_lea.vmem [#allocation5], %s3102_s27  ;;  %s3218_s27 = scalar_lea.hbm %s3217_s26, 64 }
 0x197   : > { %v2588_v39 = vadd.f32 %v4893_v34, %v2511_v24  ;;  %v2930_v17 = vld [vmem:[#allocation4 + $0x10] ss:$2 sm:$0xff]  ;;  %2920 = vst.msk [vmem:[#allocation4 + $0x40] sm:$0xff] %vm443_vm4, %v2904_v4  ;;  %s3033_s24 = sshll.u32 %s5221_s16, 4  ;;  %p3219_p11 = scmp.ne.s32.totalorder %s3217_s26, %s3218_s27  ;;  %s3034_s24 = int_to_ptr.vmem [resolvable:$true] %s3033_s24 }
 0x198   : > { %v2716_v62 = vld [vmem:[#allocation2 + $0x48] sm:$0xff]  ;;  %v2415_v8 = vadd.f32 %v2383_v43, %v2318_v53  ;;  %v2416_v56 = vadd.f32 %v2384_v9, %v2319_v19  ;;  %2921 = vst.msk [vmem:[#allocation4 + $0x48] sm:$0xff] %vm443_vm4, %v2905_v47  ;;  %p3224_p1 = scmp.lt.s32.totalorder %s3222_s17, %s3218_s27 }
 0x199   : > { %2662 = vst.msk [vmem:[#allocation2 + $0x51] sm:$0xff] %vm332_vm1, %v2588_v39  ;;  %v2740_v26 = vmax.f32 %v5056_v30, %v2716_v62  ;;  %p3220_p12 = pnand %p3219_p11, %p3358_p5 }
 0x19a   : > { %v2434_v0 = vpack.c.bf16 %v2416_v56, %v2415_v8  ;;  %2922 = vst.msk [vmem:[#allocation4 + $0x50] sm:$0xff] %vm443_vm4, %v2906_v13  ;;  %p3225_p2 = por %p3224_p1, %p3223_p0 }
 0x19b   : > { %2923 = vst.msk [vmem:[#allocation4 + $0x58] sm:$0xff] %vm443_vm4, %v2907_v1  ;;  %v2932_v24 = vld [vmem:[#allocation4 + $0x20] ss:$2 sm:$0xff]  ;;  %p3221_p13 = pneg %p3220_p12 }
 0x19c   : > { %3133 = vmatmul.msk.bf16.gmra.mxu2 %vm332_vm1, %v2433_v2  ;;  %2924 = vst.msk [vmem:[#allocation4 + $0x60] sm:$0xff] %vm443_vm4, %v2908_v52 }
 0x19d   : > { %v2934_v48 = vld [vmem:[#allocation4 + $0x30] ss:$2 sm:$0xff]  ;;  %2925 = vst.msk [vmem:[#allocation4 + $0x68] sm:$0xff] %vm443_vm4, %v2909_v45  ;;  %p3226_p3 = pnand %p3225_p2, %p3221_p13 }
 0x19e   : > { %v2514_v3 = vpop.f32.mrf.mxu1  ;;  %v2944_v39 = vpack.c.bf16 %v2934_v48, %v2932_v24  ;;  %2926 = vst.msk [vmem:[#allocation4 + $0x70] sm:$0xff] %vm443_vm4, %v2910_v32 }
 0x19f   : > { %v2589_v55 = vadd.f32 %v4893_v34, %v2514_v3  ;;  %2927 = vst.msk [vmem:[#allocation4 + $0x78] sm:$0xff] %vm443_vm4, %v2911_v23  ;;  %v2936_v12 = vld [vmem:[#allocation4 + $0x40] ss:$2 sm:$0xff] }
 0x1a0   : > { %v2717_v60 = vld [vmem:[#allocation2 + $0x50] sm:$0xff]  ;;  %v2718_v7 = vld [vmem:[#allocation2 + $0x58] sm:$0x3] }
 0x1a1   : > { %2663 = vst.msk [vmem:[#allocation2 + $0x61] sm:$0xff] %vm332_vm1, %v2589_v55  ;;  %v2741_v5 = vmax.f32 %v5074_v41, %v2717_v60  ;;  %v2742_v31 = vmax.f32 %v2694_v44, %v2718_v7  ;;  %v2943_v41 = vpack.c.bf16 %v2930_v17, %v2928_v29 }
 0x1a2   : > { %v2938_v43 = vld [vmem:[#allocation4 + $0x50] ss:$2 sm:$0xff] }
 0x1a3   : > { %v2945_v62 = vpack.c.bf16 %v2938_v43, %v2936_v12 }
 0x1a6   : > { %v2516_v46 = vpop.f32.mrf.mxu1 }
 0x1a7   : > { %v2590_v61 = vadd.f32 %v4893_v34, %v2516_v46 }
 0x1a8   : > { %v2764_v10 = vld [vmem:[#allocation2 + $0x60] sm:$0xff] }
 0x1a9   : > { %2664 = vst.msk [vmem:[#allocation2 + $0x69] sm:$0xff] %vm332_vm1, %v2590_v61  ;;  %v2788_v38 = vmax.f32 %v2740_v26, %v2764_v10  ;;  %v2940_v61 = vld [vmem:[#allocation4 + $0x60] ss:$2 sm:$0xff]  ;;  %v2942_v26 = vld [vmem:[#allocation4 + $0x70] ss:$2 sm:$0xff] }
 0x1aa   : > { %v2946_v59 = vpack.c.bf16 %v2942_v26, %v2940_v61 }
 0x1ab   : > { %2812 = vst.msk [vmem:[#allocation3 + $0x18] sm:$0xff] %vm332_vm1, %v2788_v38 }
 0x1ac   : > { %3134 = vmatmul.msk.bf16.gmra.mxu2 %vm332_vm1, %v2434_v0 }
 0x1ae   : > { %v2519_v30 = vpop.f32.mrf.mxu1 }
 0x1af   : > { %v2591_v27 = vadd.f32 %v4893_v34, %v2519_v30 }
 0x1b0   : > { %v2765_v11 = vld [vmem:[#allocation2 + $0x68] sm:$0xff]  ;;  %v2766_v57 = vld [vmem:[#allocation2 + $0x70] sm:$0x3] }
 0x1b1   : > { %2665 = vst.msk [vmem:[#allocation2 + $0x79] sm:$0xff] %vm332_vm1, %v2591_v27  ;;  %v2789_v14 = vmax.f32 %v2741_v5, %v2765_v11  ;;  %v2790_v25 = vmax.f32 %v2742_v31, %v2766_v57  ;;  %v2697_v22 = vld [vmem:[#allocation2 + $0x70] sm:$0x3] }
 0x1b3   : > { %2813 = vst.msk [vmem:[#allocation3 + $0x20] sm:$0xff] %vm332_vm1, %v2789_v14 }
 0x1b4   : > { %2814 = vst.msk [vmem:[#allocation3 + $0x28] sm:$0x3] %vm335_vm2, %v2790_v25 }
 0x1b6   : > { %v2521_v35 = vpop.f32.mrf.mxu1 }
 0x1b7   : > { %v2592_v21 = vadd.f32 %v4893_v34, %v2521_v35 }
 0x1b8   : > { %v2719_v54 = vld [vmem:[#allocation2 + $0x78] sm:$0xff] }
 0x1b9   : > { %2666 = vst.msk [vmem:[#allocation2 + $0x81] sm:$0xff] %vm332_vm1, %v2592_v21  ;;  %v2743_v2 = vmax.f32 %v2764_v10, %v2719_v54 }
 0x1bc   : > { %3137 = vmatmul.msk.bf16.vlgmr.msrb.gmra.mxu2 %vm443_vm4, %v2943_v41 }
 0x1be   : > { %v2524_v28 = vpop.f32.mrf.mxu1 }
 0x1bf   : > { %v2593_v15 = vadd.f32 %v4893_v34, %v2524_v28 }
 0x1c0   : > { %v2720_v20 = vld [vmem:[#allocation2 + $0x80] sm:$0xff]  ;;  %v2721_v50 = vld [vmem:[#allocation2 + $0x88] sm:$0x3] }
 0x1c1   : > { %2667 = vst.msk [vmem:[#allocation2 + $0x91] sm:$0xff] %vm332_vm1, %v2593_v15  ;;  %v2744_v18 = vmax.f32 %v2765_v11, %v2720_v20  ;;  %v2745_v63 = vmax.f32 %v2697_v22, %v2721_v50 }
 0x1c6   : > { %v2526_v37 = vpop.f32.mrf.mxu1 }
 0x1c7   : > { %v2594_v36 = vadd.f32 %v4893_v34, %v2526_v37 }
 0x1c8   : > { %v2767_v51 = vld [vmem:[#allocation2 + $0x90] sm:$0xff] }
 0x1c9   : > { %2668 = vst.msk [vmem:[#allocation2 + $0x99] sm:$0xff] %vm332_vm1, %v2594_v36  ;;  %v2791_v40 = vmax.f32 %v2743_v2, %v2767_v51 }
 0x1cb   : > { %2815 = vst.msk [vmem:[#allocation3 + $0x30] sm:$0xff] %vm332_vm1, %v2791_v40 }
 0x1cc   : > { %3138 = vmatmul.msk.bf16.gmra.mxu2 %vm443_vm4, %v2944_v39 }
 0x1ce   : > { %v2529_v3 = vpop.f32.mrf.mxu1 }
 0x1cf   : > { %v2595_v49 = vadd.f32 %v4893_v34, %v2529_v3 }
 0x1d0   : > { %v2768_v58 = vld [vmem:[#allocation2 + $0x98] sm:$0xff]  ;;  %v2769_v55 = vld [vmem:[#allocation2 + $0xa0] sm:$0x3] }
 0x1d1   : > { %2669 = vst.msk [vmem:[#allocation2 + $0xa9] sm:$0xff] %vm332_vm1, %v2595_v49  ;;  %v2792_v53 = vmax.f32 %v2744_v18, %v2768_v58  ;;  %v2793_v19 = vmax.f32 %v2745_v63, %v2769_v55  ;;  %v2700_v30 = vld [vmem:[#allocation2 + $0xa0] sm:$0x3] }
 0x1d3   : > { %2816 = vst.msk [vmem:[#allocation3 + $0x38] sm:$0xff] %vm332_vm1, %v2792_v53 }
 0x1d4   : > { %2817 = vst.msk [vmem:[#allocation3 + $0x40] sm:$0x3] %vm335_vm2, %v2793_v19 }
 0x1d6   : > { %v2531_v16 = vpop.f32.mrf.mxu1 }
 0x1d7   : > { %v2596_v9 = vadd.f32 %v4893_v34, %v2531_v16 }
 0x1d8   : > { %v2722_v56 = vld [vmem:[#allocation2 + $0xa8] sm:$0xff] }
 0x1d9   : > { %2670 = vst.msk [vmem:[#allocation2 + $0xb1] sm:$0xff] %vm332_vm1, %v2596_v9  ;;  %v2746_v6 = vmax.f32 %v2767_v51, %v2722_v56 }
 0x1dc   : > { %3139 = vmatmul.msk.bf16.gmra.mxu2 %vm443_vm4, %v2945_v62 }
 0x1de   : > { %v2534_v46 = vpop.f32.mrf.mxu1 }
 0x1df   : > { %v2597_v8 = vadd.f32 %v4893_v34, %v2534_v46 }
 0x1e0   : > { %v2723_v38 = vld [vmem:[#allocation2 + $0xb0] sm:$0xff]  ;;  %v2724_v60 = vld [vmem:[#allocation2 + $0xb8] sm:$0x3] }
 0x1e1   : > { %2671 = vst.msk [vmem:[#allocation2 + $0xc1] sm:$0xff] %vm332_vm1, %v2597_v8  ;;  %v2747_v5 = vmax.f32 %v2768_v58, %v2723_v38  ;;  %v2748_v31 = vmax.f32 %v2700_v30, %v2724_v60 }
 0x1e6   : > { %v2536_v10 = vpop.f32.mrf.mxu1 }
 0x1e7   : > { %v2598_v42 = vadd.f32 %v4893_v34, %v2536_v10 }
 0x1e8   : > { %v2770_v0 = vld [vmem:[#allocation2 + $0xc0] sm:$0xff] }
 0x1e9   : > { %2672 = vst.msk [vmem:[#allocation2 + $0xc9] sm:$0xff] %vm332_vm1, %v2598_v42  ;;  %v2794_v33 = vmax.f32 %v2746_v6, %v2770_v0 }
 0x1eb   : > { %2818 = vst.msk [vmem:[#allocation3 + $0x48] sm:$0xff] %vm332_vm1, %v2794_v33 }
 0x1ec   : > { %3140 = vmatmul.msk.bf16.gmra.mxu2 %vm443_vm4, %v2946_v59 }
 0x1ee   : > { %v2539_v7 = vpop.f32.mrf.mxu1 }
 0x1ef   : > { %v2599_v44 = vadd.f32 %v4893_v34, %v2539_v7  ;;  %v2544_v27 = vpop.f32.mrf.mxu2 }
 0x1f0   : > { %v2601_v11 = vadd.f32 %v4893_v34, %v2544_v27  ;;  %v2771_v57 = vld [vmem:[#allocation2 + $0xc8] sm:$0xff]  ;;  %v2772_v14 = vld [vmem:[#allocation2 + $0xd0] sm:$0x3] }
 0x1f1   : > { %2673 = vst.msk [vmem:[#allocation2 + $0xd9] sm:$0xff] %vm332_vm1, %v2599_v44  ;;  %v2795_v25 = vmax.f32 %v2747_v5, %v2771_v57  ;;  %v2796_v29 = vmax.f32 %v2748_v31, %v2772_v14  ;;  %v2703_v24 = vld [vmem:[#allocation2 + $0xd0] sm:$0x3] }
 0x1f2   : > { %2675 = vst.msk [vmem:[#allocation2 + $0xf1] sm:$0xff] %vm332_vm1, %v2601_v11  ;;  %v2833_v44 = vld [vmem:[#allocation3] ss:$2 sm:$0xff]  ;;  %v2849_v27 = vld [vmem:[#allocation3 + $0x1] ss:$2 sm:$0xff] }
 0x1f3   : > { %2819 = vst.msk [vmem:[#allocation3 + $0x50] sm:$0xff] %vm332_vm1, %v2795_v25  ;;  %v2864_v14 = vmax.f32 %v2833_v44, %v2849_v27 }
 0x1f4   : > { %2820 = vst.msk [vmem:[#allocation3 + $0x58] sm:$0x3] %vm335_vm2, %v2796_v29 }
 0x1f6   : > { %v2541_v17 = vpop.f32.mrf.mxu1 }
 0x1f7   : > { %v2600_v35 = vadd.f32 %v4893_v34, %v2541_v17  ;;  %v2546_v21 = vpop.f32.mrf.mxu2 }
 0x1f8   : > { %v2602_v41 = vadd.f32 %v4893_v34, %v2546_v21  ;;  %v2725_v4 = vld [vmem:[#allocation2 + $0xd8] sm:$0xff] }
 0x1f9   : > { %2674 = vst.msk [vmem:[#allocation2 + $0xe1] sm:$0xff] %vm332_vm1, %v2600_v35  ;;  %v2749_v47 = vmax.f32 %v2770_v0, %v2725_v4  ;;  %v2773_v13 = vld [vmem:[#allocation2 + $0xf0] sm:$0xff] }
 0x1fa   : > { %2676 = vst.msk [vmem:[#allocation2 + $0xf9] sm:$0xff] %vm332_vm1, %v2602_v41  ;;  %v2873_v35 = vld [vmem:[#allocation3 + $0x2] ss:$2 sm:$0xff] }
 0x1fb   : > { %v2797_v1 = vmax.f32 %v2749_v47, %v2773_v13  ;;  %v2835_v41 = vld [vmem:[#allocation3 + $0x18] ss:$2 sm:$0xff] }
 0x1fd   : > { %2821 = vst.msk [vmem:[#allocation3 + $0x60] sm:$0xff] %vm332_vm1, %v2797_v1  ;;  %v2851_v1 = vld [vmem:[#allocation3 + $0x19] ss:$2 sm:$0xff] }
 0x1ff   : > { %v2549_v28 = vpop.f32.mrf.mxu2 }
 0x200   : > { %v2603_v15 = vadd.f32 %v4893_v34, %v2549_v28  ;;  %v2726_v48 = vld [vmem:[#allocation2 + $0xe0] sm:$0xff]  ;;  %v2727_v54 = vld [vmem:[#allocation2 + $0xe8] sm:$0x3] }
 0x201   : > { %v2750_v37 = vmax.f32 %v2771_v57, %v2726_v48  ;;  %v2751_v36 = vmax.f32 %v2703_v24, %v2727_v54  ;;  %v2774_v39 = vld [vmem:[#allocation2 + $0xf8] sm:$0xff]  ;;  %v2775_v2 = vld [vmem:[#allocation2 + $0x100] sm:$0x3] }
 0x202   : > { %2677 = vst.msk [vmem:[#allocation2 + $0x109] sm:$0xff] %vm332_vm1, %v2603_v15  ;;  %v2706_v62 = vld [vmem:[#allocation2 + $0x100] sm:$0x3] }
 0x203   : > { %v2798_v51 = vmax.f32 %v2750_v37, %v2774_v39  ;;  %v2799_v52 = vmax.f32 %v2751_v36, %v2775_v2  ;;  %v2865_v36 = vmax.f32 %v2835_v41, %v2851_v1 }
 0x205   : > { %2822 = vst.msk [vmem:[#allocation3 + $0x68] sm:$0xff] %vm332_vm1, %v2798_v51 }
 0x206   : > { %2823 = vst.msk [vmem:[#allocation3 + $0x70] sm:$0x3] %vm335_vm2, %v2799_v52 }
 0x207   : > { %v2551_v45 = vpop.f32.mrf.mxu2  ;;  %v2569_v23 = vpop.f32.mrf.mxu3 }
 0x208   : > { %v2604_v32 = vadd.f32 %v4893_v34, %v2551_v45  ;;  %v2611_v40 = vadd.f32 %v4893_v34, %v2569_v23 }
 0x209   : > { %v2728_v49 = vld [vmem:[#allocation2 + $0x108] sm:$0xff] }
 0x20a   : > { %2678 = vst.msk [vmem:[#allocation2 + $0x111] sm:$0xff] %vm332_vm1, %v2604_v32  ;;  %v2752_v55 = vmax.f32 %v2773_v13, %v2728_v49  ;;  %v5217_v13 = vld [vmem:[%s5292_s8] ss:$0 sm:$0xff]  ;;  %v2875_v49 = vld [vmem:[#allocation3 + $0x1a] ss:$2 sm:$0xff] }
 0x20b   : > { %2685 = vst.msk [vmem:[#allocation2 + $0x169] sm:$0xff] %vm332_vm1, %v2611_v40 }
 0x20f   : > { %v2554_v20 = vpop.f32.mrf.mxu2  ;;  %v2571_v3 = vpop.f32.mrf.mxu3 }
 0x210   : > { %v2605_v50 = vadd.f32 %v4893_v34, %v2554_v20  ;;  %v2612_v22 = vadd.f32 %v4893_v34, %v2571_v3 }
 0x211   : > { %v2729_v43 = vld [vmem:[#allocation2 + $0x110] sm:$0xff]  ;;  %v2730_v16 = vld [vmem:[#allocation2 + $0x118] sm:$0x3] }
 0x212   : > { %2679 = vst.msk [vmem:[#allocation2 + $0x121] sm:$0xff] %vm332_vm1, %v2605_v50  ;;  %v2753_v56 = vmax.f32 %v2774_v39, %v2729_v43  ;;  %v2754_v61 = vmax.f32 %v2706_v62, %v2730_v16  ;;  %v2734_v57 = vld [vmem:[#allocation2 + $0x168] sm:$0xff] }
 0x213   : > { %2686 = vst.msk [vmem:[#allocation2 + $0x171] sm:$0xff] %vm332_vm1, %v2612_v22  ;;  %v2877_v16 = vld [vmem:[#allocation3 + $0x32] ss:$2 sm:$0xff] }
 0x217   : > { %v2556_v18 = vpop.f32.mrf.mxu2  ;;  %v2574_v58 = vpop.f32.mrf.mxu3 }
 0x218   : > { %v2606_v63 = vadd.f32 %v4893_v34, %v2556_v18  ;;  %v2613_v53 = vadd.f32 %v4893_v34, %v2574_v58 }
 0x219   : > { %v2776_v19 = vld [vmem:[#allocation2 + $0x120] sm:$0xff] }
 0x21a   : > { %2680 = vst.msk [vmem:[#allocation2 + $0x129] sm:$0xff] %vm332_vm1, %v2606_v63  ;;  %v2800_v12 = vmax.f32 %v2752_v55, %v2776_v19  ;;  %v2735_v37 = vld [vmem:[#allocation2 + $0x170] sm:$0xff]  ;;  %v2736_v23 = vld [vmem:[#allocation2 + $0x178] sm:$0x3]  ;;  %v2889_v63 = vmax.f32 %v2865_v36, %v2875_v49  ;;  %v2837_v55 = vld [vmem:[#allocation3 + $0x30] ss:$2 sm:$0xff] }
 0x21b   : > { %2687 = vst.msk [vmem:[#allocation2 + $0x181] sm:$0xff] %vm332_vm1, %v2613_v53  ;;  %v2853_v53 = vld [vmem:[#allocation3 + $0x31] ss:$2 sm:$0xff] }
 0x21c   : > { %2824 = vst.msk [vmem:[#allocation3 + $0x78] sm:$0xff] %vm332_vm1, %v2800_v12  ;;  %v2866_v43 = vmax.f32 %v2837_v55, %v2853_v53 }
 0x21f   : > { %v2559_v9 = vpop.f32.mrf.mxu2  ;;  %v2576_v8 = vpop.f32.mrf.mxu3 }
 0x220   : > { %v2607_v46 = vadd.f32 %v4893_v34, %v2559_v9  ;;  %v2614_v26 = vadd.f32 %v4893_v34, %v2576_v8  ;;  %v2890_v9 = vmax.f32 %v2866_v43, %v2877_v16  ;;  %v2855_v8 = vld [vmem:[#allocation3 + $0x49] ss:$2 sm:$0xff] }
 0x221   : > { %v2777_v10 = vld [vmem:[#allocation2 + $0x128] sm:$0xff]  ;;  %v2778_v42 = vld [vmem:[#allocation2 + $0x130] sm:$0x3] }
 0x222   : > { %2681 = vst.msk [vmem:[#allocation2 + $0x139] sm:$0xff] %vm332_vm1, %v2607_v46  ;;  %v2801_v6 = vmax.f32 %v2753_v56, %v2777_v10  ;;  %v2802_v59 = vmax.f32 %v2754_v61, %v2778_v42  ;;  %v2782_v17 = vld [vmem:[#allocation2 + $0x180] sm:$0xff]  ;;  %v2709_v15 = vld [vmem:[#allocation2 + $0x130] sm:$0x3] }
 0x223   : > { %2688 = vst.msk [vmem:[#allocation2 + $0x189] sm:$0xff] %vm332_vm1, %v2614_v26  ;;  %v2839_v46 = vld [vmem:[#allocation3 + $0x48] ss:$2 sm:$0xff] }
 0x224   : > { %2825 = vst.msk [vmem:[#allocation3 + $0x80] sm:$0xff] %vm332_vm1, %v2801_v6  ;;  %v2867_v26 = vmax.f32 %v2839_v46, %v2855_v8 }
 0x225   : > { %2826 = vst.msk [vmem:[#allocation3 + $0x88] sm:$0x3] %vm335_vm2, %v2802_v59  ;;  %v2841_v59 = vld [vmem:[#allocation3 + $0x60] ss:$2 sm:$0xff] }
 0x227   : > { %v2561_v0 = vpop.f32.mrf.mxu2 }
 0x228   : > { %v2608_v33 = vadd.f32 %v4893_v34, %v2561_v0  ;;  %v2857_v0 = vld [vmem:[#allocation3 + $0x61] ss:$2 sm:$0xff] }
 0x229   : > { %v2731_v7 = vld [vmem:[#allocation2 + $0x138] sm:$0xff] }
 0x22a   : > { %2682 = vst.msk [vmem:[#allocation2 + $0x141] sm:$0xff] %vm332_vm1, %v2608_v33  ;;  %v2755_v31 = vmax.f32 %v2776_v19, %v2731_v7  ;;  %v2783_v50 = vld [vmem:[#allocation2 + $0x188] sm:$0xff]  ;;  %v2784_v3 = vld [vmem:[#allocation2 + $0x190] sm:$0x3]  ;;  %v2881_v7 = vld [vmem:[#allocation3 + $0x62] ss:$2 sm:$0xff] }
 0x22b   : > { %v2843_v27 = vld [vmem:[#allocation3 + $0x78] ss:$2 sm:$0xff] }
 0x22f   : > { %v2564_v38 = vpop.f32.mrf.mxu2 }
 0x230   : > { %v2609_v60 = vadd.f32 %v4893_v34, %v2564_v38 }
 0x231   : > { %v2732_v4 = vld [vmem:[#allocation2 + $0x140] sm:$0xff]  ;;  %v2733_v47 = vld [vmem:[#allocation2 + $0x148] sm:$0x3] }
 0x232   : > { %2683 = vst.msk [vmem:[#allocation2 + $0x151] sm:$0xff] %vm332_vm1, %v2609_v60  ;;  %v2756_v48 = vmax.f32 %v2777_v10, %v2732_v4  ;;  %v2757_v54 = vmax.f32 %v2709_v15, %v2733_v47  ;;  %v2879_v10 = vld [vmem:[#allocation3 + $0x4a] ss:$2 sm:$0xff]  ;;  %v2868_v60 = vmax.f32 %v2841_v59, %v2857_v0 }
 0x233   : > { %v2891_v42 = vmax.f32 %v2867_v26, %v2879_v10 }
 0x237   : > { %v2566_v30 = vpop.f32.mrf.mxu2 }
 0x238   : > { %v2610_v5 = vadd.f32 %v4893_v34, %v2566_v30  ;;  %v2888_v34 = vmax.f32 %v2864_v14, %v2873_v35  ;;  %v2892_v30 = vmax.f32 %v2868_v60, %v2881_v7  ;;  %v2883_v14 = vld [vmem:[#allocation3 + $0x7a] ss:$2 sm:$0xff] }
 0x239   : > { %v2779_v11 = vld [vmem:[#allocation2 + $0x150] sm:$0xff] }
 0x23a   : > { %2684 = vst.msk [vmem:[#allocation2 + $0x159] sm:$0xff] %vm332_vm1, %v2610_v5  ;;  %v2803_v25 = vmax.f32 %v2755_v31, %v2779_v11  ;;  %v2758_v29 = vmax.f32 %v2779_v11, %v2734_v57  ;;  %v2859_v5 = vld [vmem:[#allocation3 + $0x79] ss:$2 sm:$0xff] }
 0x23b   : > { %v2869_v57 = vmax.f32 %v2843_v27, %v2859_v5 }
 0x23c   : > { %2827 = vst.msk [vmem:[#allocation3 + $0x90] sm:$0xff] %vm332_vm1, %v2803_v25  ;;  %v2806_v21 = vmax.f32 %v2758_v29, %v2782_v17 }
 0x23d   : > { %v2893_v25 = vmax.f32 %v2869_v57, %v2883_v14 }
 0x23e   : > { %2830 = vst.msk [vmem:[#allocation3 + $0xa8] sm:$0xff] %vm332_vm1, %v2806_v21 }
 0x23f   : > { %v2972_v28 = vpop.f32.mrf.mxu2 }
 0x240   : > { %v2992_v24 = vadd.f32 %v2972_v28, %v2888_v34 }
 0x241   : > { %v2780_v39 = vld [vmem:[#allocation2 + $0x158] sm:$0xff]  ;;  %v2781_v2 = vld [vmem:[#allocation2 + $0x160] sm:$0x3] }
 0x242   : > { %v2712_v51 = vld [vmem:[#allocation2 + $0x160] sm:$0x3]  ;;  %v3004_v52 = vadd.f32 %v5217_v13, %v2992_v24  ;;  %v2804_v45 = vmax.f32 %v2756_v48, %v2780_v39  ;;  %v2805_v32 = vmax.f32 %v2757_v54, %v2781_v2  ;;  %v2759_v40 = vmax.f32 %v2780_v39, %v2735_v37 }
 0x243   : > { %v2760_v20 = vmax.f32 %v2712_v51, %v2736_v23 }
 0x244   : > { %3012 = vst.msk [vmem:[%s5221_s16] sm:$0xff] %vm332_vm1, %v3004_v52  ;;  %v2807_v22 = vmax.f32 %v2759_v40, %v2783_v50 }
 0x245   : > { %2828 = vst.msk [vmem:[#allocation3 + $0x98] sm:$0xff] %vm332_vm1, %v2804_v45  ;;  %v2808_v18 = vmax.f32 %v2760_v20, %v2784_v3 }
 0x246   : > { %2829 = vst.msk [vmem:[#allocation3 + $0xa0] sm:$0x3] %vm335_vm2, %v2805_v32 }
 0x247   : > { %v2974_v58 = vpop.f32.mrf.mxu2  ;;  %2831 = vst.msk [vmem:[#allocation3 + $0xb0] sm:$0xff] %vm332_vm1, %v2807_v22 }
 0x248   : > { %v2993_v19 = vadd.f32 %v2974_v58, %v2889_v63  ;;  %2832 = vst.msk [vmem:[#allocation3 + $0xb8] sm:$0x3] %vm335_vm2, %v2808_v18 }
 0x24a   : > { %v3005_v12 = vadd.f32 %v5217_v13, %v2993_v19 }
 0x24c   : > { %3013 = vst.msk [vmem:[%s5221_s16 + $0x8] sm:$0xff] %vm332_vm1, %v3005_v12  ;;  %v2845_v17 = vld [vmem:[#allocation3 + $0x90] ss:$2 sm:$0xff]  ;;  %v2861_v35 = vld [vmem:[#allocation3 + $0x91] ss:$2 sm:$0xff] }
 0x24d   : > { %v2870_v4 = vmax.f32 %v2845_v17, %v2861_v35  ;;  %v2885_v47 = vld [vmem:[#allocation3 + $0x92] ss:$2 sm:$0xff] }
 0x24e   : > { %v2847_v28 = vld [vmem:[#allocation3 + $0xa8] ss:$2 sm:$0xff]  ;;  %v2863_v15 = vld [vmem:[#allocation3 + $0xa9] ss:$2 sm:$0xff] }
 0x24f   : > { %v2977_v62 = vpop.f32.mrf.mxu2  ;;  %v2894_v34 = vmax.f32 %v2870_v4, %v2885_v47  ;;  %v2871_v54 = vmax.f32 %v2847_v28, %v2863_v15  ;;  %v2887_v37 = vld [vmem:[#allocation3 + $0xaa] ss:$2 sm:$0xff] }
 0x250   : > { %v2994_v56 = vadd.f32 %v2977_v62, %v2890_v9 }
 0x251   : > { %v2895_v36 = vmax.f32 %v2871_v54, %v2887_v37 }
 0x252   : > { %v3006_v61 = vadd.f32 %v5217_v13, %v2994_v56 }
 0x254   : > { %3014 = vst.msk [vmem:[%s5221_s16 + $0x10] sm:$0xff] %vm332_vm1, %v3006_v61 }
 0x257   : > { %v2979_v6 = vpop.f32.mrf.mxu2 }
 0x258   : > { %v2995_v33 = vadd.f32 %v2979_v6, %v2891_v42 }
 0x25a   : > { %v3007_v38 = vadd.f32 %v5217_v13, %v2995_v33 }
 0x25c   : > { %3015 = vst.msk [vmem:[%s5221_s16 + $0x18] sm:$0xff] %vm332_vm1, %v3007_v38 }
 0x25f   : > { %v2982_v44 = vpop.f32.mrf.mxu2 }
 0x260   : > { %v2996_v31 = vadd.f32 %v2982_v44, %v2892_v30 }
 0x262   : > { %v3008_v11 = vadd.f32 %v5217_v13, %v2996_v31 }
 0x264   : > { %3016 = vst.msk [vmem:[%s5221_s16 + $0x20] sm:$0xff] %vm332_vm1, %v3008_v11 }
 0x267   : > { %v2984_v29 = vpop.f32.mrf.mxu2 }
 0x268   : > { %v2997_v21 = vadd.f32 %v2984_v29, %v2893_v25 }
 0x26a   : > { %v3009_v41 = vadd.f32 %v5217_v13, %v2997_v21 }
 0x26c   : > { %3017 = vst.msk [vmem:[%s5221_s16 + $0x28] sm:$0xff] %vm332_vm1, %v3009_v41 }
 0x26f   : > { %v2987_v1 = vpop.f32.mrf.mxu2 }
 0x270   : > { %v2998_v24 = vadd.f32 %v2987_v1, %v2894_v34 }
 0x272   : > { %v3010_v48 = vadd.f32 %v5217_v13, %v2998_v24 }
 0x274   : > { %3018 = vst.msk [vmem:[%s5221_s16 + $0x30] sm:$0xff] %vm332_vm1, %v3010_v48 }
 0x277   : > { %v2989_v39 = vpop.f32.mrf.mxu2 }
 0x278   : > { %v2999_v2 = vadd.f32 %v2989_v39, %v2895_v36 }
 0x27a   : > { %v3011_v51 = vadd.f32 %v5217_v13, %v2999_v2 }
 0x27c   : > { %3019 = vst.msk [vmem:[%s5221_s16 + $0x38] sm:$0xff] %vm332_vm1, %v3011_v51 }
 0x27d   : > { %3229 = shalt.err (!%p3226_p3)
}
 0x27e   : > { %s3268_s29 = smov 128   ;;  %s3269_s16 = smov 8  }
 0x27f   : > { %3151 = dma.vmem_to_hbm [thread:$0]  (%p3358_p5), %s3034_s24, 1024, %s3036_s25, %s3021_s13, %s3268_s29, %s3268_s29, %s3269_s16  }
 0x280 PF: > { %p3157_p4 = scmp.ge.s32.totalorder %s3264_s12, 2  ;;  %s3050_s23 = sand.u32 1, %s3252_s30  }
 0x281   : > { %s3051_s28 = scalar_lea.sflag [#allocation6], %s3050_s23 }
 0x282   : > { %p3154_p7 = pnand %p3157_p4, %p3362_p6 }
 0x284   : > { %p3155_p8 = pneg %p3154_p7 }
 0x286   : > { %3247 = dma.done.wait (%p3155_p8), %s3051_s28, 1024  }
 0x287   : > { %3249 = vsyncadd (%p3155_p8), %s3051_s28, 4294966272  ;;  %p19_p9 = scmp.ge.s32.totalorder %s3345_s15, 4   ;;  %s5373_s30 = smov %s3256_s10 }
 0x288   : > { %s5374_s10 = smov %s3260_s11  ;;  %s5375_s11 = smov %s3356_s18 }
 0x289   : > { %s5376_s12 = smov %s3345_s15  ;;  %21 = sbr.rel (!%p19_p9) target bundleno = 3 (0x3), region = 124 }
 0x28e   :  { %3057 = vsyncpa [#allocation6], 1 }
 0x28f   :  { %3059 = vsyncpa [#allocation6 + $0x1], 1 }

</bundles_post_ra>
